<compile_context>
chip_gen: v7x
topology: tpu7x:2x2x1
jax: 0.10.0
libtpu: 0.0.40
codegen_flags: <defaults>
</compile_context>

<pallas_src>
import jax
import jax.numpy as jnp
from jax.experimental import pallas as pl
from jax.experimental.pallas import tpu as pltpu

_BN_EPS = 1e-5
_LRELU_SLOPE = 0.2
_KSIZE = 4
_STRIDE = 2
_LANE = 128
_VMEM_LIMIT = 32 * 1024 * 1024  # safe on v5e/v6e (128 MiB) and v7x (64 MiB)


def _round_up(x, m):
    return ((x + m - 1) // m) * m


# ---------------------------------------------------------------------------
# Pallas kernels
# ---------------------------------------------------------------------------
def _gemm_stats_kernel(x_ref, w_ref, y_ref, sum_ref, sq_ref):
    """BN-block pass 1: bf16 GEMM (f32 acc), bf16 conv output, f32 per-channel
    sum / sumsq accumulated across the inner ("arbitrary") M grid axis.

    x_ref: (TILE_M, K_pad) bf16     w_ref: (K_pad, C_pad) bf16 (resident)
    y_ref: (TILE_M, C_pad) bf16     sum_ref/sq_ref: (1, C_pad) f32 per split
    """
    j = pl.program_id(1)
    acc = jnp.dot(x_ref[...], w_ref[...], preferred_element_type=jnp.float32)
    y_ref[...] = acc.astype(y_ref.dtype)

    @pl.when(j == 0)
    def _():
        sum_ref[...] = jnp.zeros_like(sum_ref)
        sq_ref[...] = jnp.zeros_like(sq_ref)

    sum_ref[...] += jnp.sum(acc, axis=0, keepdims=True)
    sq_ref[...] += jnp.sum(acc * acc, axis=0, keepdims=True)


def _make_bn_lrelu_kernel(inv_m, n_split, c_pad):
    """BN-block pass 2: in-kernel BN fold + affine + LeakyReLU(0.2).

    y_ref: (TILE_M, C_pad) bf16
    sum_ref/sq_ref: (1, n_split*C_pad) f32 partial stats (lane-concatenated)
    gamma_ref/beta_ref: (1, C_pad) f32
    o_ref: (TILE_M, C_pad) bf16
    """

    def kernel(y_ref, sum_ref, sq_ref, gamma_ref, beta_ref, o_ref):
        s = sum_ref[...]
        q = sq_ref[...]
        total = s[:, 0:c_pad]
        total_sq = q[:, 0:c_pad]
        for t in range(1, n_split):            # static unroll (n_split <= 2)
            total = total + s[:, t * c_pad:(t + 1) * c_pad]
            total_sq = total_sq + q[:, t * c_pad:(t + 1) * c_pad]
        mean = total * inv_m
        var = total_sq * inv_m - mean * mean    # biased var (BN training mode)
        scale = gamma_ref[...] * jax.lax.rsqrt(var + _BN_EPS)
        shift = beta_ref[...] - mean * scale
        y = y_ref[...].astype(jnp.float32) * scale + shift
        o_ref[...] = jnp.where(y > 0.0, y, _LRELU_SLOPE * y).astype(o_ref.dtype)

    return kernel


def _gemm_bias_kernel(x_ref, w_ref, b_ref, o_ref):
    """Final block: bf16 GEMM (f32 acc) + bias, no BN / no activation."""
    o_ref[...] = (
        jnp.dot(x_ref[...], w_ref[...], preferred_element_type=jnp.float32)
        + b_ref[...]
    )


# ---------------------------------------------------------------------------
# pallas_call wrappers
# ---------------------------------------------------------------------------
def _choose_tiling(m):
    """Pick (tile_m, n_split, m_pad).  n_split=2 exposes a 'parallel' leading
    grid axis for megacore (v7x); tile_m keeps per-step overhead amortized."""
    if m >= 8 * 1024:
        tile_m = 1024
    elif m >= 1024:
        tile_m = 512
    else:
        tile_m = _round_up(m, 16)          # bf16-friendly sublane multiple
    n_split = 2 if m >= 2 * tile_m else 1
    m_pad = _round_up(m, tile_m * n_split)
    return tile_m, n_split, m_pad


def _conv_gemm_with_stats(x_pad, w_pad, tile_m, n_split):
    m_pad, k_pad = x_pad.shape
    c_pad = w_pad.shape[1]
    tiles_per_split = m_pad // (tile_m * n_split)
    cost = pl.CostEstimate(
        flops=2 * m_pad * k_pad * c_pad,
        transcendentals=0,
        bytes_accessed=x_pad.size * 2 + w_pad.size * 2 + m_pad * c_pad * 2,
    )
    return pl.pallas_call(
        _gemm_stats_kernel,
        out_shape=(
            jax.ShapeDtypeStruct((m_pad, c_pad), jnp.bfloat16),
            jax.ShapeDtypeStruct((1, n_split * c_pad), jnp.float32),
            jax.ShapeDtypeStruct((1, n_split * c_pad), jnp.float32),
        ),
        grid_spec=pltpu.PrefetchScalarGridSpec(
            num_scalar_prefetch=0,
            grid=(n_split, tiles_per_split),
            in_specs=[
                pl.BlockSpec((tile_m, k_pad),
                             lambda i, j: (i * tiles_per_split + j, 0)),
                pl.BlockSpec((k_pad, c_pad), lambda i, j: (0, 0)),
            ],
            out_specs=[
                pl.BlockSpec((tile_m, c_pad),
                             lambda i, j: (i * tiles_per_split + j, 0)),
                pl.BlockSpec((1, c_pad), lambda i, j: (0, i)),
                pl.BlockSpec((1, c_pad), lambda i, j: (0, i)),
            ],
        ),
        compiler_params=pltpu.CompilerParams(
            dimension_semantics=("parallel", "arbitrary"),
            vmem_limit_bytes=_VMEM_LIMIT,
        ),
        cost_estimate=cost,
    )(x_pad, w_pad)


def _bn_lrelu(y, ysum, ysq, gamma2d, beta2d, inv_m, n_split, tile_m, out_dtype):
    m_pad, c_pad = y.shape
    kernel = _make_bn_lrelu_kernel(inv_m, n_split, c_pad)
    return pl.pallas_call(
        kernel,
        out_shape=jax.ShapeDtypeStruct((m_pad, c_pad), out_dtype),
        grid_spec=pltpu.PrefetchScalarGridSpec(
            num_scalar_prefetch=0,
            grid=(m_pad // tile_m,),
            in_specs=[
                pl.BlockSpec((tile_m, c_pad), lambda i: (i, 0)),
                pl.BlockSpec((1, n_split * c_pad), lambda i: (0, 0)),
                pl.BlockSpec((1, n_split * c_pad), lambda i: (0, 0)),
                pl.BlockSpec((1, c_pad), lambda i: (0, 0)),
                pl.BlockSpec((1, c_pad), lambda i: (0, 0)),
            ],
            out_specs=pl.BlockSpec((tile_m, c_pad), lambda i: (i, 0)),
        ),
        compiler_params=pltpu.CompilerParams(
            dimension_semantics=("parallel",),    # megacore-shardable on v7x
            vmem_limit_bytes=_VMEM_LIMIT,
        ),
    )(y, ysum, ysq, gamma2d, beta2d)


def _conv_gemm_bias(x_pad, w_pad, b_pad, tile_m):
    m_pad, k_pad = x_pad.shape
    c_pad = w_pad.shape[1]
    cost = pl.CostEstimate(
        flops=2 * m_pad * k_pad * c_pad,
        transcendentals=0,
        bytes_accessed=x_pad.size * 2 + w_pad.size * 2 + m_pad * c_pad * 4,
    )
    return pl.pallas_call(
        _gemm_bias_kernel,
        out_shape=jax.ShapeDtypeStruct((m_pad, c_pad), jnp.float32),
        grid_spec=pltpu.PrefetchScalarGridSpec(
            num_scalar_prefetch=0,
            grid=(m_pad // tile_m,),
            in_specs=[
                pl.BlockSpec((tile_m, k_pad), lambda i: (i, 0)),
                pl.BlockSpec((k_pad, c_pad), lambda i: (0, 0)),
                pl.BlockSpec((1, c_pad), lambda i: (0, 0)),
            ],
            out_specs=pl.BlockSpec((tile_m, c_pad), lambda i: (i, 0)),
        ),
        compiler_params=pltpu.CompilerParams(
            dimension_semantics=("parallel",),
            vmem_limit_bytes=_VMEM_LIMIT,
        ),
        cost_estimate=cost,
    )(x_pad, w_pad, b_pad)


# ---------------------------------------------------------------------------
# Plain-JAX glue (patch extraction / padding)
# ---------------------------------------------------------------------------
def _im2col_nhwc(x, k=_KSIZE, s=_STRIDE):
    """x: (N, H, W, C) -> (N*Ho*Wo, k*k*C); column order (kh, kw, cin)."""
    # TODO(synk): patch gather stays in plain JAX; a data-dependent Pallas
    # gather buys nothing for dense stride-2 conv windows.
    n, h, w, c = x.shape
    ho = (h - k) // s + 1
    wo = (w - k) // s + 1
    cols = []
    for di in range(k):
        for dj in range(k):
            cols.append(x[:, di:di + s * ho:s, dj:dj + s * wo:s, :])
    p = jnp.stack(cols, axis=3)                       # (N, Ho, Wo, k*k, C)
    return p.reshape(n * ho * wo, k * k * c), ho, wo


def _pad2d(a, rows, cols):
    r, c = a.shape
    return jnp.pad(a, ((0, rows - r), (0, cols - c)))


def _prep_gemm_operands(x_nhwc, w_conv):
    """Returns bf16-padded patches / weights + true sizes and tiling choice."""
    cout, cin = w_conv.shape[0], w_conv.shape[1]
    patches, ho, wo = _im2col_nhwc(x_nhwc)
    m, k = patches.shape
    k_pad = _round_up(k, _LANE)
    c_pad = _round_up(cout, _LANE)
    tile_m, n_split, m_pad = _choose_tiling(m)

    x_pad = _pad2d(patches.astype(jnp.bfloat16), m_pad, k_pad)
    # (Cout, Cin, kh, kw) -> (kh, kw, Cin, Cout) -> (k*k*Cin, Cout): matches
    # the (kh, kw, cin) patch column order above.
    w2d = w_conv.transpose(2, 3, 1, 0).reshape(k, cout)
    w_pad = _pad2d(w2d.astype(jnp.bfloat16), k_pad, c_pad)
    return x_pad, w_pad, (m, cout, c_pad, ho, wo, tile_m, n_split)


def _apply_bn_block(x_nhwc, params):
    n = x_nhwc.shape[0]
    x_pad, w_pad, (m, cout, c_pad, ho, wo, tile_m, n_split) = \
        _prep_gemm_operands(x_nhwc, params["w"])
    # Conv bias intentionally dropped: it is exactly cancelled by the
    # training-mode BatchNorm mean subtraction.
    y, ysum, ysq = _conv_gemm_with_stats(x_pad, w_pad, tile_m, n_split)

    # Padded rows are all-zero patches with no bias -> contribute exactly 0 to
    # the stats; normalize by the true M inside the fused pass-2 kernel.
    gamma2d = jnp.pad(params["gamma"], (0, c_pad - cout)).reshape(1, c_pad)
    beta2d = jnp.pad(params["beta"], (0, c_pad - cout)).reshape(1, c_pad)
    out = _bn_lrelu(y, ysum, ysq, gamma2d, beta2d, 1.0 / float(m),
                    n_split, tile_m, jnp.bfloat16)
    return out[:m, :cout].reshape(n, ho, wo, cout)


def _apply_final_block(x_nhwc, params):
    n = x_nhwc.shape[0]
    x_pad, w_pad, (m, cout, c_pad, ho, wo, tile_m, _) = \
        _prep_gemm_operands(x_nhwc, params["w"])
    b_pad = jnp.pad(params["b"], (0, c_pad - cout)).reshape(1, c_pad)
    out = _conv_gemm_bias(x_pad, w_pad, b_pad, tile_m)
    return out[:m, :cout].reshape(n, ho, wo, cout)


# ---------------------------------------------------------------------------
# Critic module
# ---------------------------------------------------------------------------
def init_critic_params(key, im_chan=3, hidden_dim=64):
    """Synthetic parameters matching nn.Conv2d / nn.BatchNorm2d shapes."""
    def conv_params(k, cin, cout):
        kw, kb = jax.random.split(k)
        fan_in = cin * _KSIZE * _KSIZE
        scale = 1.0 / jnp.sqrt(jnp.float32(fan_in))
        w = jax.random.uniform(kw, (cout, cin, _KSIZE, _KSIZE),
                               jnp.float32, -scale, scale)
        b = jax.random.uniform(kb, (cout,), jnp.float32, -scale, scale)
        return w, b

    k1, k2, k3 = jax.random.split(key, 3)
    w1, b1 = conv_params(k1, im_chan, hidden_dim)
    w2, b2 = conv_params(k2, hidden_dim, hidden_dim * 2)
    w3, b3 = conv_params(k3, hidden_dim * 2, 1)
    return {
        "block1": {"w": w1, "b": b1,
                   "gamma": jnp.ones((hidden_dim,), jnp.float32),
                   "beta": jnp.zeros((hidden_dim,), jnp.float32)},
        "block2": {"w": w2, "b": b2,
                   "gamma": jnp.ones((hidden_dim * 2,), jnp.float32),
                   "beta": jnp.zeros((hidden_dim * 2,), jnp.float32)},
        "block3": {"w": w3, "b": b3},
    }


def critic_forward(params, image):
    """image: (B, im_chan, H, W) float32 NCHW -> (B, -1), matching
    crit_pred.view(len(crit_pred), -1)."""
    # Single layout change at the boundary; blocks stay NHWC / bf16.
    x = jnp.transpose(image, (0, 2, 3, 1)).astype(jnp.bfloat16)
    h1 = _apply_bn_block(x, params["block1"])
    h2 = _apply_bn_block(h1, params["block2"])
    h3 = _apply_final_block(h2, params["block3"])     # (B, Ho, Wo, 1) f32
    b, ho, wo, c = h3.shape
    return jnp.transpose(h3, (0, 3, 1, 2)).reshape(b, c * ho * wo)


if __name__ == "__main__":
    key = jax.random.PRNGKey(0)
    kp, kx = jax.random.split(key)

    im_chan = 3
    hidden_dim = 32           # small synthetic hidden dim
    batch = 10                # big enough to exercise the megacore-split path
    spatial = 32              # 32 -> 15 -> 6 -> 2 under (k=4, s=2) convs

    params = init_critic_params(kp, im_chan=im_chan, hidden_dim=hidden_dim)
    image = jax.random.normal(kx, (batch, im_chan, spatial, spatial),
                              jnp.float32)

    fwd = jax.jit(critic_forward)
    out = jax.block_until_ready(fwd(params, image))
    assert out.shape == (batch, 4), out.shape     # (B, 1*2*2) flattened
    assert bool(jnp.all(jnp.isfinite(out)))
    print("KERNEL_OK")
</pallas_src>

<mosaic_0001>
module attributes {stable_mosaic.version = 11 : i64} {
  func.func @_gemm_stats_kernel(%arg0: i32, %arg1: i32, %arg2: memref<512x128xbf16, #tpu.memory_space<vmem>>, %arg3: memref<128x128xbf16, #tpu.memory_space<vmem>>, %arg4: memref<512x128xbf16, #tpu.memory_space<vmem>>, %arg5: memref<1x128xf32, #tpu.memory_space<vmem>>, %arg6: memref<1x128xf32, #tpu.memory_space<vmem>>) attributes {dimension_semantics = [#tpu.dimension_semantics<parallel>, #tpu.dimension_semantics<arbitrary>], iteration_bounds = array<i64: 2, 3>, scalar_prefetch = 0 : i64, scratch_operands = 0 : i64, tpu.core_type = #tpu.core_type<tc>, window_params = [{transform_indices = @transform_0, window_bounds = array<i64: 512, 128>}, {pipeline_mode = #tpu.pipeline_mode<synchronous>, transform_indices = @transform_1, window_bounds = array<i64: 128, 128>}, {transform_indices = @transform_2, window_bounds = array<i64: 512, 128>}, {transform_indices = @transform_3, window_bounds = array<i64: 1, 128>}, {transform_indices = @transform_4, window_bounds = array<i64: 1, 128>}]} {
    %c0 = arith.constant 0 : index
    %c0_0 = arith.constant 0 : index
    %0 = vector.load %arg2[%c0, %c0_0] : memref<512x128xbf16, #tpu.memory_space<vmem>>, vector<512x128xbf16>
    %c0_1 = arith.constant 0 : index
    %c0_2 = arith.constant 0 : index
    %1 = vector.load %arg3[%c0_1, %c0_2] : memref<128x128xbf16, #tpu.memory_space<vmem>>, vector<128x128xbf16>
    %cst = arith.constant dense<0.000000e+00> : vector<512x128xf32>
    %2 = tpu.matmul %0, %1, %cst {dimension_numbers = #tpu.dot_dimension_numbers<[1], [0], [0], [1], [0, 0, 1, 1], [], []>} : vector<512x128xbf16>, vector<128x128xbf16>, vector<512x128xf32> -> vector<512x128xf32>
    %3 = arith.truncf %2 : vector<512x128xf32> to vector<512x128xbf16>
    %c0_3 = arith.constant 0 : index
    %c0_4 = arith.constant 0 : index
    %4 = vector.load %arg4[%c0_3, %c0_4] : memref<512x128xbf16, #tpu.memory_space<vmem>>, vector<512x128xbf16>
    tpu.vector_store %arg4[%c0_3, %c0_4], %3 {strides = array<i32>} : memref<512x128xbf16, #tpu.memory_space<vmem>>, vector<512x128xbf16>,
    %c0_i32 = arith.constant 0 : i32
    %5 = arith.cmpi eq, %arg1, %c0_i32 : i32
    %6 = arith.extui %5 : i1 to i32
    %c0_i32_5 = arith.constant 0 : i32
    %7 = arith.cmpi ne, %6, %c0_i32_5 : i32
    scf.if %7 {
      %cst_16 = arith.constant 0.000000e+00 : f32
      %19 = vector.broadcast %cst_16 : f32 to vector<1x128xf32>
      %c0_17 = arith.constant 0 : index
      %c0_18 = arith.constant 0 : index
      %20 = vector.load %arg5[%c0_17, %c0_18] : memref<1x128xf32, #tpu.memory_space<vmem>>, vector<1x128xf32>
      tpu.vector_store %arg5[%c0_17, %c0_18], %19 {strides = array<i32>} : memref<1x128xf32, #tpu.memory_space<vmem>>, vector<1x128xf32>,
      %cst_19 = arith.constant 0.000000e+00 : f32
      %21 = vector.broadcast %cst_19 : f32 to vector<1x128xf32>
      %c0_20 = arith.constant 0 : index
      %c0_21 = arith.constant 0 : index
      %22 = vector.load %arg6[%c0_20, %c0_21] : memref<1x128xf32, #tpu.memory_space<vmem>>, vector<1x128xf32>
      tpu.vector_store %arg6[%c0_20, %c0_21], %21 {strides = array<i32>} : memref<1x128xf32, #tpu.memory_space<vmem>>, vector<1x128xf32>,
    } else {
    }
    %c0_6 = arith.constant 0 : index
    %c0_7 = arith.constant 0 : index
    %8 = vector.load %arg5[%c0_6, %c0_7] : memref<1x128xf32, #tpu.memory_space<vmem>>, vector<1x128xf32>
    %cst_8 = arith.constant dense<0.000000e+00> : vector<128xf32>
    %9 = vector.multi_reduction <add>, %2, %cst_8 [0] : vector<512x128xf32> to vector<128xf32>
    %10 = vector.shape_cast %9 : vector<128xf32> to vector<1x128xf32>
    %11 = arith.addf %8, %10 : vector<1x128xf32>
    %c0_9 = arith.constant 0 : index
    %c0_10 = arith.constant 0 : index
    %12 = vector.load %arg5[%c0_9, %c0_10] : memref<1x128xf32, #tpu.memory_space<vmem>>, vector<1x128xf32>
    tpu.vector_store %arg5[%c0_9, %c0_10], %11 {strides = array<i32>} : memref<1x128xf32, #tpu.memory_space<vmem>>, vector<1x128xf32>,
    %c0_11 = arith.constant 0 : index
    %c0_12 = arith.constant 0 : index
    %13 = vector.load %arg6[%c0_11, %c0_12] : memref<1x128xf32, #tpu.memory_space<vmem>>, vector<1x128xf32>
    %14 = arith.mulf %2, %2 : vector<512x128xf32>
    %cst_13 = arith.constant dense<0.000000e+00> : vector<128xf32>
    %15 = vector.multi_reduction <add>, %14, %cst_13 [0] : vector<512x128xf32> to vector<128xf32>
    %16 = vector.shape_cast %15 : vector<128xf32> to vector<1x128xf32>
    %17 = arith.addf %13, %16 : vector<1x128xf32>
    %c0_14 = arith.constant 0 : index
    %c0_15 = arith.constant 0 : index
    %18 = vector.load %arg6[%c0_14, %c0_15] : memref<1x128xf32, #tpu.memory_space<vmem>>, vector<1x128xf32>
    tpu.vector_store %arg6[%c0_14, %c0_15], %17 {strides = array<i32>} : memref<1x128xf32, #tpu.memory_space<vmem>>, vector<1x128xf32>,
    return
  }
  func.func @transform_0(%arg0: i32, %arg1: i32) -> (i32, i32) {
    %c3_i32 = arith.constant 3 : i32
    %0 = arith.muli %arg0, %c3_i32 : i32
    %1 = arith.addi %0, %arg1 : i32
    %c0_i32 = arith.constant 0 : i32
    %c0_i32_0 = arith.constant 0 : i32
    return %1, %c0_i32 : i32, i32
  }
  func.func @transform_1(%arg0: i32, %arg1: i32) -> (i32, i32) {
    %c0_i32 = arith.constant 0 : i32
    %c0_i32_0 = arith.constant 0 : i32
    %c0_i32_1 = arith.constant 0 : i32
    return %c0_i32, %c0_i32_0 : i32, i32
  }
  func.func @transform_2(%arg0: i32, %arg1: i32) -> (i32, i32) {
    %c3_i32 = arith.constant 3 : i32
    %0 = arith.muli %arg0, %c3_i32 : i32
    %1 = arith.addi %0, %arg1 : i32
    %c0_i32 = arith.constant 0 : i32
    %c0_i32_0 = arith.constant 0 : i32
    return %1, %c0_i32 : i32, i32
  }
  func.func @transform_3(%arg0: i32, %arg1: i32) -> (i32, i32) {
    %c0_i32 = arith.constant 0 : i32
    %c0_i32_0 = arith.constant 0 : i32
    return %c0_i32, %arg0 : i32, i32
  }
  func.func @transform_4(%arg0: i32, %arg1: i32) -> (i32, i32) {
    %c0_i32 = arith.constant 0 : i32
    %c0_i32_0 = arith.constant 0 : i32
    return %c0_i32, %arg0 : i32, i32
  }
}

module attributes {stable_mosaic.version = 11 : i64} {
  func.func @kernel(%arg0: i32, %arg1: memref<512x128xbf16, #tpu.memory_space<vmem>>, %arg2: memref<1x256xf32, #tpu.memory_space<vmem>>, %arg3: memref<1x256xf32, #tpu.memory_space<vmem>>, %arg4: memref<1x128xf32, #tpu.memory_space<vmem>>, %arg5: memref<1x128xf32, #tpu.memory_space<vmem>>, %arg6: memref<512x128xbf16, #tpu.memory_space<vmem>>) attributes {dimension_semantics = [#tpu.dimension_semantics<parallel>], iteration_bounds = array<i64: 6>, scalar_prefetch = 0 : i64, scratch_operands = 0 : i64, tpu.core_type = #tpu.core_type<tc>, window_params = [{transform_indices = @transform_0, window_bounds = array<i64: 512, 128>}, {pipeline_mode = #tpu.pipeline_mode<synchronous>, transform_indices = @transform_1, window_bounds = array<i64: 1, 256>}, {pipeline_mode = #tpu.pipeline_mode<synchronous>, transform_indices = @transform_2, window_bounds = array<i64: 1, 256>}, {pipeline_mode = #tpu.pipeline_mode<synchronous>, transform_indices = @transform_3, window_bounds = array<i64: 1, 128>}, {pipeline_mode = #tpu.pipeline_mode<synchronous>, transform_indices = @transform_4, window_bounds = array<i64: 1, 128>}, {transform_indices = @transform_5, window_bounds = array<i64: 512, 128>}]} {
    %c0 = arith.constant 0 : index
    %c0_0 = arith.constant 0 : index
    %0 = vector.load %arg2[%c0, %c0_0] : memref<1x256xf32, #tpu.memory_space<vmem>>, vector<1x256xf32>
    %c0_1 = arith.constant 0 : index
    %c0_2 = arith.constant 0 : index
    %1 = vector.load %arg3[%c0_1, %c0_2] : memref<1x256xf32, #tpu.memory_space<vmem>>, vector<1x256xf32>
    %2 = vector.extract_strided_slice %0 {offsets = [0, 0], sizes = [1, 128], strides = [1, 1]} : vector<1x256xf32> to vector<1x128xf32>
    %3 = vector.extract_strided_slice %1 {offsets = [0, 0], sizes = [1, 128], strides = [1, 1]} : vector<1x256xf32> to vector<1x128xf32>
    %4 = vector.extract_strided_slice %0 {offsets = [0, 128], sizes = [1, 128], strides = [1, 1]} : vector<1x256xf32> to vector<1x128xf32>
    %5 = arith.addf %2, %4 : vector<1x128xf32>
    %6 = vector.extract_strided_slice %1 {offsets = [0, 128], sizes = [1, 128], strides = [1, 1]} : vector<1x256xf32> to vector<1x128xf32>
    %7 = arith.addf %3, %6 : vector<1x128xf32>
    %cst = arith.constant 4.44444449E-4 : f32
    %8 = vector.broadcast %cst : f32 to vector<1x128xf32>
    %9 = arith.mulf %5, %8 : vector<1x128xf32>
    %cst_3 = arith.constant 4.44444449E-4 : f32
    %10 = vector.broadcast %cst_3 : f32 to vector<1x128xf32>
    %11 = arith.mulf %7, %10 : vector<1x128xf32>
    %12 = arith.mulf %9, %9 : vector<1x128xf32>
    %13 = arith.subf %11, %12 : vector<1x128xf32>
    %c0_4 = arith.constant 0 : index
    %c0_5 = arith.constant 0 : index
    %14 = vector.load %arg4[%c0_4, %c0_5] : memref<1x128xf32, #tpu.memory_space<vmem>>, vector<1x128xf32>
    %cst_6 = arith.constant 9.99999974E-6 : f32
    %15 = vector.broadcast %cst_6 : f32 to vector<1x128xf32>
    %16 = arith.addf %13, %15 : vector<1x128xf32>
    %17 = math.rsqrt %16 : vector<1x128xf32>
    %18 = arith.mulf %14, %17 : vector<1x128xf32>
    %c0_7 = arith.constant 0 : index
    %c0_8 = arith.constant 0 : index
    %19 = vector.load %arg5[%c0_7, %c0_8] : memref<1x128xf32, #tpu.memory_space<vmem>>, vector<1x128xf32>
    %20 = arith.mulf %9, %18 : vector<1x128xf32>
    %21 = arith.subf %19, %20 : vector<1x128xf32>
    %c0_9 = arith.constant 0 : index
    %c0_10 = arith.constant 0 : index
    %22 = vector.load %arg1[%c0_9, %c0_10] : memref<512x128xbf16, #tpu.memory_space<vmem>>, vector<512x128xbf16>
    %23 = arith.extf %22 : vector<512x128xbf16> to vector<512x128xf32>
    %24 = vector.broadcast %18 : vector<1x128xf32> to vector<512x128xf32>
    %25 = arith.mulf %23, %24 : vector<512x128xf32>
    %26 = vector.broadcast %21 : vector<1x128xf32> to vector<512x128xf32>
    %27 = arith.addf %25, %26 : vector<512x128xf32>
    %cst_11 = arith.constant 0.000000e+00 : f32
    %28 = vector.broadcast %cst_11 : f32 to vector<512x128xf32>
    %29 = arith.cmpf ogt, %27, %28 : vector<512x128xf32>
    %cst_12 = arith.constant 2.000000e-01 : f32
    %30 = vector.broadcast %cst_12 : f32 to vector<512x128xf32>
    %31 = arith.mulf %30, %27 : vector<512x128xf32>
    %32 = arith.select %29, %27, %31 : vector<512x128xi1>, vector<512x128xf32>
    %33 = arith.truncf %32 : vector<512x128xf32> to vector<512x128xbf16>
    %c0_13 = arith.constant 0 : index
    %c0_14 = arith.constant 0 : index
    %34 = vector.load %arg6[%c0_13, %c0_14] : memref<512x128xbf16, #tpu.memory_space<vmem>>, vector<512x128xbf16>
    tpu.vector_store %arg6[%c0_13, %c0_14], %33 {strides = array<i32>} : memref<512x128xbf16, #tpu.memory_space<vmem>>, vector<512x128xbf16>,
    return
  }
  func.func @transform_0(%arg0: i32) -> (i32, i32) {
    %c0_i32 = arith.constant 0 : i32
    %c0_i32_0 = arith.constant 0 : i32
    return %arg0, %c0_i32 : i32, i32
  }
  func.func @transform_1(%arg0: i32) -> (i32, i32) {
    %c0_i32 = arith.constant 0 : i32
    %c0_i32_0 = arith.constant 0 : i32
    %c0_i32_1 = arith.constant 0 : i32
    return %c0_i32, %c0_i32_0 : i32, i32
  }
  func.func @transform_2(%arg0: i32) -> (i32, i32) {
    %c0_i32 = arith.constant 0 : i32
    %c0_i32_0 = arith.constant 0 : i32
    %c0_i32_1 = arith.constant 0 : i32
    return %c0_i32, %c0_i32_0 : i32, i32
  }
  func.func @transform_3(%arg0: i32) -> (i32, i32) {
    %c0_i32 = arith.constant 0 : i32
    %c0_i32_0 = arith.constant 0 : i32
    %c0_i32_1 = arith.constant 0 : i32
    return %c0_i32, %c0_i32_0 : i32, i32
  }
  func.func @transform_4(%arg0: i32) -> (i32, i32) {
    %c0_i32 = arith.constant 0 : i32
    %c0_i32_0 = arith.constant 0 : i32
    %c0_i32_1 = arith.constant 0 : i32
    return %c0_i32, %c0_i32_0 : i32, i32
  }
  func.func @transform_5(%arg0: i32) -> (i32, i32) {
    %c0_i32 = arith.constant 0 : i32
    %c0_i32_0 = arith.constant 0 : i32
    return %arg0, %c0_i32 : i32, i32
  }
}

module attributes {stable_mosaic.version = 11 : i64} {
  func.func @_gemm_stats_kernel(%arg0: i32, %arg1: i32, %arg2: memref<368x512xbf16, #tpu.memory_space<vmem>>, %arg3: memref<512x128xbf16, #tpu.memory_space<vmem>>, %arg4: memref<368x128xbf16, #tpu.memory_space<vmem>>, %arg5: memref<1x128xf32, #tpu.memory_space<vmem>>, %arg6: memref<1x128xf32, #tpu.memory_space<vmem>>) attributes {dimension_semantics = [#tpu.dimension_semantics<parallel>, #tpu.dimension_semantics<arbitrary>], iteration_bounds = array<i64: 1, 1>, scalar_prefetch = 0 : i64, scratch_operands = 0 : i64, tpu.core_type = #tpu.core_type<tc>, window_params = [{transform_indices = @transform_0, window_bounds = array<i64: 368, 512>}, {pipeline_mode = #tpu.pipeline_mode<synchronous>, transform_indices = @transform_1, window_bounds = array<i64: 512, 128>}, {transform_indices = @transform_2, window_bounds = array<i64: 368, 128>}, {transform_indices = @transform_3, window_bounds = array<i64: 1, 128>}, {transform_indices = @transform_4, window_bounds = array<i64: 1, 128>}]} {
    %c0 = arith.constant 0 : index
    %c0_0 = arith.constant 0 : index
    %0 = vector.load %arg2[%c0, %c0_0] : memref<368x512xbf16, #tpu.memory_space<vmem>>, vector<368x512xbf16>
    %c0_1 = arith.constant 0 : index
    %c0_2 = arith.constant 0 : index
    %1 = vector.load %arg3[%c0_1, %c0_2] : memref<512x128xbf16, #tpu.memory_space<vmem>>, vector<512x128xbf16>
    %cst = arith.constant dense<0.000000e+00> : vector<368x128xf32>
    %2 = tpu.matmul %0, %1, %cst {dimension_numbers = #tpu.dot_dimension_numbers<[1], [0], [0], [1], [0, 0, 1, 1], [], []>} : vector<368x512xbf16>, vector<512x128xbf16>, vector<368x128xf32> -> vector<368x128xf32>
    %3 = arith.truncf %2 : vector<368x128xf32> to vector<368x128xbf16>
    %c0_3 = arith.constant 0 : index
    %c0_4 = arith.constant 0 : index
    %4 = vector.load %arg4[%c0_3, %c0_4] : memref<368x128xbf16, #tpu.memory_space<vmem>>, vector<368x128xbf16>
    tpu.vector_store %arg4[%c0_3, %c0_4], %3 {strides = array<i32>} : memref<368x128xbf16, #tpu.memory_space<vmem>>, vector<368x128xbf16>,
    %c0_i32 = arith.constant 0 : i32
    %5 = arith.cmpi eq, %arg1, %c0_i32 : i32
    %6 = arith.extui %5 : i1 to i32
    %c0_i32_5 = arith.constant 0 : i32
    %7 = arith.cmpi ne, %6, %c0_i32_5 : i32
    scf.if %7 {
      %cst_16 = arith.constant 0.000000e+00 : f32
      %19 = vector.broadcast %cst_16 : f32 to vector<1x128xf32>
      %c0_17 = arith.constant 0 : index
      %c0_18 = arith.constant 0 : index
      %20 = vector.load %arg5[%c0_17, %c0_18] : memref<1x128xf32, #tpu.memory_space<vmem>>, vector<1x128xf32>
      tpu.vector_store %arg5[%c0_17, %c0_18], %19 {strides = array<i32>} : memref<1x128xf32, #tpu.memory_space<vmem>>, vector<1x128xf32>,
      %cst_19 = arith.constant 0.000000e+00 : f32
      %21 = vector.broadcast %cst_19 : f32 to vector<1x128xf32>
      %c0_20 = arith.constant 0 : index
      %c0_21 = arith.constant 0 : index
      %22 = vector.load %arg6[%c0_20, %c0_21] : memref<1x128xf32, #tpu.memory_space<vmem>>, vector<1x128xf32>
      tpu.vector_store %arg6[%c0_20, %c0_21], %21 {strides = array<i32>} : memref<1x128xf32, #tpu.memory_space<vmem>>, vector<1x128xf32>,
    } else {
    }
    %c0_6 = arith.constant 0 : index
    %c0_7 = arith.constant 0 : index
    %8 = vector.load %arg5[%c0_6, %c0_7] : memref<1x128xf32, #tpu.memory_space<vmem>>, vector<1x128xf32>
    %cst_8 = arith.constant dense<0.000000e+00> : vector<128xf32>
    %9 = vector.multi_reduction <add>, %2, %cst_8 [0] : vector<368x128xf32> to vector<128xf32>
    %10 = vector.shape_cast %9 : vector<128xf32> to vector<1x128xf32>
    %11 = arith.addf %8, %10 : vector<1x128xf32>
    %c0_9 = arith.constant 0 : index
    %c0_10 = arith.constant 0 : index
    %12 = vector.load %arg5[%c0_9, %c0_10] : memref<1x128xf32, #tpu.memory_space<vmem>>, vector<1x128xf32>
    tpu.vector_store %arg5[%c0_9, %c0_10], %11 {strides = array<i32>} : memref<1x128xf32, #tpu.memory_space<vmem>>, vector<1x128xf32>,
    %c0_11 = arith.constant 0 : index
    %c0_12 = arith.constant 0 : index
    %13 = vector.load %arg6[%c0_11, %c0_12] : memref<1x128xf32, #tpu.memory_space<vmem>>, vector<1x128xf32>
    %14 = arith.mulf %2, %2 : vector<368x128xf32>
    %cst_13 = arith.constant dense<0.000000e+00> : vector<128xf32>
    %15 = vector.multi_reduction <add>, %14, %cst_13 [0] : vector<368x128xf32> to vector<128xf32>
    %16 = vector.shape_cast %15 : vector<128xf32> to vector<1x128xf32>
    %17 = arith.addf %13, %16 : vector<1x128xf32>
    %c0_14 = arith.constant 0 : index
    %c0_15 = arith.constant 0 : index
    %18 = vector.load %arg6[%c0_14, %c0_15] : memref<1x128xf32, #tpu.memory_space<vmem>>, vector<1x128xf32>
    tpu.vector_store %arg6[%c0_14, %c0_15], %17 {strides = array<i32>} : memref<1x128xf32, #tpu.memory_space<vmem>>, vector<1x128xf32>,
    return
  }
  func.func @transform_0(%arg0: i32, %arg1: i32) -> (i32, i32) {
    %c1_i32 = arith.constant 1 : i32
    %0 = arith.muli %arg0, %c1_i32 : i32
    %1 = arith.addi %0, %arg1 : i32
    %c0_i32 = arith.constant 0 : i32
    %c0_i32_0 = arith.constant 0 : i32
    return %1, %c0_i32 : i32, i32
  }
  func.func @transform_1(%arg0: i32, %arg1: i32) -> (i32, i32) {
    %c0_i32 = arith.constant 0 : i32
    %c0_i32_0 = arith.constant 0 : i32
    %c0_i32_1 = arith.constant 0 : i32
    return %c0_i32, %c0_i32_0 : i32, i32
  }
  func.func @transform_2(%arg0: i32, %arg1: i32) -> (i32, i32) {
    %c1_i32 = arith.constant 1 : i32
    %0 = arith.muli %arg0, %c1_i32 : i32
    %1 = arith.addi %0, %arg1 : i32
    %c0_i32 = arith.constant 0 : i32
    %c0_i32_0 = arith.constant 0 : i32
    return %1, %c0_i32 : i32, i32
  }
  func.func @transform_3(%arg0: i32, %arg1: i32) -> (i32, i32) {
    %c0_i32 = arith.constant 0 : i32
    %c0_i32_0 = arith.constant 0 : i32
    return %c0_i32, %arg0 : i32, i32
  }
  func.func @transform_4(%arg0: i32, %arg1: i32) -> (i32, i32) {
    %c0_i32 = arith.constant 0 : i32
    %c0_i32_0 = arith.constant 0 : i32
    return %c0_i32, %arg0 : i32, i32
  }
}

module attributes {stable_mosaic.version = 11 : i64} {
  func.func @kernel(%arg0: i32, %arg1: memref<368x128xbf16, #tpu.memory_space<vmem>>, %arg2: memref<1x128xf32, #tpu.memory_space<vmem>>, %arg3: memref<1x128xf32, #tpu.memory_space<vmem>>, %arg4: memref<1x128xf32, #tpu.memory_space<vmem>>, %arg5: memref<1x128xf32, #tpu.memory_space<vmem>>, %arg6: memref<368x128xbf16, #tpu.memory_space<vmem>>) attributes {dimension_semantics = [#tpu.dimension_semantics<parallel>], iteration_bounds = array<i64: 1>, scalar_prefetch = 0 : i64, scratch_operands = 0 : i64, tpu.core_type = #tpu.core_type<tc>, window_params = [{transform_indices = @transform_0, window_bounds = array<i64: 368, 128>}, {pipeline_mode = #tpu.pipeline_mode<synchronous>, transform_indices = @transform_1, window_bounds = array<i64: 1, 128>}, {pipeline_mode = #tpu.pipeline_mode<synchronous>, transform_indices = @transform_2, window_bounds = array<i64: 1, 128>}, {pipeline_mode = #tpu.pipeline_mode<synchronous>, transform_indices = @transform_3, window_bounds = array<i64: 1, 128>}, {pipeline_mode = #tpu.pipeline_mode<synchronous>, transform_indices = @transform_4, window_bounds = array<i64: 1, 128>}, {transform_indices = @transform_5, window_bounds = array<i64: 368, 128>}]} {
    %c0 = arith.constant 0 : index
    %c0_0 = arith.constant 0 : index
    %0 = vector.load %arg2[%c0, %c0_0] : memref<1x128xf32, #tpu.memory_space<vmem>>, vector<1x128xf32>
    %c0_1 = arith.constant 0 : index
    %c0_2 = arith.constant 0 : index
    %1 = vector.load %arg3[%c0_1, %c0_2] : memref<1x128xf32, #tpu.memory_space<vmem>>, vector<1x128xf32>
    %cst = arith.constant 0.00277777785 : f32
    %2 = vector.broadcast %cst : f32 to vector<1x128xf32>
    %3 = arith.mulf %0, %2 : vector<1x128xf32>
    %cst_3 = arith.constant 0.00277777785 : f32
    %4 = vector.broadcast %cst_3 : f32 to vector<1x128xf32>
    %5 = arith.mulf %1, %4 : vector<1x128xf32>
    %6 = arith.mulf %3, %3 : vector<1x128xf32>
    %7 = arith.subf %5, %6 : vector<1x128xf32>
    %c0_4 = arith.constant 0 : index
    %c0_5 = arith.constant 0 : index
    %8 = vector.load %arg4[%c0_4, %c0_5] : memref<1x128xf32, #tpu.memory_space<vmem>>, vector<1x128xf32>
    %cst_6 = arith.constant 9.99999974E-6 : f32
    %9 = vector.broadcast %cst_6 : f32 to vector<1x128xf32>
    %10 = arith.addf %7, %9 : vector<1x128xf32>
    %11 = math.rsqrt %10 : vector<1x128xf32>
    %12 = arith.mulf %8, %11 : vector<1x128xf32>
    %c0_7 = arith.constant 0 : index
    %c0_8 = arith.constant 0 : index
    %13 = vector.load %arg5[%c0_7, %c0_8] : memref<1x128xf32, #tpu.memory_space<vmem>>, vector<1x128xf32>
    %14 = arith.mulf %3, %12 : vector<1x128xf32>
    %15 = arith.subf %13, %14 : vector<1x128xf32>
    %c0_9 = arith.constant 0 : index
    %c0_10 = arith.constant 0 : index
    %16 = vector.load %arg1[%c0_9, %c0_10] : memref<368x128xbf16, #tpu.memory_space<vmem>>, vector<368x128xbf16>
    %17 = arith.extf %16 : vector<368x128xbf16> to vector<368x128xf32>
    %18 = vector.broadcast %12 : vector<1x128xf32> to vector<368x128xf32>
    %19 = arith.mulf %17, %18 : vector<368x128xf32>
    %20 = vector.broadcast %15 : vector<1x128xf32> to vector<368x128xf32>
    %21 = arith.addf %19, %20 : vector<368x128xf32>
    %cst_11 = arith.constant 0.000000e+00 : f32
    %22 = vector.broadcast %cst_11 : f32 to vector<368x128xf32>
    %23 = arith.cmpf ogt, %21, %22 : vector<368x128xf32>
    %cst_12 = arith.constant 2.000000e-01 : f32
    %24 = vector.broadcast %cst_12 : f32 to vector<368x128xf32>
    %25 = arith.mulf %24, %21 : vector<368x128xf32>
    %26 = arith.select %23, %21, %25 : vector<368x128xi1>, vector<368x128xf32>
    %27 = arith.truncf %26 : vector<368x128xf32> to vector<368x128xbf16>
    %c0_13 = arith.constant 0 : index
    %c0_14 = arith.constant 0 : index
    %28 = vector.load %arg6[%c0_13, %c0_14] : memref<368x128xbf16, #tpu.memory_space<vmem>>, vector<368x128xbf16>
    tpu.vector_store %arg6[%c0_13, %c0_14], %27 {strides = array<i32>} : memref<368x128xbf16, #tpu.memory_space<vmem>>, vector<368x128xbf16>,
    return
  }
  func.func @transform_0(%arg0: i32) -> (i32, i32) {
    %c0_i32 = arith.constant 0 : i32
    %c0_i32_0 = arith.constant 0 : i32
    return %arg0, %c0_i32 : i32, i32
  }
  func.func @transform_1(%arg0: i32) -> (i32, i32) {
    %c0_i32 = arith.constant 0 : i32
    %c0_i32_0 = arith.constant 0 : i32
    %c0_i32_1 = arith.constant 0 : i32
    return %c0_i32, %c0_i32_0 : i32, i32
  }
  func.func @transform_2(%arg0: i32) -> (i32, i32) {
    %c0_i32 = arith.constant 0 : i32
    %c0_i32_0 = arith.constant 0 : i32
    %c0_i32_1 = arith.constant 0 : i32
    return %c0_i32, %c0_i32_0 : i32, i32
  }
  func.func @transform_3(%arg0: i32) -> (i32, i32) {
    %c0_i32 = arith.constant 0 : i32
    %c0_i32_0 = arith.constant 0 : i32
    %c0_i32_1 = arith.constant 0 : i32
    return %c0_i32, %c0_i32_0 : i32, i32
  }
  func.func @transform_4(%arg0: i32) -> (i32, i32) {
    %c0_i32 = arith.constant 0 : i32
    %c0_i32_0 = arith.constant 0 : i32
    %c0_i32_1 = arith.constant 0 : i32
    return %c0_i32, %c0_i32_0 : i32, i32
  }
  func.func @transform_5(%arg0: i32) -> (i32, i32) {
    %c0_i32 = arith.constant 0 : i32
    %c0_i32_0 = arith.constant 0 : i32
    return %arg0, %c0_i32 : i32, i32
  }
}

module attributes {stable_mosaic.version = 11 : i64} {
  func.func @_gemm_bias_kernel(%arg0: i32, %arg1: memref<48x1024xbf16, #tpu.memory_space<vmem>>, %arg2: memref<1024x128xbf16, #tpu.memory_space<vmem>>, %arg3: memref<1x128xf32, #tpu.memory_space<vmem>>, %arg4: memref<48x128xf32, #tpu.memory_space<vmem>>) attributes {dimension_semantics = [#tpu.dimension_semantics<parallel>], iteration_bounds = array<i64: 1>, scalar_prefetch = 0 : i64, scratch_operands = 0 : i64, tpu.core_type = #tpu.core_type<tc>, window_params = [{transform_indices = @transform_0, window_bounds = array<i64: 48, 1024>}, {pipeline_mode = #tpu.pipeline_mode<synchronous>, transform_indices = @transform_1, window_bounds = array<i64: 1024, 128>}, {pipeline_mode = #tpu.pipeline_mode<synchronous>, transform_indices = @transform_2, window_bounds = array<i64: 1, 128>}, {transform_indices = @transform_3, window_bounds = array<i64: 48, 128>}]} {
    %c0 = arith.constant 0 : index
    %c0_0 = arith.constant 0 : index
    %0 = vector.load %arg1[%c0, %c0_0] : memref<48x1024xbf16, #tpu.memory_space<vmem>>, vector<48x1024xbf16>
    %c0_1 = arith.constant 0 : index
    %c0_2 = arith.constant 0 : index
    %1 = vector.load %arg2[%c0_1, %c0_2] : memref<1024x128xbf16, #tpu.memory_space<vmem>>, vector<1024x128xbf16>
    %cst = arith.constant dense<0.000000e+00> : vector<48x128xf32>
    %2 = tpu.matmul %0, %1, %cst {dimension_numbers = #tpu.dot_dimension_numbers<[1], [0], [0], [1], [0, 0, 1, 1], [], []>} : vector<48x1024xbf16>, vector<1024x128xbf16>, vector<48x128xf32> -> vector<48x128xf32>
    %c0_3 = arith.constant 0 : index
    %c0_4 = arith.constant 0 : index
    %3 = vector.load %arg3[%c0_3, %c0_4] : memref<1x128xf32, #tpu.memory_space<vmem>>, vector<1x128xf32>
    %4 = vector.broadcast %3 : vector<1x128xf32> to vector<48x128xf32>
    %5 = arith.addf %2, %4 : vector<48x128xf32>
    %c0_5 = arith.constant 0 : index
    %c0_6 = arith.constant 0 : index
    %6 = vector.load %arg4[%c0_5, %c0_6] : memref<48x128xf32, #tpu.memory_space<vmem>>, vector<48x128xf32>
    tpu.vector_store %arg4[%c0_5, %c0_6], %5 {strides = array<i32>} : memref<48x128xf32, #tpu.memory_space<vmem>>, vector<48x128xf32>,
    return
  }
  func.func @transform_0(%arg0: i32) -> (i32, i32) {
    %c0_i32 = arith.constant 0 : i32
    %c0_i32_0 = arith.constant 0 : i32
    return %arg0, %c0_i32 : i32, i32
  }
  func.func @transform_1(%arg0: i32) -> (i32, i32) {
    %c0_i32 = arith.constant 0 : i32
    %c0_i32_0 = arith.constant 0 : i32
    %c0_i32_1 = arith.constant 0 : i32
    return %c0_i32, %c0_i32_0 : i32, i32
  }
  func.func @transform_2(%arg0: i32) -> (i32, i32) {
    %c0_i32 = arith.constant 0 : i32
    %c0_i32_0 = arith.constant 0 : i32
    %c0_i32_1 = arith.constant 0 : i32
    return %c0_i32, %c0_i32_0 : i32, i32
  }
  func.func @transform_3(%arg0: i32) -> (i32, i32) {
    %c0_i32 = arith.constant 0 : i32
    %c0_i32_0 = arith.constant 0 : i32
    return %arg0, %c0_i32 : i32, i32
  }
}

</mosaic_0001>

<bundles_post_ra>
// kernel: critic_forward.6
= control target key start
LH: loop header
LB: loop body
LE: loop exit
PB: predicated region body
PF: predicated region fallthrough
CT: control target
= control target key end

     0   :  { %s1622_s18 = smov 0   ;;  %s2126_s0 = inlined_call_operand.vmem [shape: bf16[3072,128], index: 0, kind: input, shape index: {}]   ;;  %s2127_s1 = inlined_call_operand.vmem [shape: f32[1,256], index: 1, kind: input, shape index: {}]   ;;  %s2128_s2 = inlined_call_operand.vmem [shape: f32[1,256], index: 2, kind: input, shape index: {}]   ;;  %s2129_s3 = inlined_call_operand.vmem [shape: f32[1,128], index: 3, kind: input, shape index: {}]   ;;  %s2130_s4 = inlined_call_operand.vmem [shape: f32[1,128], index: 4, kind: input, shape index: {}]   ;;  %s2131_s5 = inlined_call_operand.vmem [shape: bf16[3072,128], index: 5, kind: output, shape index: {}]  }
   0x1 LB: > { %s1085_s19 = sadd.s32 4294967295, %s1590_s18   ;;  %p1089_p0 = scmp.ge.s32.totalorder %s1590_s18, 1  ;;  %s1590_s18 = sphi %s1622_s18, %s15_s18  }
   0x2   : > { %p188_p1 = scmp.lt.s32.totalorder %s1590_s18, 7 }
   0x4   : > { %p189_p2 = pnand %p1089_p0, %p188_p1 }
   0x5   : > { %s1090_s20 = sshll.u32 (!%p189_p2), %s1085_s19, 6  ;;  %v228_v0 = vld [vmem:[%s2127_s1] sm:$0x3] (!%p189_p2)  ;;  %v378_v4 = vlaneseq (!%p189_p2) }
   0x6   : > { %192 = sbr.rel (%p189_p2) target bundleno = 138 (0x8a), region = 40  ;;  %v229_v1 = vld [vmem:[%s2128_s2] sm:$0x3] (!%p189_p2)  ;;  %p217_p3 = scmp.lt.s32.totalorder (!%p189_p2), %s1090_s20, 383  ;;  %v231_v2 = vrot.slane (!%p189_p2), %v228_v0, 1 }
   0x7   : > { %v235_v3 = vrot.slane (!%p189_p2), %v229_v1, 1  ;;  %v1648_v9 = vshrl.u32 (!%p189_p2), %v378_v4, 7  ;;  %v246_v62 = vld [vmem:[%s2130_s4] sm:$0x1] (!%p189_p2) }
   0x8   : > { %v233_v5 = vadd.f32 (!%p189_p2), %v231_v2, %v228_v0 }
   0x9   : > { %v237_v6 = vadd.f32 (!%p189_p2), %v235_v3, %v229_v1  ;;  %v380_v17 = vsub.s32 (!%p189_p2), 0, %v1648_v9 }
   0xa   : > { %v1639_v7 = vmul.f32 (!%p189_p2), 0.00044444445, %v233_v5 }
   0xb   : > { %v239_v8 = vmul.f32 (!%p189_p2), 0.00044444445, %v237_v6  ;;  %v242_v6 = vld [vmem:[%s2129_s3] sm:$0x1] (!%p189_p2) }
   0xc   : > { %v240_v10 = vmul.f32 (!%p189_p2), %v1639_v7, %v1639_v7 }
   0xd   : > { %s2176_s20 = smov (!%p217_p3, %s1090_s20), 383 }
   0xe   : > { %s1091_s25 = sshll.u32 %s2176_s20, 2  ;;  %v241_v13 = vsub.f32 %v239_v8, %v240_v10 }
   0xf   : > { %s1646_s28 = scalar_lea.vmem %s2126_s0, %s1091_s25  ;;  %s1883_s10 = scalar_lea.vmem %s2131_s5, %s1091_s25 }
  0x10   : > { %v1653_v11 = vld [vmem:[%s1646_s28] sm:$0xff]   ;;  %v1656_v12 = vld [vmem:[%s1646_s28 + $0x8] sm:$0xff]   ;;  %v1659_v14 = vld [vmem:[%s1646_s28 + $0x10] sm:$0xff]   ;;  %v243_v20 = vadd.f32 1e-05, %v241_v13 }
  0x11   : > { %v1662_v15 = vld [vmem:[%s1646_s28 + $0x18] sm:$0xff]   ;;  %v1226_v16 = vunpack.c.l.bf16 %v1653_v11  ;;  %v1667_v18 = vld [vmem:[%s1646_s28 + $0x20] sm:$0xff]   ;;  %v1670_v19 = vld [vmem:[%s1646_s28 + $0x28] sm:$0xff]   ;;  %v1227_v21 = vunpack.c.h.bf16 %v1653_v11  ;;  %v1230_v22 = vunpack.c.l.bf16 %v1656_v12  ;;  %v1231_v23 = vunpack.c.h.bf16 %v1656_v12 }
  0x12   : > { %v1676_v24 = vld [vmem:[%s1646_s28 + $0x30] sm:$0xff]   ;;  %v1679_v25 = vld [vmem:[%s1646_s28 + $0x38] sm:$0xff]   ;;  %v1234_v26 = vunpack.c.l.bf16 %v1659_v14  ;;  %v1235_v27 = vunpack.c.h.bf16 %v1659_v14  ;;  %v1238_v28 = vunpack.c.l.bf16 %v1662_v15  ;;  %v1239_v29 = vunpack.c.h.bf16 %v1662_v15  ;;  %v1686_v30 = vld [vmem:[%s1646_s28 + $0x40] sm:$0xff]  }
  0x13   : > { %v1689_v31 = vld [vmem:[%s1646_s28 + $0x48] sm:$0xff]   ;;  %1582 = vrsqrt.f32 %v243_v20  ;;  %v1242_v32 = vunpack.c.l.bf16 %v1667_v18  ;;  %v1243_v33 = vunpack.c.h.bf16 %v1667_v18  ;;  %v1246_v34 = vunpack.c.l.bf16 %v1670_v19  ;;  %v1695_v35 = vld [vmem:[%s1646_s28 + $0x50] sm:$0xff]   ;;  %v1698_v36 = vld [vmem:[%s1646_s28 + $0x58] sm:$0xff]  }
  0x14   : > { %v1247_v37 = vunpack.c.h.bf16 %v1670_v19  ;;  %v1250_v38 = vunpack.c.l.bf16 %v1676_v24  ;;  %v1251_v39 = vunpack.c.h.bf16 %v1676_v24  ;;  %v1254_v40 = vunpack.c.l.bf16 %v1679_v25  ;;  %v1705_v41 = vld [vmem:[%s1646_s28 + $0x60] sm:$0xff]   ;;  %v1708_v42 = vld [vmem:[%s1646_s28 + $0x68] sm:$0xff]   ;;  %v1715_v47 = vld [vmem:[%s1646_s28 + $0x70] sm:$0xff]  }
  0x15   : > { %v1255_v43 = vunpack.c.h.bf16 %v1679_v25  ;;  %v1258_v44 = vunpack.c.l.bf16 %v1686_v30  ;;  %v1718_v48 = vld [vmem:[%s1646_s28 + $0x78] sm:$0xff]   ;;  %v1725_v53 = vld [vmem:[%s1646_s28 + $0x80] sm:$0xff]   ;;  %v1728_v54 = vld [vmem:[%s1646_s28 + $0x88] sm:$0xff]   ;;  %v2134_v25 = vunpack.c.h.bf16 %v1689_v31 }
  0x16   : > { %v1735_v59 = vld [vmem:[%s1646_s28 + $0x90] sm:$0xff]   ;;  %v1738_v60 = vld [vmem:[%s1646_s28 + $0x98] sm:$0xff]   ;;  %v1745_v1 = vld [vmem:[%s1646_s28 + $0xa0] sm:$0xff]  }
  0x17   : > { %v1748_v2 = vld [vmem:[%s1646_s28 + $0xa8] sm:$0xff]   ;;  %v1755_v8 = vld [vmem:[%s1646_s28 + $0xb0] sm:$0xff]   ;;  %v1758_v10 = vld [vmem:[%s1646_s28 + $0xb8] sm:$0xff]  }
  0x18   : > { %v1765_v4 = vld [vmem:[%s1646_s28 + $0xc0] sm:$0xff]   ;;  %v1768_v63 = vld [vmem:[%s1646_s28 + $0xc8] sm:$0xff]   ;;  %v1778_v0 = vld [vmem:[%s1646_s28 + $0xd0] sm:$0xff]  }
  0x19   : > { %v1785_v5 = vld [vmem:[%s1646_s28 + $0xd8] sm:$0xff]   ;;  %v1788_v56 = vld [vmem:[%s1646_s28 + $0xe0] sm:$0xff]   ;;  %v1795_v52 = vld [vmem:[%s1646_s28 + $0xe8] sm:$0xff]  }
  0x1a   : > { %v1801_v50 = vld [vmem:[%s1646_s28 + $0xf0] sm:$0xff]   ;;  %v1804_v49 = vld [vmem:[%s1646_s28 + $0xf8] sm:$0xff]   ;;  %v1342_v58 = vunpack.c.l.bf16 %v1795_v52 }
  0x1b   : > { %v1346_v46 = vunpack.c.l.bf16 %v1801_v50  ;;  %v1350_v3 = vunpack.c.l.bf16 %v1804_v49 }
  0x1d   : > { %v1583_v13 = vpop.eup %1582 }
  0x1e   : > { %v245_v61 = vmul.f32 %v1583_v13, %v242_v6  ;;  %v1339_v13 = vunpack.c.h.bf16 %v1788_v56 }
  0x20   : > { %v247_v57 = vmul.f32 %v245_v61, %v1639_v7  ;;  %v1816_v51 = vrot.slane %v245_v61, %v380_v17 }
  0x22   : > { %v248_v45 = vsub.f32 %v246_v62, %v247_v57  ;;  %v383_v7 = vmul.f32 %v1226_v16, %v1816_v51  ;;  %v384_v61 = vmul.f32 %v1227_v21, %v1816_v51  ;;  %v385_v20 = vmul.f32 %v1230_v22, %v1816_v51 }
  0x23   : > { %v386_v55 = vmul.f32 %v1231_v23, %v1816_v51  ;;  %v387_v57 = vmul.f32 %v1234_v26, %v1816_v51  ;;  %v388_v16 = vmul.f32 %v1235_v27, %v1816_v51  ;;  %v389_v11 = vmul.f32 %v1238_v28, %v1816_v51 }
  0x24   : > { %v1847_v21 = vrot.slane %v248_v45, %v380_v17  ;;  %v390_v12 = vmul.f32 %v1239_v29, %v1816_v51  ;;  %v391_v22 = vmul.f32 %v1242_v32, %v1816_v51  ;;  %v392_v14 = vmul.f32 %v1243_v33, %v1816_v51 }
  0x25   : > { %v393_v23 = vmul.f32 %v1246_v34, %v1816_v51  ;;  %v394_v9 = vmul.f32 %v1247_v37, %v1816_v51  ;;  %v395_v15 = vmul.f32 %v1250_v38, %v1816_v51  ;;  %v396_v17 = vmul.f32 %v1251_v39, %v1816_v51 }
  0x26   : > { %v453_v26 = vadd.f32 %v1847_v21, %v383_v7  ;;  %v454_v18 = vadd.f32 %v1847_v21, %v384_v61  ;;  %v455_v27 = vadd.f32 %v1847_v21, %v385_v20  ;;  %v456_v28 = vadd.f32 %v1847_v21, %v386_v55 }
  0x27   : > { %v457_v19 = vadd.f32 %v1847_v21, %v387_v57  ;;  %v458_v29 = vadd.f32 %v1847_v21, %v388_v16  ;;  %v459_v32 = vadd.f32 %v1847_v21, %v389_v11  ;;  %v460_v33 = vadd.f32 %v1847_v21, %v390_v12 }
  0x28   : > { %vm517_vm0 = vcmp.gt.f32.partialorder %v453_v26, 0.0  ;;  %vm518_vm1 = vcmp.gt.f32.partialorder %v454_v18, 0.0  ;;  %v581_v24 = vmul.f32 0.2, %v453_v26  ;;  %v582_v34 = vmul.f32 0.2, %v454_v18 }
  0x29   : > { %vm519_vm2 = vcmp.gt.f32.partialorder %v455_v27, 0.0  ;;  %vm520_vm3 = vcmp.gt.f32.partialorder %v456_v28, 0.0  ;;  %v583_v37 = vmul.f32 0.2, %v455_v27  ;;  %v584_v38 = vmul.f32 0.2, %v456_v28 }
  0x2a   : > { %v645_v39 = vsel %vm517_vm0, %v453_v26, %v581_v24  ;;  %v646_v45 = vsel %vm518_vm1, %v454_v18, %v582_v34  ;;  %vm521_vm4 = vcmp.gt.f32.partialorder %v457_v19, 0.0  ;;  %vm522_vm5 = vcmp.gt.f32.partialorder %v458_v29, 0.0 }
  0x2b   : > { %v1355_v55 = vpack.c.bf16 %v646_v45, %v645_v39  ;;  %v647_v62 = vsel %vm519_vm2, %v455_v27, %v583_v37  ;;  %v648_v20 = vsel %vm520_vm3, %v456_v28, %v584_v38  ;;  %v585_v7 = vmul.f32 0.2, %v457_v19 }
  0x2c   : > { %v1360_v61 = vpack.c.bf16 %v648_v20, %v647_v62  ;;  %v586_v57 = vmul.f32 0.2, %v458_v29  ;;  %vm523_vm6 = vcmp.gt.f32.partialorder %v459_v32, 0.0  ;;  %vm524_vm7 = vcmp.gt.f32.partialorder %v460_v33, 0.0 }
  0x2d   : > { %1356 = vst [vmem:[%s1883_s10] sm:$0xff] %v1355_v55   ;;  %v649_v16 = vsel %vm521_vm4, %v457_v19, %v585_v7  ;;  %v587_v11 = vmul.f32 0.2, %v459_v32  ;;  %v588_v12 = vmul.f32 0.2, %v460_v33  ;;  %v461_v6 = vadd.f32 %v1847_v21, %v391_v22 }
  0x2e   : > { %1543 = vst [vmem:[%s1883_s10 + $0x8] sm:$0xff] %v1360_v61   ;;  %v650_v26 = vsel %vm522_vm5, %v458_v29, %v586_v57  ;;  %v462_v18 = vadd.f32 %v1847_v21, %v392_v14  ;;  %v463_v27 = vadd.f32 %v1847_v21, %v393_v23  ;;  %v464_v28 = vadd.f32 %v1847_v21, %v394_v9 }
  0x2f   : > { %v1365_v24 = vpack.c.bf16 %v650_v26, %v649_v16  ;;  %v651_v34 = vsel %vm523_vm6, %v459_v32, %v587_v11  ;;  %v652_v37 = vsel %vm524_vm7, %v460_v33, %v588_v12  ;;  %vm525_vm8 = vcmp.gt.f32.partialorder %v461_v6, 0.0 }
  0x30   : > { %v1370_v38 = vpack.c.bf16 %v652_v37, %v651_v34  ;;  %vm526_vm9 = vcmp.gt.f32.partialorder %v462_v18, 0.0  ;;  %v589_v19 = vmul.f32 0.2, %v461_v6  ;;  %v590_v39 = vmul.f32 0.2, %v462_v18 }
  0x31   : > { %1544 = vst [vmem:[%s1883_s10 + $0x10] sm:$0xff] %v1365_v24   ;;  %vm527_vm10 = vcmp.gt.f32.partialorder %v463_v27, 0.0  ;;  %vm528_vm11 = vcmp.gt.f32.partialorder %v464_v28, 0.0  ;;  %v591_v22 = vmul.f32 0.2, %v463_v27  ;;  %v465_v23 = vadd.f32 %v1847_v21, %v395_v15 }
  0x32   : > { %v592_v29 = vmul.f32 0.2, %v464_v28  ;;  %1545 = vst [vmem:[%s1883_s10 + $0x18] sm:$0xff] %v1370_v38   ;;  %v653_v14 = vsel %vm525_vm8, %v461_v6, %v589_v19  ;;  %v654_v45 = vsel %vm526_vm9, %v462_v18, %v590_v39  ;;  %v466_v9 = vadd.f32 %v1847_v21, %v396_v17 }
  0x33   : > { %v1375_v32 = vpack.c.bf16 %v654_v45, %v653_v14  ;;  %v655_v33 = vsel %vm527_vm10, %v463_v27, %v591_v22  ;;  %v397_v62 = vmul.f32 %v1254_v40, %v1816_v51  ;;  %vm529_vm12 = vcmp.gt.f32.partialorder %v465_v23, 0.0 }
  0x34   : > { %v656_v55 = vsel %vm528_vm11, %v464_v28, %v592_v29  ;;  %vm530_vm13 = vcmp.gt.f32.partialorder %v466_v9, 0.0  ;;  %v593_v7 = vmul.f32 0.2, %v465_v23  ;;  %v594_v61 = vmul.f32 0.2, %v466_v9 }
  0x35   : > { %v1380_v20 = vpack.c.bf16 %v656_v55, %v655_v33  ;;  %1546 = vst [vmem:[%s1883_s10 + $0x20] sm:$0xff] %v1375_v32   ;;  %v398_v6 = vmul.f32 %v1255_v43, %v1816_v51  ;;  %v467_v15 = vadd.f32 %v1847_v21, %v397_v62  ;;  %v399_v17 = vmul.f32 %v1258_v44, %v1816_v51 }
  0x36   : > { %v657_v57 = vsel %vm529_vm12, %v465_v23, %v593_v7  ;;  %v2132_v40 = vunpack.c.h.bf16 %v1686_v30  ;;  %v2133_v11 = vunpack.c.l.bf16 %v1689_v31  ;;  %v402_v43 = vmul.f32 %v2134_v25, %v1816_v51 }
  0x37   : > { %1547 = vst [vmem:[%s1883_s10 + $0x28] sm:$0xff] %v1380_v20   ;;  %v658_v26 = vsel %vm530_vm13, %v466_v9, %v594_v61  ;;  %v468_v18 = vadd.f32 %v1847_v21, %v398_v6  ;;  %vm531_vm14 = vcmp.gt.f32.partialorder %v467_v15, 0.0  ;;  %v595_v44 = vmul.f32 0.2, %v467_v15 }
  0x38   : > { %v400_v16 = vmul.f32 %v2132_v40, %v1816_v51  ;;  %v401_v12 = vmul.f32 %v2133_v11, %v1816_v51  ;;  %v1385_v27 = vpack.c.bf16 %v658_v26, %v657_v57  ;;  %v469_v28 = vadd.f32 %v1847_v21, %v399_v17 }
  0x39   : > { %vm532_vm15 = vcmp.gt.f32.partialorder %v468_v18, 0.0  ;;  %v596_v34 = vmul.f32 0.2, %v468_v18  ;;  %v659_v37 = vsel %vm531_vm14, %v467_v15, %v595_v44  ;;  %v472_v38 = vadd.f32 %v1847_v21, %v402_v43 }
  0x3a   : > { %v470_v30 = vadd.f32 %v1847_v21, %v400_v16  ;;  %v471_v24 = vadd.f32 %v1847_v21, %v401_v12  ;;  %1548 = vst [vmem:[%s1883_s10 + $0x30] sm:$0xff] %v1385_v27   ;;  %vm533_vm0 = vcmp.gt.f32.partialorder %v469_v28, 0.0  ;;  %v597_v31 = vmul.f32 0.2, %v469_v28 }
  0x3b   : > { %v660_v39 = vsel %vm532_vm15, %v468_v18, %v596_v34  ;;  %vm536_vm3 = vcmp.gt.f32.partialorder %v472_v38, 0.0  ;;  %v600_v23 = vmul.f32 0.2, %v472_v38  ;;  %v2135_v33 = vunpack.c.l.bf16 %v1695_v35 }
  0x3c   : > { %vm534_vm1 = vcmp.gt.f32.partialorder %v470_v30, 0.0  ;;  %v598_v19 = vmul.f32 0.2, %v470_v30  ;;  %vm535_vm2 = vcmp.gt.f32.partialorder %v471_v24, 0.0  ;;  %v599_v22 = vmul.f32 0.2, %v471_v24 }
  0x3d   : > { %v1390_v29 = vpack.c.bf16 %v660_v39, %v659_v37  ;;  %v661_v14 = vsel %vm533_vm0, %v469_v28, %v597_v31  ;;  %v403_v55 = vmul.f32 %v2135_v33, %v1816_v51  ;;  %v2136_v62 = vunpack.c.h.bf16 %v1695_v35 }
  0x3e   : > { %v662_v45 = vsel %vm534_vm1, %v470_v30, %v598_v19  ;;  %v663_v32 = vsel %vm535_vm2, %v471_v24, %v599_v22  ;;  %v664_v7 = vsel %vm536_vm3, %v472_v38, %v600_v23  ;;  %v2137_v61 = vunpack.c.l.bf16 %v1698_v36 }
  0x3f   : > { %v1395_v9 = vpack.c.bf16 %v662_v45, %v661_v14  ;;  %v404_v20 = vmul.f32 %v2136_v62, %v1816_v51  ;;  %1549 = vst [vmem:[%s1883_s10 + $0x38] sm:$0xff] %v1390_v29   ;;  %v2138_v15 = vunpack.c.h.bf16 %v1698_v36  ;;  %v2139_v57 = vunpack.c.l.bf16 %v1705_v41 }
  0x40   : > { %v405_v6 = vmul.f32 %v2137_v61, %v1816_v51  ;;  %v1400_v16 = vpack.c.bf16 %v664_v7, %v663_v32  ;;  %v473_v35 = vadd.f32 %v1847_v21, %v403_v55  ;;  %v2140_v12 = vunpack.c.h.bf16 %v1705_v41 }
  0x41   : > { %v406_v17 = vmul.f32 %v2138_v15, %v1816_v51  ;;  %v407_v40 = vmul.f32 %v2139_v57, %v1816_v51  ;;  %1550 = vst [vmem:[%s1883_s10 + $0x40] sm:$0xff] %v1395_v9   ;;  %v474_v11 = vadd.f32 %v1847_v21, %v404_v20  ;;  %v2141_v18 = vunpack.c.l.bf16 %v1708_v42 }
  0x42   : > { %v408_v25 = vmul.f32 %v2140_v12, %v1816_v51  ;;  %v475_v43 = vadd.f32 %v1847_v21, %v405_v6  ;;  %1551 = vst [vmem:[%s1883_s10 + $0x48] sm:$0xff] %v1400_v16   ;;  %vm537_vm4 = vcmp.gt.f32.partialorder %v473_v35, 0.0  ;;  %v601_v27 = vmul.f32 0.2, %v473_v35 }
  0x43   : > { %v476_v26 = vadd.f32 %v1847_v21, %v406_v17  ;;  %v477_v36 = vadd.f32 %v1847_v21, %v407_v40  ;;  %v409_v44 = vmul.f32 %v2141_v18, %v1816_v51  ;;  %vm538_vm5 = vcmp.gt.f32.partialorder %v474_v11, 0.0 }
  0x44   : > { %v602_v28 = vmul.f32 0.2, %v474_v11  ;;  %vm539_vm6 = vcmp.gt.f32.partialorder %v475_v43, 0.0  ;;  %v603_v41 = vmul.f32 0.2, %v475_v43  ;;  %v665_v24 = vsel %vm537_vm4, %v473_v35, %v601_v27 }
  0x45   : > { %vm540_vm7 = vcmp.gt.f32.partialorder %v476_v26, 0.0  ;;  %v604_v30 = vmul.f32 0.2, %v476_v26  ;;  %v478_v37 = vadd.f32 %v1847_v21, %v408_v25  ;;  %vm541_vm8 = vcmp.gt.f32.partialorder %v477_v36, 0.0 }
  0x46   : > { %v666_v34 = vsel %vm538_vm5, %v474_v11, %v602_v28  ;;  %v667_v31 = vsel %vm539_vm6, %v475_v43, %v603_v41  ;;  %v605_v39 = vmul.f32 0.2, %v477_v36  ;;  %v2142_v14 = vunpack.c.h.bf16 %v1708_v42 }
  0x47   : > { %v1405_v38 = vpack.c.bf16 %v666_v34, %v665_v24  ;;  %v668_v19 = vsel %vm540_vm7, %v476_v26, %v604_v30  ;;  %vm542_vm9 = vcmp.gt.f32.partialorder %v478_v37, 0.0  ;;  %v606_v29 = vmul.f32 0.2, %v478_v37 }
  0x48   : > { %v1410_v22 = vpack.c.bf16 %v668_v19, %v667_v31  ;;  %v410_v45 = vmul.f32 %v2142_v14, %v1816_v51  ;;  %v669_v23 = vsel %vm541_vm8, %v477_v36, %v605_v39  ;;  %v479_v9 = vadd.f32 %v1847_v21, %v409_v44 }
  0x49   : > { %1552 = vst [vmem:[%s1883_s10 + $0x50] sm:$0xff] %v1405_v38   ;;  %v2143_v32 = vunpack.c.l.bf16 %v1715_v47  ;;  %v2144_v55 = vunpack.c.h.bf16 %v1715_v47  ;;  %v670_v20 = vsel %vm542_vm9, %v478_v37, %v606_v29  ;;  %v2145_v42 = vunpack.c.l.bf16 %v1718_v48 }
  0x4a   : > { %1553 = vst [vmem:[%s1883_s10 + $0x58] sm:$0xff] %v1410_v22   ;;  %v480_v7 = vadd.f32 %v1847_v21, %v410_v45  ;;  %v2146_v6 = vunpack.c.h.bf16 %v1718_v48  ;;  %v1415_v17 = vpack.c.bf16 %v670_v20, %v669_v23  ;;  %vm543_vm10 = vcmp.gt.f32.partialorder %v479_v9, 0.0 }
  0x4b   : > { %v411_v33 = vmul.f32 %v2143_v32, %v1816_v51  ;;  %v412_v62 = vmul.f32 %v2144_v55, %v1816_v51  ;;  %v413_v61 = vmul.f32 %v2145_v42, %v1816_v51  ;;  %v607_v57 = vmul.f32 0.2, %v479_v9 }
  0x4c   : > { %v414_v15 = vmul.f32 %v2146_v6, %v1816_v51  ;;  %vm544_vm11 = vcmp.gt.f32.partialorder %v480_v7, 0.0  ;;  %v608_v47 = vmul.f32 0.2, %v480_v7  ;;  %1554 = vst [vmem:[%s1883_s10 + $0x60] sm:$0xff] %v1415_v17   ;;  %v2147_v28 = vunpack.c.l.bf16 %v1725_v53 }
  0x4d   : > { %v481_v40 = vadd.f32 %v1847_v21, %v411_v33  ;;  %v482_v16 = vadd.f32 %v1847_v21, %v412_v62  ;;  %v483_v35 = vadd.f32 %v1847_v21, %v413_v61  ;;  %v671_v11 = vsel %vm543_vm10, %v479_v9, %v607_v57 }
  0x4e   : > { %v484_v25 = vadd.f32 %v1847_v21, %v414_v15  ;;  %v672_v48 = vsel %vm544_vm11, %v480_v7, %v608_v47  ;;  %v415_v41 = vmul.f32 %v2147_v28, %v1816_v51  ;;  %v2148_v30 = vunpack.c.h.bf16 %v1725_v53 }
  0x4f   : > { %vm545_vm12 = vcmp.gt.f32.partialorder %v481_v40, 0.0  ;;  %v609_v12 = vmul.f32 0.2, %v481_v40  ;;  %vm546_vm13 = vcmp.gt.f32.partialorder %v482_v16, 0.0  ;;  %v610_v43 = vmul.f32 0.2, %v482_v16 }
  0x50   : > { %vm547_vm14 = vcmp.gt.f32.partialorder %v483_v35, 0.0  ;;  %v1420_v26 = vpack.c.bf16 %v672_v48, %v671_v11  ;;  %vm548_vm15 = vcmp.gt.f32.partialorder %v484_v25, 0.0  ;;  %v611_v18 = vmul.f32 0.2, %v483_v35 }
  0x51   : > { %v673_v36 = vsel %vm545_vm12, %v481_v40, %v609_v12  ;;  %v674_v44 = vsel %vm546_vm13, %v482_v16, %v610_v43  ;;  %v612_v27 = vmul.f32 0.2, %v484_v25  ;;  %v416_v24 = vmul.f32 %v2148_v30, %v1816_v51 }
  0x52   : > { %1555 = vst [vmem:[%s1883_s10 + $0x68] sm:$0xff] %v1420_v26   ;;  %v1425_v34 = vpack.c.bf16 %v674_v44, %v673_v36  ;;  %v675_v37 = vsel %vm547_vm14, %v483_v35, %v611_v18  ;;  %v2149_v38 = vunpack.c.l.bf16 %v1728_v54  ;;  %v2150_v19 = vunpack.c.h.bf16 %v1728_v54 }
  0x53   : > { %v676_v22 = vsel %vm548_vm15, %v484_v25, %v612_v27  ;;  %v485_v29 = vadd.f32 %v1847_v21, %v415_v41  ;;  %v486_v14 = vadd.f32 %v1847_v21, %v416_v24  ;;  %v2151_v53 = vunpack.c.l.bf16 %v1735_v59 }
  0x54   : > { %v417_v31 = vmul.f32 %v2149_v38, %v1816_v51  ;;  %v418_v39 = vmul.f32 %v2150_v19, %v1816_v51  ;;  %1556 = vst [vmem:[%s1883_s10 + $0x70] sm:$0xff] %v1425_v34   ;;  %v1430_v23 = vpack.c.bf16 %v676_v22, %v675_v37  ;;  %v2152_v33 = vunpack.c.h.bf16 %v1735_v59 }
  0x55   : > { %v419_v45 = vmul.f32 %v2151_v53, %v1816_v51  ;;  %vm549_vm0 = vcmp.gt.f32.partialorder %v485_v29, 0.0  ;;  %vm550_vm1 = vcmp.gt.f32.partialorder %v486_v14, 0.0  ;;  %v613_v55 = vmul.f32 0.2, %v485_v29 }
  0x56   : > { %v487_v9 = vadd.f32 %v1847_v21, %v417_v31  ;;  %v488_v32 = vadd.f32 %v1847_v21, %v418_v39  ;;  %v420_v54 = vmul.f32 %v2152_v33, %v1816_v51  ;;  %v614_v62 = vmul.f32 0.2, %v486_v14  ;;  %1557 = vst [vmem:[%s1883_s10 + $0x78] sm:$0xff] %v1430_v23  }
  0x57   : > { %v677_v42 = vsel %vm549_vm0, %v485_v29, %v613_v55  ;;  %v489_v6 = vadd.f32 %v1847_v21, %v419_v45  ;;  %v2153_v40 = vunpack.c.l.bf16 %v1738_v60  ;;  %v2154_v12 = vunpack.c.h.bf16 %v1738_v60 }
  0x58   : > { %vm551_vm2 = vcmp.gt.f32.partialorder %v487_v9, 0.0  ;;  %vm552_vm3 = vcmp.gt.f32.partialorder %v488_v32, 0.0  ;;  %v615_v20 = vmul.f32 0.2, %v487_v9  ;;  %v616_v7 = vmul.f32 0.2, %v488_v32 }
  0x59   : > { %v678_v61 = vsel %vm550_vm1, %v486_v14, %v614_v62  ;;  %v490_v15 = vadd.f32 %v1847_v21, %v420_v54  ;;  %v421_v47 = vmul.f32 %v2153_v40, %v1816_v51  ;;  %vm553_vm4 = vcmp.gt.f32.partialorder %v489_v6, 0.0 }
  0x5a   : > { %v1435_v17 = vpack.c.bf16 %v678_v61, %v677_v42  ;;  %v679_v59 = vsel %vm551_vm2, %v487_v9, %v615_v20  ;;  %v680_v57 = vsel %vm552_vm3, %v488_v32, %v616_v7  ;;  %v617_v35 = vmul.f32 0.2, %v489_v6 }
  0x5b   : > { %v1440_v16 = vpack.c.bf16 %v680_v57, %v679_v59  ;;  %vm554_vm5 = vcmp.gt.f32.partialorder %v490_v15, 0.0  ;;  %v618_v11 = vmul.f32 0.2, %v490_v15  ;;  %v422_v25 = vmul.f32 %v2154_v12, %v1816_v51 }
  0x5c   : > { %1558 = vst [vmem:[%s1883_s10 + $0x80] sm:$0xff] %v1435_v17   ;;  %v491_v48 = vadd.f32 %v1847_v21, %v421_v47  ;;  %v2155_v43 = vunpack.c.l.bf16 %v1745_v1  ;;  %v681_v36 = vsel %vm553_vm4, %v489_v6, %v617_v35  ;;  %v2156_v18 = vunpack.c.h.bf16 %v1745_v1 }
  0x5d   : > { %1559 = vst [vmem:[%s1883_s10 + $0x88] sm:$0xff] %v1440_v16   ;;  %v2157_v27 = vunpack.c.l.bf16 %v1748_v2  ;;  %v2158_v60 = vunpack.c.h.bf16 %v1748_v2  ;;  %v682_v30 = vsel %vm554_vm5, %v490_v15, %v618_v11  ;;  %v492_v24 = vadd.f32 %v1847_v21, %v422_v25 }
  0x5e   : > { %v423_v26 = vmul.f32 %v2155_v43, %v1816_v51  ;;  %v424_v44 = vmul.f32 %v2156_v18, %v1816_v51  ;;  %vm555_vm6 = vcmp.gt.f32.partialorder %v491_v48, 0.0  ;;  %v619_v34 = vmul.f32 0.2, %v491_v48 }
  0x5f   : > { %v425_v28 = vmul.f32 %v2157_v27, %v1816_v51  ;;  %v426_v41 = vmul.f32 %v2158_v60, %v1816_v51  ;;  %v1445_v37 = vpack.c.bf16 %v682_v30, %v681_v36  ;;  %vm556_vm7 = vcmp.gt.f32.partialorder %v492_v24, 0.0 }
  0x60   : > { %v493_v38 = vadd.f32 %v1847_v21, %v423_v26  ;;  %v494_v1 = vadd.f32 %v1847_v21, %v424_v44  ;;  %v620_v19 = vmul.f32 0.2, %v492_v24  ;;  %v683_v39 = vsel %vm555_vm6, %v491_v48, %v619_v34 }
  0x61   : > { %v495_v31 = vadd.f32 %v1847_v21, %v425_v28  ;;  %v496_v22 = vadd.f32 %v1847_v21, %v426_v41  ;;  %1560 = vst [vmem:[%s1883_s10 + $0x90] sm:$0xff] %v1445_v37   ;;  %v2159_v55 = vunpack.c.l.bf16 %v1755_v8  ;;  %v2160_v20 = vunpack.c.h.bf16 %v1755_v8 }
  0x62   : > { %vm557_vm8 = vcmp.gt.f32.partialorder %v493_v38, 0.0  ;;  %vm558_vm9 = vcmp.gt.f32.partialorder %v494_v1, 0.0  ;;  %v621_v2 = vmul.f32 0.2, %v493_v38  ;;  %v622_v29 = vmul.f32 0.2, %v494_v1 }
  0x63   : > { %v684_v14 = vsel %vm556_vm7, %v492_v24, %v620_v19  ;;  %vm559_vm10 = vcmp.gt.f32.partialorder %v495_v31, 0.0  ;;  %vm560_vm11 = vcmp.gt.f32.partialorder %v496_v22, 0.0  ;;  %v623_v53 = vmul.f32 0.2, %v495_v31 }
  0x64   : > { %v1450_v45 = vpack.c.bf16 %v684_v14, %v683_v39  ;;  %v685_v23 = vsel %vm557_vm8, %v493_v38, %v621_v2  ;;  %v686_v9 = vsel %vm558_vm9, %v494_v1, %v622_v29  ;;  %v624_v32 = vmul.f32 0.2, %v496_v22 }
  0x65   : > { %v1455_v33 = vpack.c.bf16 %v686_v9, %v685_v23  ;;  %v687_v54 = vsel %vm559_vm10, %v495_v31, %v623_v53  ;;  %v427_v62 = vmul.f32 %v2159_v55, %v1816_v51  ;;  %v428_v7 = vmul.f32 %v2160_v20, %v1816_v51 }
  0x66   : > { %1561 = vst [vmem:[%s1883_s10 + $0x98] sm:$0xff] %v1450_v45   ;;  %v688_v42 = vsel %vm560_vm11, %v496_v22, %v624_v32  ;;  %v2161_v61 = vunpack.c.l.bf16 %v1758_v10  ;;  %v2162_v15 = vunpack.c.h.bf16 %v1758_v10  ;;  %v2163_v59 = vunpack.c.l.bf16 %v1765_v4 }
  0x67   : > { %1562 = vst [vmem:[%s1883_s10 + $0xa0] sm:$0xff] %v1455_v33   ;;  %v1460_v40 = vpack.c.bf16 %v688_v42, %v687_v54  ;;  %v497_v8 = vadd.f32 %v1847_v21, %v427_v62  ;;  %v498_v47 = vadd.f32 %v1847_v21, %v428_v7  ;;  %v2164_v16 = vunpack.c.h.bf16 %v1765_v4 }
  0x68   : > { %v429_v6 = vmul.f32 %v2161_v61, %v1816_v51  ;;  %v430_v17 = vmul.f32 %v2162_v15, %v1816_v51  ;;  %v431_v57 = vmul.f32 %v2163_v59, %v1816_v51  ;;  %v2165_v25 = vunpack.c.l.bf16 %v1768_v63 }
  0x69   : > { %v432_v35 = vmul.f32 %v2164_v16, %v1816_v51  ;;  %1563 = vst [vmem:[%s1883_s10 + $0xa8] sm:$0xff] %v1460_v40   ;;  %vm561_vm12 = vcmp.gt.f32.partialorder %v497_v8, 0.0  ;;  %vm562_vm13 = vcmp.gt.f32.partialorder %v498_v47, 0.0  ;;  %v625_v43 = vmul.f32 0.2, %v497_v8 }
  0x6a   : > { %v499_v11 = vadd.f32 %v1847_v21, %v429_v6  ;;  %v500_v12 = vadd.f32 %v1847_v21, %v430_v17  ;;  %v501_v10 = vadd.f32 %v1847_v21, %v431_v57  ;;  %v433_v48 = vmul.f32 %v2165_v25, %v1816_v51 }
  0x6b   : > { %v626_v26 = vmul.f32 0.2, %v498_v47  ;;  %v689_v18 = vsel %vm561_vm12, %v497_v8, %v625_v43  ;;  %v502_v27 = vadd.f32 %v1847_v21, %v432_v35  ;;  %v2166_v37 = vunpack.c.h.bf16 %v1768_v63 }
  0x6c   : > { %vm563_vm14 = vcmp.gt.f32.partialorder %v499_v11, 0.0  ;;  %vm564_vm15 = vcmp.gt.f32.partialorder %v500_v12, 0.0  ;;  %v627_v4 = vmul.f32 0.2, %v499_v11  ;;  %v628_v36 = vmul.f32 0.2, %v500_v12 }
  0x6d   : > { %v690_v44 = vsel %vm562_vm13, %v498_v47, %v626_v26  ;;  %vm565_vm0 = vcmp.gt.f32.partialorder %v501_v10, 0.0  ;;  %v629_v30 = vmul.f32 0.2, %v501_v10  ;;  %vm566_vm1 = vcmp.gt.f32.partialorder %v502_v27, 0.0 }
  0x6e   : > { %v1465_v28 = vpack.c.bf16 %v690_v44, %v689_v18  ;;  %v691_v60 = vsel %vm563_vm14, %v499_v11, %v627_v4  ;;  %v692_v41 = vsel %vm564_vm15, %v500_v12, %v628_v36  ;;  %v630_v34 = vmul.f32 0.2, %v502_v27 }
  0x6f   : > { %v1470_v24 = vpack.c.bf16 %v692_v41, %v691_v60  ;;  %v434_v38 = vmul.f32 %v2166_v37, %v1816_v51  ;;  %v693_v1 = vsel %vm565_vm0, %v501_v10, %v629_v30  ;;  %v503_v31 = vadd.f32 %v1847_v21, %v433_v48 }
  0x70   : > { %1564 = vst [vmem:[%s1883_s10 + $0xb0] sm:$0xff] %v1465_v28   ;;  %v2167_v19 = vunpack.c.l.bf16 %v1778_v0  ;;  %v2168_v22 = vunpack.c.h.bf16 %v1778_v0  ;;  %v694_v29 = vsel %vm566_vm1, %v502_v27, %v630_v34  ;;  %v2169_v63 = vunpack.c.l.bf16 %v1785_v5 }
  0x71   : > { %1565 = vst [vmem:[%s1883_s10 + $0xb8] sm:$0xff] %v1470_v24   ;;  %v504_v14 = vadd.f32 %v1847_v21, %v434_v38  ;;  %v2170_v45 = vunpack.c.h.bf16 %v1785_v5  ;;  %v1475_v9 = vpack.c.bf16 %v694_v29, %v693_v1  ;;  %vm567_vm2 = vcmp.gt.f32.partialorder %v503_v31, 0.0 }
  0x72   : > { %v435_v39 = vmul.f32 %v2167_v19, %v1816_v51  ;;  %v436_v2 = vmul.f32 %v2168_v22, %v1816_v51  ;;  %v437_v53 = vmul.f32 %v2169_v63, %v1816_v51  ;;  %v631_v32 = vmul.f32 0.2, %v503_v31 }
  0x73   : > { %v438_v23 = vmul.f32 %v2170_v45, %v1816_v51  ;;  %vm568_vm3 = vcmp.gt.f32.partialorder %v504_v14, 0.0  ;;  %v632_v0 = vmul.f32 0.2, %v504_v14  ;;  %1566 = vst [vmem:[%s1883_s10 + $0xc0] sm:$0xff] %v1475_v9   ;;  %v2171_v57 = vunpack.c.l.bf16 %v1788_v56 }
  0x74   : > { %v505_v33 = vadd.f32 %v1847_v21, %v435_v39  ;;  %v506_v54 = vadd.f32 %v1847_v21, %v436_v2  ;;  %v507_v55 = vadd.f32 %v1847_v21, %v437_v53  ;;  %v695_v62 = vsel %vm567_vm2, %v503_v31, %v631_v32 }
  0x75   : > { %v508_v7 = vadd.f32 %v1847_v21, %v438_v23  ;;  %v696_v5 = vsel %vm568_vm3, %v504_v14, %v632_v0  ;;  %v439_v40 = vmul.f32 %v2171_v57, %v1816_v51  ;;  %v440_v8 = vmul.f32 %v1339_v13, %v1816_v51 }
  0x76   : > { %vm569_vm4 = vcmp.gt.f32.partialorder %v505_v33, 0.0  ;;  %v633_v20 = vmul.f32 0.2, %v505_v33  ;;  %vm570_vm5 = vcmp.gt.f32.partialorder %v506_v54, 0.0  ;;  %v634_v42 = vmul.f32 0.2, %v506_v54 }
  0x77   : > { %vm571_vm6 = vcmp.gt.f32.partialorder %v507_v55, 0.0  ;;  %v1480_v61 = vpack.c.bf16 %v696_v5, %v695_v62  ;;  %vm572_vm7 = vcmp.gt.f32.partialorder %v508_v7, 0.0  ;;  %v635_v15 = vmul.f32 0.2, %v507_v55 }
  0x78   : > { %v697_v6 = vsel %vm569_vm4, %v505_v33, %v633_v20  ;;  %v698_v17 = vsel %vm570_vm5, %v506_v54, %v634_v42  ;;  %v636_v59 = vmul.f32 0.2, %v508_v7  ;;  %v441_v35 = vmul.f32 %v1342_v58, %v1816_v51 }
  0x79   : > { %1567 = vst [vmem:[%s1883_s10 + $0xc8] sm:$0xff] %v1480_v61   ;;  %v1485_v47 = vpack.c.bf16 %v698_v17, %v697_v6  ;;  %v699_v16 = vsel %vm571_vm6, %v507_v55, %v635_v15  ;;  %v2172_v11 = vunpack.c.h.bf16 %v1795_v52  ;;  %v509_v25 = vadd.f32 %v1847_v21, %v439_v40 }
  0x7a   : > { %v700_v10 = vsel %vm572_vm7, %v508_v7, %v636_v59  ;;  %v510_v48 = vadd.f32 %v1847_v21, %v440_v8  ;;  %v443_v56 = vmul.f32 %v1346_v46, %v1816_v51  ;;  %v511_v43 = vadd.f32 %v1847_v21, %v441_v35 }
  0x7b   : > { %v442_v12 = vmul.f32 %v2172_v11, %v1816_v51  ;;  %1568 = vst [vmem:[%s1883_s10 + $0xd0] sm:$0xff] %v1485_v47   ;;  %v1490_v13 = vpack.c.bf16 %v700_v10, %v699_v16  ;;  %v2173_v58 = vunpack.c.h.bf16 %v1801_v50  ;;  %vm573_vm8 = vcmp.gt.f32.partialorder %v509_v25, 0.0 }
  0x7c   : > { %vm574_vm9 = vcmp.gt.f32.partialorder %v510_v48, 0.0  ;;  %v637_v4 = vmul.f32 0.2, %v509_v25  ;;  %v638_v36 = vmul.f32 0.2, %v510_v48  ;;  %vm575_vm10 = vcmp.gt.f32.partialorder %v511_v43, 0.0 }
  0x7d   : > { %v512_v26 = vadd.f32 %v1847_v21, %v442_v12  ;;  %v444_v52 = vmul.f32 %v2173_v58, %v1816_v51  ;;  %1569 = vst [vmem:[%s1883_s10 + $0xd8] sm:$0xff] %v1490_v13   ;;  %v639_v18 = vmul.f32 0.2, %v511_v43  ;;  %v513_v28 = vadd.f32 %v1847_v21, %v443_v56 }
  0x7e   : > { %v701_v44 = vsel %vm573_vm8, %v509_v25, %v637_v4  ;;  %v702_v27 = vsel %vm574_vm9, %v510_v48, %v638_v36  ;;  %v445_v24 = vmul.f32 %v1350_v3, %v1816_v51  ;;  %v2174_v1 = vunpack.c.h.bf16 %v1804_v49 }
  0x7f   : > { %vm576_vm11 = vcmp.gt.f32.partialorder %v512_v26, 0.0  ;;  %v640_v46 = vmul.f32 0.2, %v512_v26  ;;  %v514_v60 = vadd.f32 %v1847_v21, %v444_v52  ;;  %v1495_v41 = vpack.c.bf16 %v702_v27, %v701_v44 }
  0x80   : > { %v703_v50 = vsel %vm575_vm10, %v511_v43, %v639_v18  ;;  %vm577_vm12 = vcmp.gt.f32.partialorder %v513_v28, 0.0  ;;  %v641_v37 = vmul.f32 0.2, %v513_v28  ;;  %v446_v31 = vmul.f32 %v2174_v1, %v1816_v51 }
  0x81   : > { %v704_v30 = vsel %vm576_vm11, %v512_v26, %v640_v46  ;;  %vm578_vm13 = vcmp.gt.f32.partialorder %v514_v60, 0.0  ;;  %1570 = vst [vmem:[%s1883_s10 + $0xe0] sm:$0xff] %v1495_v41   ;;  %v642_v38 = vmul.f32 0.2, %v514_v60  ;;  %v515_v19 = vadd.f32 %v1847_v21, %v445_v24 }
  0x82   : > { %v1500_v34 = vpack.c.bf16 %v704_v30, %v703_v50  ;;  %v705_v39 = vsel %vm577_vm12, %v513_v28, %v641_v37  ;;  %v516_v2 = vadd.f32 %v1847_v21, %v446_v31 }
  0x83   : > { %v706_v22 = vsel %vm578_vm13, %v514_v60, %v642_v38  ;;  %vm579_vm14 = vcmp.gt.f32.partialorder %v515_v19, 0.0  ;;  %v643_v3 = vmul.f32 0.2, %v515_v19 }
  0x84   : > { %1571 = vst [vmem:[%s1883_s10 + $0xe8] sm:$0xff] %v1500_v34   ;;  %v1505_v29 = vpack.c.bf16 %v706_v22, %v705_v39  ;;  %vm580_vm15 = vcmp.gt.f32.partialorder %v516_v2, 0.0  ;;  %v644_v14 = vmul.f32 0.2, %v516_v2 }
  0x85   : > { %v707_v63 = vsel %vm579_vm14, %v515_v19, %v643_v3 }
  0x86   : > { %1572 = vst [vmem:[%s1883_s10 + $0xf0] sm:$0xff] %v1505_v29   ;;  %v708_v53 = vsel %vm580_vm15, %v516_v2, %v644_v14 }
  0x87   : > { %v1510_v45 = vpack.c.bf16 %v708_v53, %v707_v63 }
  0x89   : > { %1573 = vst [vmem:[%s1883_s10 + $0xf8] sm:$0xff] %v1510_v45  }
  0x8a PF: > { %s15_s18 = sadd.s32 1, %s1590_s18  }
  0x8b   : > { %p12_p4 = scmp.ge.s32.totalorder %s15_s18, 8  }
  0x8d   :  { %14 = sbr.rel (!%p12_p4) target bundleno = 1 (0x1), region = 70 }

// kernel: critic_forward.5
= control target key start
LH: loop header
LB: loop body
LE: loop exit
PB: predicated region body
PF: predicated region fallthrough
CT: control target
= control target key end

     0   :  { %s2176_s15 = smov 0   ;;  %s2178_s16 = smov 0   ;;  %s2730_s0 = inlined_call_operand.vmem [shape: bf16[3072,128], index: 0, kind: input, shape index: {}]   ;;  %s2731_s1 = inlined_call_operand.vmem [shape: bf16[128,128], index: 1, kind: input, shape index: {}]   ;;  %s2732_s2 = inlined_call_operand.vmem [shape: bf16[3072,128], index: 2, kind: output, shape index: {0}]   ;;  %s2733_s3 = inlined_call_operand.vmem [shape: f32[1,256], index: 3, kind: output, shape index: {1}]   ;;  %s2734_s4 = inlined_call_operand.vmem [shape: f32[1,256], index: 4, kind: output, shape index: {2}]  }
   0x1   :  { %s2180_s17 = smov 0   ;;  %s2182_s18 = smov 0  }
   0x2   :  { %s2184_s19 = smov 0  }
   0x3 LB: > { %s24_s20 = sadd.s32 1, %s2140_s17  ;;  %s27_s21 = sadd.s32 1, %s2144_s18  ;;  %s2148_s19 = sphi %s2184_s19, %s15_s19   ;;  %s2144_s18 = sphi %s2182_s18, %s2786_s18   ;;  %s2140_s17 = sphi %s2180_s17, %s2785_s17   ;;  %s2136_s16 = sphi %s2178_s16, %s2784_s16   ;;  %s2132_s15 = sphi %s2176_s15, %s2783_s15  }
   0x4   : > { %p25_p0 = scmp.ge.s32.totalorder %s24_s20, 3  ;;  %p1526_p1 = scmp.ge.s32.totalorder %s2148_s19, 1 }
   0x5   : > { %p192_p2 = scmp.lt.s32.totalorder %s2148_s19, 7 }
   0x6   : > { %s2788_s20 = smov (%p25_p0, %s24_s20), 0  ;;  %s2790_s21 = smov (!%p25_p0, %s27_s21), %s2144_s18 }
   0x7   : > { %p193_p3 = pnand %p1526_p1, %p192_p2  ;;  %p29_p4 = scmp.ge.s32.totalorder %s2790_s21, 2 }
   0x9   : > { %s2792_s21 = smov (%p29_p4, %s2790_s21), 0  ;;  %196 = sbr.rel (%p193_p3) target bundleno = 476 (0x1dc), region = 28 }
  0x10   : > { %p248_p5 = scmp.lt.s32.totalorder %s2136_s16, 1  ;;  %v2070_v0 = vld [vmem:[%s2731_s1] sm:$0xff]   ;;  %v2071_v1 = vld [vmem:[%s2731_s1 + $0x8] sm:$0xff]   ;;  %s228_s26 = smul.u32 3, %s2136_s16  ;;  %v2072_v2 = vld [vmem:[%s2731_s1 + $0x10] sm:$0xff]  }
  0x11   : > { %1933 = vmatprep.subr.bf16.mxu0 %v2070_v0  ;;  %2013 = vmatprep.subr.bf16.mxu1 %v2070_v0  ;;  %v2073_v3 = vld [vmem:[%s2731_s1 + $0x18] sm:$0xff]   ;;  %v2074_v4 = vld [vmem:[%s2731_s1 + $0x20] sm:$0xff]   ;;  %v2075_v7 = vld [vmem:[%s2731_s1 + $0x28] sm:$0xff]   ;;  %p1635_p7 = scmp.ne.s32.totalorder %s2132_s15, 0 }
  0x12   : > { %s2794_s16 = smov (!%p248_p5, %s2136_s16), 1  ;;  %1934 = vmatpush3.bf16.msra.mxu0 %v2070_v0  ;;  %2021 = vmatpush3.bf16.msra.mxu1 %v2070_v0  ;;  %s229_s27 = sadd.s32 %s2132_s15, %s228_s26  ;;  %v2076_v8 = vld [vmem:[%s2731_s1 + $0x30] sm:$0xff]   ;;  %v2077_v9 = vld [vmem:[%s2731_s1 + $0x38] sm:$0xff]  }
  0x13   : > { %s2218_s30 = scalar_lea.vmem %s2733_s3, %s2794_s16  ;;  %s2223_s7 = scalar_lea.vmem %s2734_s4, %s2794_s16  ;;  %1935 = vmatprep.subr.bf16.mxu0 %v2071_v1  ;;  %2014 = vmatprep.subr.bf16.mxu1 %v2071_v1 }
  0x14   : > { %s1527_s10 = sshll.u32 %s229_s27, 6 }
  0x15   : > { %p231_p6 = scmp.lt.s32.totalorder %s1527_s10, 383 }
  0x16   : > { %1936 = vmatpush3.bf16.msra.mxu0 %v2071_v1  ;;  %2022 = vmatpush3.bf16.msra.mxu1 %v2071_v1 }
  0x17   : > { %1937 = vmatprep.subr.bf16.mxu0 %v2072_v2  ;;  %2015 = vmatprep.subr.bf16.mxu1 %v2072_v2  ;;  %s2796_s10 = smov (!%p231_p6, %s1527_s10), 383 }
  0x18   : > { %s1528_s13 = sshll.u32 %s2796_s10, 2 }
  0x19   : > { %s2242_s24 = scalar_lea.vmem %s2730_s0, %s1528_s13  ;;  %s2298_s9 = scalar_lea.vmem %s2732_s2, %s1528_s13 }
  0x1a   : > { %1938 = vmatpush3.bf16.msra.mxu0 %v2072_v2  ;;  %2023 = vmatpush3.bf16.msra.mxu1 %v2072_v2  ;;  %v2078_v5 = vld [vmem:[%s2242_s24] sm:$0xff]   ;;  %v2080_v10 = vld [vmem:[%s2242_s24 + $0x8] sm:$0xff]   ;;  %v2082_v12 = vld [vmem:[%s2242_s24 + $0x10] sm:$0xff]  }
  0x1b   : > { %1939 = vmatprep.subr.bf16.mxu0 %v2073_v3  ;;  %2016 = vmatprep.subr.bf16.mxu1 %v2073_v3  ;;  %v2079_v6 = vld [vmem:[%s2242_s24 + $0x80] sm:$0xff]   ;;  %v2081_v11 = vld [vmem:[%s2242_s24 + $0x88] sm:$0xff]   ;;  %v2083_v13 = vld [vmem:[%s2242_s24 + $0x90] sm:$0xff]  }
  0x1c   : > { %1949 = vmatprep.mubr.bf16.mxu0 %v2078_v5  ;;  %1981 = vmatprep.mubr.bf16.mxu1 %v2079_v6  ;;  %v2084_v14 = vld [vmem:[%s2242_s24 + $0x18] sm:$0xff]   ;;  %v2086_v16 = vld [vmem:[%s2242_s24 + $0x20] sm:$0xff]   ;;  %v2088_v18 = vld [vmem:[%s2242_s24 + $0x28] sm:$0xff]  }
  0x1d   : > { %v2085_v15 = vld [vmem:[%s2242_s24 + $0x98] sm:$0xff]   ;;  %v2087_v17 = vld [vmem:[%s2242_s24 + $0xa0] sm:$0xff]   ;;  %v2089_v19 = vld [vmem:[%s2242_s24 + $0xa8] sm:$0xff]  }
  0x1e   : > { %1940 = vmatpush3.bf16.msra.mxu0 %v2073_v3  ;;  %2024 = vmatpush3.bf16.msra.mxu1 %v2073_v3  ;;  %v2090_v20 = vld [vmem:[%s2242_s24 + $0x30] sm:$0xff]   ;;  %v2092_v22 = vld [vmem:[%s2242_s24 + $0x38] sm:$0xff]   ;;  %v2094_v24 = vld [vmem:[%s2242_s24 + $0x40] sm:$0xff]  }
  0x1f   : > { %1941 = vmatprep.subr.bf16.mxu0 %v2074_v4  ;;  %2017 = vmatprep.subr.bf16.mxu1 %v2074_v4  ;;  %v2091_v21 = vld [vmem:[%s2242_s24 + $0xb0] sm:$0xff]   ;;  %v2093_v23 = vld [vmem:[%s2242_s24 + $0xb8] sm:$0xff]   ;;  %v2095_v25 = vld [vmem:[%s2242_s24 + $0xc0] sm:$0xff]  }
  0x20   : > { %v2096_v26 = vld [vmem:[%s2242_s24 + $0x48] sm:$0xff]   ;;  %v2098_v28 = vld [vmem:[%s2242_s24 + $0x50] sm:$0xff]   ;;  %v2100_v30 = vld [vmem:[%s2242_s24 + $0x58] sm:$0xff]  }
  0x21   : > { %v2097_v27 = vld [vmem:[%s2242_s24 + $0xc8] sm:$0xff]   ;;  %v2099_v29 = vld [vmem:[%s2242_s24 + $0xd0] sm:$0xff]   ;;  %v2101_v31 = vld [vmem:[%s2242_s24 + $0xd8] sm:$0xff]  }
  0x22   : > { %1942 = vmatpush3.bf16.msra.mxu0 %v2074_v4  ;;  %2025 = vmatpush3.bf16.msra.mxu1 %v2074_v4  ;;  %v2102_v32 = vld [vmem:[%s2242_s24 + $0x60] sm:$0xff]   ;;  %v2104_v34 = vld [vmem:[%s2242_s24 + $0x68] sm:$0xff]   ;;  %v2106_v36 = vld [vmem:[%s2242_s24 + $0x70] sm:$0xff]  }
  0x23   : > { %1943 = vmatprep.subr.bf16.mxu0 %v2075_v7  ;;  %2018 = vmatprep.subr.bf16.mxu1 %v2075_v7  ;;  %v2103_v33 = vld [vmem:[%s2242_s24 + $0xe0] sm:$0xff]   ;;  %v2105_v35 = vld [vmem:[%s2242_s24 + $0xe8] sm:$0xff]   ;;  %v2107_v37 = vld [vmem:[%s2242_s24 + $0xf0] sm:$0xff]  }
  0x24   : > { %v2108_v38 = vld [vmem:[%s2242_s24 + $0x78] sm:$0xff]  }
  0x25   : > { %v2109_v39 = vld [vmem:[%s2242_s24 + $0xf8] sm:$0xff]  }
  0x26   : > { %1944 = vmatpush3.bf16.msra.mxu0 %v2075_v7  ;;  %2026 = vmatpush3.bf16.msra.mxu1 %v2075_v7 }
  0x27   : > { %1945 = vmatprep.subr.bf16.mxu0 %v2076_v8  ;;  %2019 = vmatprep.subr.bf16.mxu1 %v2076_v8 }
  0x2a   : > { %1946 = vmatpush3.bf16.msra.mxu0 %v2076_v8  ;;  %2027 = vmatpush3.bf16.msra.mxu1 %v2076_v8 }
  0x2b   : > { %1947 = vmatprep.subr.bf16.mxu0 %v2077_v9  ;;  %2020 = vmatprep.subr.bf16.mxu1 %v2077_v9 }
  0x2e   : > { %1948 = vmatpush3.bf16.msra.mxu0 %v2077_v9  ;;  %2028 = vmatpush3.bf16.msra.mxu1 %v2077_v9 }
  0x31   : > { %1950 = vmatmul.mubr.bf16.vlgmr.msra.gmra.mrb[0].mxu0 %v2080_v10  ;;  %1982 = vmatmul.mubr.bf16.vlgmr.msra.gmra.mrb[0].mxu1 %v2081_v11 }
  0x32   : > { %1953 = vmatprep.mubr.bf16.mxu0 %v2082_v12  ;;  %1985 = vmatprep.mubr.bf16.mxu1 %v2083_v13 }
  0x39   : > { %1954 = vmatmul.mubr.bf16.gmra.mrb[4].mxu0 %v2084_v14  ;;  %1986 = vmatmul.mubr.bf16.gmra.mrb[4].mxu1 %v2085_v15 }
  0x3a   : > { %1957 = vmatprep.mubr.bf16.mxu0 %v2086_v16  ;;  %1989 = vmatprep.mubr.bf16.mxu1 %v2087_v17 }
  0x41   : > { %1958 = vmatmul.mubr.bf16.gmra.mrb[8].mxu0 %v2088_v18  ;;  %1990 = vmatmul.mubr.bf16.gmra.mrb[8].mxu1 %v2089_v19 }
  0x42   : > { %1961 = vmatprep.mubr.bf16.mxu0 %v2090_v20  ;;  %1993 = vmatprep.mubr.bf16.mxu1 %v2091_v21 }
  0x49   : > { %1962 = vmatmul.mubr.bf16.gmra.mrb[12].mxu0 %v2092_v22  ;;  %1994 = vmatmul.mubr.bf16.gmra.mrb[12].mxu1 %v2093_v23 }
  0x4a   : > { %1965 = vmatprep.mubr.bf16.mxu0 %v2094_v24  ;;  %1997 = vmatprep.mubr.bf16.mxu1 %v2095_v25 }
  0x51   : > { %1966 = vmatmul.mubr.bf16.gmra.mrb[16].mxu0 %v2096_v26  ;;  %1998 = vmatmul.mubr.bf16.gmra.mrb[16].mxu1 %v2097_v27 }
  0x52   : > { %1969 = vmatprep.mubr.bf16.mxu0 %v2098_v28  ;;  %2001 = vmatprep.mubr.bf16.mxu1 %v2099_v29 }
  0x59   : > { %1970 = vmatmul.mubr.bf16.gmra.mrb[20].mxu0 %v2100_v30  ;;  %2002 = vmatmul.mubr.bf16.gmra.mrb[20].mxu1 %v2101_v31 }
  0x5a   : > { %1973 = vmatprep.mubr.bf16.mxu0 %v2102_v32  ;;  %2005 = vmatprep.mubr.bf16.mxu1 %v2103_v33 }
  0x61   : > { %1974 = vmatmul.mubr.bf16.gmra.mrb[24].mxu0 %v2104_v34  ;;  %2006 = vmatmul.mubr.bf16.gmra.mrb[24].mxu1 %v2105_v35 }
  0x62   : > { %1977 = vmatprep.mubr.bf16.mxu0 %v2106_v36  ;;  %2009 = vmatprep.mubr.bf16.mxu1 %v2107_v37 }
  0x69   : > { %1978 = vmatmul.mubr.bf16.gmra.mrb[28].mxu0 %v2108_v38  ;;  %2010 = vmatmul.mubr.bf16.gmra.mrb[28].mxu1 %v2109_v39 }
 0x104   : > { %v2285_v40 = vpop.f32.mrb[0].mxu0  ;;  %v2287_v41 = vpop.f32.mrb[0].mxu1 }
 0x105   : > { %v2289_v42 = vpop.f32.mrb[1].mxu0  ;;  %v2291_v43 = vpop.f32.mrb[1].mxu1 }
 0x106   : > { %v2300_v44 = vpop.f32.mrb[2].mxu0  ;;  %v2302_v45 = vpop.f32.mrb[2].mxu1 }
 0x107   : > { %v1710_v46 = vpack.c.bf16 %v2300_v44, %v2285_v40  ;;  %v1790_v47 = vpack.c.bf16 %v2302_v45, %v2287_v41  ;;  %v2308_v48 = vpop.f32.mrb[3].mxu0  ;;  %v2310_v49 = vpop.f32.mrb[3].mxu1 }
 0x108   : > { %v1705_v50 = vpack.c.bf16 %v2308_v48, %v2289_v42  ;;  %v1785_v51 = vpack.c.bf16 %v2310_v49, %v2291_v43 }
 0x109   : > { %1862 = vst [vmem:[%s2298_s9 + $0x8] sm:$0xff] %v1710_v46   ;;  %1878 = vst [vmem:[%s2298_s9 + $0x88] sm:$0xff] %v1790_v47  }
 0x10a   : > { %1706 = vst [vmem:[%s2298_s9] sm:$0xff] %v1705_v50   ;;  %1877 = vst [vmem:[%s2298_s9 + $0x80] sm:$0xff] %v1785_v51  }
 0x10c   : > { %v2320_v52 = vpop.f32.mrb[4].mxu0  ;;  %v2322_v53 = vpop.f32.mrb[4].mxu1 }
 0x10d   : > { %v2324_v54 = vpop.f32.mrb[5].mxu0  ;;  %v2326_v55 = vpop.f32.mrb[5].mxu1 }
 0x10e   : > { %v2328_v56 = vpop.f32.mrb[6].mxu0  ;;  %v2330_v57 = vpop.f32.mrb[6].mxu1 }
 0x10f   : > { %v1720_v58 = vpack.c.bf16 %v2328_v56, %v2320_v52  ;;  %v1800_v59 = vpack.c.bf16 %v2330_v57, %v2322_v53  ;;  %v2336_v60 = vpop.f32.mrb[7].mxu0  ;;  %v2338_v61 = vpop.f32.mrb[7].mxu1 }
 0x110   : > { %v1715_v62 = vpack.c.bf16 %v2336_v60, %v2324_v54  ;;  %v1795_v63 = vpack.c.bf16 %v2338_v61, %v2326_v55 }
 0x111   : > { %1864 = vst [vmem:[%s2298_s9 + $0x18] sm:$0xff] %v1720_v58   ;;  %1880 = vst [vmem:[%s2298_s9 + $0x98] sm:$0xff] %v1800_v59  }
 0x112   : > { %1863 = vst [vmem:[%s2298_s9 + $0x10] sm:$0xff] %v1715_v62   ;;  %1879 = vst [vmem:[%s2298_s9 + $0x90] sm:$0xff] %v1795_v63  }
 0x114   : > { %v2348_v0 = vpop.f32.mrb[8].mxu0  ;;  %v2350_v1 = vpop.f32.mrb[8].mxu1 }
 0x115   : > { %v2352_v2 = vpop.f32.mrb[9].mxu0  ;;  %v2354_v3 = vpop.f32.mrb[9].mxu1 }
 0x116   : > { %v2356_v4 = vpop.f32.mrb[10].mxu0  ;;  %v2358_v5 = vpop.f32.mrb[10].mxu1 }
 0x117   : > { %v1730_v6 = vpack.c.bf16 %v2356_v4, %v2348_v0  ;;  %v1810_v7 = vpack.c.bf16 %v2358_v5, %v2350_v1  ;;  %v2364_v8 = vpop.f32.mrb[11].mxu0  ;;  %v2366_v9 = vpop.f32.mrb[11].mxu1 }
 0x118   : > { %v1725_v10 = vpack.c.bf16 %v2364_v8, %v2352_v2  ;;  %v1805_v11 = vpack.c.bf16 %v2366_v9, %v2354_v3 }
 0x119   : > { %1866 = vst [vmem:[%s2298_s9 + $0x28] sm:$0xff] %v1730_v6   ;;  %1882 = vst [vmem:[%s2298_s9 + $0xa8] sm:$0xff] %v1810_v7  }
 0x11a   : > { %1865 = vst [vmem:[%s2298_s9 + $0x20] sm:$0xff] %v1725_v10   ;;  %1881 = vst [vmem:[%s2298_s9 + $0xa0] sm:$0xff] %v1805_v11  }
 0x11c   : > { %v2376_v12 = vpop.f32.mrb[12].mxu0  ;;  %v2378_v13 = vpop.f32.mrb[12].mxu1 }
 0x11d   : > { %v2380_v14 = vpop.f32.mrb[13].mxu0  ;;  %v2382_v15 = vpop.f32.mrb[13].mxu1 }
 0x11e   : > { %v2384_v16 = vpop.f32.mrb[14].mxu0  ;;  %v2386_v17 = vpop.f32.mrb[14].mxu1 }
 0x11f   : > { %v1740_v18 = vpack.c.bf16 %v2384_v16, %v2376_v12  ;;  %v1820_v19 = vpack.c.bf16 %v2386_v17, %v2378_v13  ;;  %v2392_v20 = vpop.f32.mrb[15].mxu0  ;;  %v2394_v21 = vpop.f32.mrb[15].mxu1 }
 0x120   : > { %v1735_v22 = vpack.c.bf16 %v2392_v20, %v2380_v14  ;;  %v1815_v23 = vpack.c.bf16 %v2394_v21, %v2382_v15 }
 0x121   : > { %1868 = vst [vmem:[%s2298_s9 + $0x38] sm:$0xff] %v1740_v18   ;;  %1884 = vst [vmem:[%s2298_s9 + $0xb8] sm:$0xff] %v1820_v19  }
 0x122   : > { %1867 = vst [vmem:[%s2298_s9 + $0x30] sm:$0xff] %v1735_v22   ;;  %1883 = vst [vmem:[%s2298_s9 + $0xb0] sm:$0xff] %v1815_v23  }
 0x124   : > { %v2404_v24 = vpop.f32.mrb[16].mxu0  ;;  %v2406_v25 = vpop.f32.mrb[16].mxu1 }
 0x125   : > { %v2408_v26 = vpop.f32.mrb[17].mxu0  ;;  %v2410_v27 = vpop.f32.mrb[17].mxu1 }
 0x126   : > { %v2412_v28 = vpop.f32.mrb[18].mxu0  ;;  %v2414_v29 = vpop.f32.mrb[18].mxu1 }
 0x127   : > { %v1750_v30 = vpack.c.bf16 %v2412_v28, %v2404_v24  ;;  %v1830_v31 = vpack.c.bf16 %v2414_v29, %v2406_v25  ;;  %v2420_v32 = vpop.f32.mrb[19].mxu0  ;;  %v2422_v33 = vpop.f32.mrb[19].mxu1 }
 0x128   : > { %v1745_v34 = vpack.c.bf16 %v2420_v32, %v2408_v26  ;;  %v1825_v35 = vpack.c.bf16 %v2422_v33, %v2410_v27 }
 0x129   : > { %1870 = vst [vmem:[%s2298_s9 + $0x48] sm:$0xff] %v1750_v30   ;;  %1886 = vst [vmem:[%s2298_s9 + $0xc8] sm:$0xff] %v1830_v31  }
 0x12a   : > { %1869 = vst [vmem:[%s2298_s9 + $0x40] sm:$0xff] %v1745_v34   ;;  %1885 = vst [vmem:[%s2298_s9 + $0xc0] sm:$0xff] %v1825_v35  }
 0x12c   : > { %v2432_v36 = vpop.f32.mrb[20].mxu0  ;;  %v2434_v37 = vpop.f32.mrb[20].mxu1 }
 0x12d   : > { %2759 = vst [vmem:[#allocation2_spill] sm:$0xff] %v2434_v37  ;;  %v2436_v38 = vpop.f32.mrb[21].mxu0  ;;  %v2438_v39 = vpop.f32.mrb[21].mxu1 }
 0x12e   : > { %2760 = vst [vmem:[#allocation3_spill] sm:$0xff] %v2438_v39  ;;  %v2440_v46 = vpop.f32.mrb[22].mxu0  ;;  %v2442_v47 = vpop.f32.mrb[22].mxu1 }
 0x12f   : > { %2761 = vst [vmem:[#allocation4_spill] sm:$0xff] %v2442_v47  ;;  %v1760_v50 = vpack.c.bf16 %v2440_v46, %v2432_v36  ;;  %v1840_v51 = vpack.c.bf16 %v2442_v47, %v2434_v37  ;;  %v2448_v58 = vpop.f32.mrb[23].mxu0  ;;  %v2450_v59 = vpop.f32.mrb[23].mxu1  ;;  %v2150_v47 = vmov (!%p1635_p7), 0.0  }
 0x130   : > { %2762 = vst [vmem:[#allocation5_spill] sm:$0xff] %v2450_v59  ;;  %v1755_v62 = vpack.c.bf16 %v2448_v58, %v2436_v38  ;;  %v1835_v63 = vpack.c.bf16 %v2450_v59, %v2438_v39  ;;  %1188 = vst [vmem:[%s2218_s30] sm:$0x1] (!%p1635_p7), %v2150_v47 }
 0x131   : > { %1872 = vst [vmem:[%s2298_s9 + $0x58] sm:$0xff] %v1760_v50   ;;  %1888 = vst [vmem:[%s2298_s9 + $0xd8] sm:$0xff] %v1840_v51  }
 0x132   : > { %1871 = vst [vmem:[%s2298_s9 + $0x50] sm:$0xff] %v1755_v62   ;;  %1887 = vst [vmem:[%s2298_s9 + $0xd0] sm:$0xff] %v1835_v63  }
 0x133   : > { %1189 = vst [vmem:[%s2223_s7] sm:$0x1] (!%p1635_p7), %v2150_v47 }
 0x134   : > { %v2460_v6 = vpop.f32.mrb[24].mxu0  ;;  %v2462_v7 = vpop.f32.mrb[24].mxu1 }
 0x135   : > { %2763 = vst [vmem:[#allocation6_spill] sm:$0xff] %v2462_v7  ;;  %v2464_v10 = vpop.f32.mrb[25].mxu0  ;;  %v2466_v11 = vpop.f32.mrb[25].mxu1 }
 0x136   : > { %2764 = vst [vmem:[#allocation7_spill] sm:$0xff] %v2466_v11  ;;  %v2468_v18 = vpop.f32.mrb[26].mxu0  ;;  %v2470_v19 = vpop.f32.mrb[26].mxu1 }
 0x137   : > { %2765 = vst [vmem:[#allocation8_spill] sm:$0xff] %v2470_v19  ;;  %v1770_v22 = vpack.c.bf16 %v2468_v18, %v2460_v6  ;;  %v1850_v23 = vpack.c.bf16 %v2470_v19, %v2462_v7  ;;  %v2476_v30 = vpop.f32.mrb[27].mxu0  ;;  %v2478_v31 = vpop.f32.mrb[27].mxu1 }
 0x138   : > { %2766 = vst [vmem:[#allocation9_spill] sm:$0xff] %v2478_v31  ;;  %v1765_v34 = vpack.c.bf16 %v2476_v30, %v2464_v10  ;;  %v1845_v35 = vpack.c.bf16 %v2478_v31, %v2466_v11 }
 0x139   : > { %1874 = vst [vmem:[%s2298_s9 + $0x68] sm:$0xff] %v1770_v22   ;;  %1890 = vst [vmem:[%s2298_s9 + $0xe8] sm:$0xff] %v1850_v23  }
 0x13a   : > { %1873 = vst [vmem:[%s2298_s9 + $0x60] sm:$0xff] %v1765_v34   ;;  %1889 = vst [vmem:[%s2298_s9 + $0xe0] sm:$0xff] %v1845_v35  }
 0x13c   : > { %v2488_v50 = vpop.f32.mrb[28].mxu0  ;;  %v2490_v51 = vpop.f32.mrb[28].mxu1  ;;  %1187 = sbr.rel (%p1635_p7) target bundleno = 323 (0x143), region = 32 }
 0x13d   : > { %2767 = vst [vmem:[#allocation10_spill] sm:$0xff] %v2490_v51  ;;  %v2492_v62 = vpop.f32.mrb[29].mxu0  ;;  %v2494_v63 = vpop.f32.mrb[29].mxu1 }
 0x13e   : > { %2768 = vst [vmem:[#allocation11_spill] sm:$0xff] %v2494_v63  ;;  %v2496_v19 = vpop.f32.mrb[30].mxu0  ;;  %v2498_v7 = vpop.f32.mrb[30].mxu1 }
 0x13f   : > { %2769 = vst [vmem:[#allocation12_spill] sm:$0xff] %v2498_v7  ;;  %v1780_v22 = vpack.c.bf16 %v2496_v19, %v2488_v50  ;;  %v1860_v23 = vpack.c.bf16 %v2498_v7, %v2490_v51  ;;  %v2504_v34 = vpop.f32.mrb[31].mxu0  ;;  %v2506_v35 = vpop.f32.mrb[31].mxu1 }
 0x140   : > { %2770 = vst [vmem:[#allocation13_spill] sm:$0xff] %v2506_v35  ;;  %v1775_v31 = vpack.c.bf16 %v2504_v34, %v2492_v62  ;;  %v1855_v11 = vpack.c.bf16 %v2506_v35, %v2494_v63 }
 0x141   : > { %1876 = vst [vmem:[%s2298_s9 + $0x78] sm:$0xff] %v1780_v22   ;;  %1892 = vst [vmem:[%s2298_s9 + $0xf8] sm:$0xff] %v1860_v23  }
 0x142   : > { %1875 = vst [vmem:[%s2298_s9 + $0x70] sm:$0xff] %v1775_v31   ;;  %1891 = vst [vmem:[%s2298_s9 + $0xf0] sm:$0xff] %v1855_v11  }
 0x143 PF: > { %v1191_v7 = vadd.f32 %v2308_v48, %v2289_v42  ;;  %v1263_v47 = vmul.f32 %v2289_v42, %v2289_v42  ;;  %v1264_v37 = vmul.f32 %v2308_v48, %v2308_v48  ;;  %v1268_v48 = vmul.f32 %v2336_v60, %v2336_v60 }
 0x145   : > { %v1192_v51 = vadd.f32 %v2285_v40, %v1191_v7 }
 0x147   : > { %v1193_v35 = vadd.f32 %v2300_v44, %v1192_v51  ;;  %v1265_v51 = vmul.f32 %v2285_v40, %v2285_v40 }
 0x149   : > { %v1194_v22 = vadd.f32 %v1193_v35, %v2324_v54 }
 0x14b   : > { %v1195_v11 = vadd.f32 %v1194_v22, %v2336_v60  ;;  %v1266_v22 = vmul.f32 %v2300_v44, %v2300_v44 }
 0x14d   : > { %v1196_v31 = vadd.f32 %v2320_v52, %v1195_v11  ;;  %v1327_v11 = vadd.f32 %v1264_v37, %v1263_v47  ;;  %v1270_v37 = vmul.f32 %v2328_v56, %v2328_v56 }
 0x14f   : > { %v1197_v23 = vadd.f32 %v2328_v56, %v1196_v31  ;;  %v1328_v42 = vadd.f32 %v1327_v11, %v1265_v51  ;;  %v1271_v51 = vmul.f32 %v2352_v2, %v2352_v2  ;;  %v1273_v11 = vmul.f32 %v2348_v0, %v2348_v0 }
 0x151   : > { %v1198_v63 = vadd.f32 %v1197_v23, %v2352_v2  ;;  %v1267_v23 = vmul.f32 %v2324_v54, %v2324_v54 }
 0x153   : > { %v1199_v7 = vadd.f32 %v1198_v63, %v2364_v8  ;;  %v1329_v63 = vadd.f32 %v1328_v42, %v1266_v22  ;;  %v1275_v42 = vmul.f32 %v2380_v14, %v2380_v14 }
 0x155   : > { %v1200_v35 = vadd.f32 %v2348_v0, %v1199_v7  ;;  %v1269_v7 = vmul.f32 %v2320_v52, %v2320_v52  ;;  %v1330_v39 = vadd.f32 %v1329_v63, %v1267_v23  ;;  %v1276_v63 = vmul.f32 %v2392_v20, %v2392_v20 }
 0x157   : > { %v1201_v31 = vadd.f32 %v2356_v4, %v1200_v35  ;;  %v1331_v47 = vadd.f32 %v1330_v39, %v1268_v48  ;;  %v1274_v39 = vmul.f32 %v2356_v4, %v2356_v4 }
 0x159   : > { %v1202_v59 = vadd.f32 %v1201_v31, %v2380_v14  ;;  %v1332_v35 = vadd.f32 %v1331_v47, %v1269_v7  ;;  %v1277_v7 = vmul.f32 %v2376_v12, %v2376_v12 }
 0x15b   : > { %v1203_v40 = vadd.f32 %v1202_v59, %v2392_v20  ;;  %v1272_v59 = vmul.f32 %v2364_v8, %v2364_v8  ;;  %v1333_v22 = vadd.f32 %v1332_v35, %v1270_v37  ;;  %v1278_v37 = vmul.f32 %v2384_v16, %v2384_v16 }
 0x15c   : > { %v1280_v35 = vmul.f32 %v2420_v32, %v2420_v32 }
 0x15d   : > { %v1204_v44 = vadd.f32 %v2376_v12, %v1203_v40  ;;  %v1334_v31 = vadd.f32 %v1333_v22, %v1271_v51 }
 0x15f   : > { %v1205_v54 = vadd.f32 %v2384_v16, %v1204_v44  ;;  %v1335_v23 = vadd.f32 %v1334_v31, %v1272_v59  ;;  %v1281_v59 = vmul.f32 %v2404_v24, %v2404_v24  ;;  %v1283_v31 = vmul.f32 %v2436_v38, %v2436_v38 }
 0x161   : > { %v1206_v60 = vadd.f32 %v1205_v54, %v2408_v26  ;;  %v1336_v48 = vadd.f32 %v1335_v23, %v1273_v11  ;;  %v1279_v54 = vmul.f32 %v2408_v26, %v2408_v26 }
 0x163   : > { %v1207_v52 = vadd.f32 %v1206_v60, %v2420_v32  ;;  %v1337_v40 = vadd.f32 %v1336_v48, %v1274_v39  ;;  %v1284_v39 = vmul.f32 %v2448_v58, %v2448_v58  ;;  %v1286_v48 = vmul.f32 %v2440_v46, %v2440_v46 }
 0x165   : > { %v1208_v56 = vadd.f32 %v2404_v24, %v1207_v52  ;;  %v1338_v44 = vadd.f32 %v1337_v40, %v1275_v42  ;;  %v1282_v52 = vmul.f32 %v2412_v28, %v2412_v28 }
 0x167   : > { %v1209_v2 = vadd.f32 %v2412_v28, %v1208_v56  ;;  %v1339_v47 = vadd.f32 %v1338_v44, %v1276_v63  ;;  %v1287_v63 = vmul.f32 %v2464_v10, %v2464_v10  ;;  %v1289_v44 = vmul.f32 %v2460_v6, %v2460_v6 }
 0x169   : > { %v1210_v8 = vadd.f32 %v1209_v2, %v2436_v38  ;;  %v1340_v51 = vadd.f32 %v1339_v47, %v1277_v7  ;;  %v1285_v2 = vmul.f32 %v2432_v36, %v2432_v36 }
 0x16b   : > { %v1211_v0 = vadd.f32 %v1210_v8, %v2448_v58  ;;  %v1341_v60 = vadd.f32 %v1340_v51, %v1278_v37  ;;  %v1290_v37 = vmul.f32 %v2468_v18, %v2468_v18  ;;  %v1292_v51 = vmul.f32 %v2504_v34, %v2504_v34 }
 0x16d   : > { %v1212_v4 = vadd.f32 %v2432_v36, %v1211_v0  ;;  %v1342_v22 = vadd.f32 %v1341_v60, %v1279_v54  ;;  %v1288_v0 = vmul.f32 %v2476_v30, %v2476_v30 }
 0x16f   : > { %v1213_v14 = vadd.f32 %v2440_v46, %v1212_v4  ;;  %v1343_v11 = vadd.f32 %v1342_v22, %v1280_v35  ;;  %v1293_v35 = vmul.f32 %v2488_v50, %v2488_v50  ;;  %v1295_v22 = vmul.f32 %v2291_v43, %v2291_v43 }
 0x171   : > { %v1214_v20 = vadd.f32 %v1213_v14, %v2464_v10  ;;  %v1344_v56 = vadd.f32 %v1343_v11, %v1281_v59  ;;  %v1291_v14 = vmul.f32 %v2492_v62, %v2492_v62 }
 0x173   : > { %v1215_v12 = vadd.f32 %v1214_v20, %v2476_v30  ;;  %v1345_v23 = vadd.f32 %v1344_v56, %v1282_v52  ;;  %v1296_v52 = vmul.f32 %v2310_v49, %v2310_v49  ;;  %v1298_v56 = vmul.f32 %v2302_v45, %v2302_v45 }
 0x175   : > { %v1216_v16 = vadd.f32 %v2460_v6, %v1215_v12  ;;  %v1346_v42 = vadd.f32 %v1345_v23, %v1283_v31  ;;  %v1294_v12 = vmul.f32 %v2496_v19, %v2496_v19 }
 0x177   : > { %v1217_v26 = vadd.f32 %v2468_v18, %v1216_v16  ;;  %v1347_v8 = vadd.f32 %v1346_v42, %v1284_v39  ;;  %v1299_v39 = vmul.f32 %v2326_v55, %v2326_v55  ;;  %v1301_v42 = vmul.f32 %v2322_v53, %v2322_v53 }
 0x179   : > { %v1218_v32 = vadd.f32 %v1217_v26, %v2492_v62  ;;  %v1348_v40 = vadd.f32 %v1347_v8, %v1285_v2  ;;  %v1297_v26 = vmul.f32 %v2287_v41, %v2287_v41 }
 0x17b   : > { %v1219_v24 = vadd.f32 %v1218_v32, %v2504_v34  ;;  %v1349_v7 = vadd.f32 %v1348_v40, %v1286_v48  ;;  %v1302_v48 = vmul.f32 %v2330_v57, %v2330_v57  ;;  %v1304_v40 = vmul.f32 %v2366_v9, %v2366_v9 }
 0x17d   : > { %v1220_v28 = vadd.f32 %v2488_v50, %v1219_v24  ;;  %v1350_v4 = vadd.f32 %v1349_v7, %v1287_v63  ;;  %v1300_v24 = vmul.f32 %v2338_v61, %v2338_v61 }
 0x17f   : > { %v1221_v38 = vadd.f32 %v2496_v19, %v1220_v28  ;;  %v1351_v47 = vadd.f32 %v1350_v4, %v1288_v0  ;;  %v1305_v0 = vmul.f32 %v2350_v1, %v2350_v1  ;;  %v1307_v4 = vmul.f32 %v2382_v15, %v2382_v15 }
 0x181   : > { %v1222_v58 = vadd.f32 %v1221_v38, %v2291_v43  ;;  %v1352_v54 = vadd.f32 %v1351_v47, %v1289_v44  ;;  %v1303_v38 = vmul.f32 %v2354_v3, %v2354_v3  ;;  %v1308_v47 = vmul.f32 %v2394_v21, %v2394_v21 }
 0x183   : > { %v1223_v36 = vadd.f32 %v1222_v58, %v2310_v49  ;;  %v1353_v20 = vadd.f32 %v1352_v54, %v1290_v37  ;;  %v1309_v54 = vmul.f32 %v2378_v13, %v2378_v13 }
 0x185   : > { %v1224_v46 = vadd.f32 %v2287_v41, %v1223_v36  ;;  %v1354_v60 = vadd.f32 %v1353_v20, %v1291_v14  ;;  %v1306_v36 = vmul.f32 %v2358_v5, %v2358_v5  ;;  %v1310_v20 = vmul.f32 %v2386_v17, %v2386_v17 }
 0x187   : > { %v1225_v10 = vadd.f32 %v2302_v45, %v1224_v46  ;;  %v1355_v59 = vadd.f32 %v1354_v60, %v1292_v51  ;;  %v1311_v60 = vmul.f32 %v2410_v27, %v2410_v27 }
 0x189   : > { %v1226_v30 = vadd.f32 %v1225_v10, %v2326_v55  ;;  %v1356_v16 = vadd.f32 %v1355_v59, %v1293_v35  ;;  %v1312_v59 = vmul.f32 %v2422_v33, %v2422_v33 }
 0x18b   : > { %v1227_v6 = vadd.f32 %v1226_v30, %v2338_v61  ;;  %v1357_v11 = vadd.f32 %v1356_v16, %v1294_v12  ;;  %v1313_v16 = vmul.f32 %v2406_v25, %v2406_v25 }
 0x18d   : > { %v1228_v18 = vadd.f32 %v2322_v53, %v1227_v6  ;;  %v1358_v31 = vadd.f32 %v1357_v11, %v1295_v22  ;;  %v1314_v11 = vmul.f32 %v2414_v29, %v2414_v29 }
 0x18f   : > { %v1229_v62 = vadd.f32 %v2330_v57, %v1228_v18  ;;  %v1359_v32 = vadd.f32 %v1358_v31, %v1296_v52 }
 0x191   : > { %v1230_v34 = vadd.f32 %v1229_v62, %v2354_v3  ;;  %v1360_v23 = vadd.f32 %v1359_v32, %v1297_v26 }
 0x193   : > { %v1231_v50 = vadd.f32 %v1230_v34, %v2366_v9  ;;  %v1361_v2 = vadd.f32 %v1360_v23, %v1298_v56  ;;  %v2771_v9 = vld [vmem:[#allocation3_spill] sm:$0xff] }
 0x194   : > { %v1315_v31 = vmul.f32 %v2771_v9, %v2771_v9 }
 0x195   : > { %v1232_v19 = vadd.f32 %v2350_v1, %v1231_v50  ;;  %v1362_v28 = vadd.f32 %v1361_v2, %v1299_v39  ;;  %v2772_v1 = vld [vmem:[#allocation5_spill] sm:$0xff] }
 0x196   : > { %v1316_v32 = vmul.f32 %v2772_v1, %v2772_v1 }
 0x197   : > { %v1233_v43 = vadd.f32 %v2358_v5, %v1232_v19  ;;  %v1363_v8 = vadd.f32 %v1362_v28, %v1300_v24  ;;  %v2773_v5 = vld [vmem:[#allocation2_spill] sm:$0xff] }
 0x198   : > { %v1317_v23 = vmul.f32 %v2773_v5, %v2773_v5 }
 0x199   : > { %v1234_v49 = vadd.f32 %v1233_v43, %v2382_v15  ;;  %v1364_v63 = vadd.f32 %v1363_v8, %v1301_v42  ;;  %v2774_v15 = vld [vmem:[#allocation4_spill] sm:$0xff] }
 0x19a   : > { %v1318_v2 = vmul.f32 %v2774_v15, %v2774_v15  ;;  %v2782_v42 = vld [vmem:[#allocation12_spill] sm:$0xff] }
 0x19b   : > { %v1235_v41 = vadd.f32 %v1234_v49, %v2394_v21  ;;  %v1365_v58 = vadd.f32 %v1364_v63, %v1302_v48  ;;  %v2775_v21 = vld [vmem:[#allocation7_spill] sm:$0xff] }
 0x19d   : > { %v1236_v45 = vadd.f32 %v2378_v13, %v1235_v41  ;;  %v1366_v7 = vadd.f32 %v1365_v58, %v1303_v38  ;;  %v2776_v13 = vld [vmem:[#allocation9_spill] sm:$0xff] }
 0x19f   : > { %v1237_v55 = vadd.f32 %v2386_v17, %v1236_v45  ;;  %v1367_v44 = vadd.f32 %v1366_v7, %v1304_v40  ;;  %v2777_v17 = vld [vmem:[#allocation6_spill] sm:$0xff]  ;;  %v1319_v45 = vmul.f32 %v2775_v21, %v2775_v21 }
 0x1a1   : > { %v1238_v61 = vadd.f32 %v1237_v55, %v2410_v27  ;;  %v1368_v46 = vadd.f32 %v1367_v44, %v1305_v0  ;;  %v2778_v27 = vld [vmem:[#allocation8_spill] sm:$0xff]  ;;  %v1320_v55 = vmul.f32 %v2776_v13, %v2776_v13 }
 0x1a3   : > { %v1239_v53 = vadd.f32 %v1238_v61, %v2422_v33  ;;  %v1369_v10 = vadd.f32 %v1368_v46, %v1306_v36  ;;  %v2779_v33 = vld [vmem:[#allocation11_spill] sm:$0xff]  ;;  %v1321_v61 = vmul.f32 %v2777_v17, %v2777_v17  ;;  %v1190_v46 = vld [vmem:[%s2218_s30] sm:$0x1] }
 0x1a5   : > { %v1240_v57 = vadd.f32 %v2406_v25, %v1239_v53  ;;  %v1370_v30 = vadd.f32 %v1369_v10, %v1307_v4  ;;  %v2780_v25 = vld [vmem:[#allocation13_spill] sm:$0xff]  ;;  %v1322_v53 = vmul.f32 %v2778_v27, %v2778_v27 }
 0x1a7   : > { %v1241_v3 = vadd.f32 %v2414_v29, %v1240_v57  ;;  %v1371_v6 = vadd.f32 %v1370_v30, %v1308_v47  ;;  %v2781_v29 = vld [vmem:[#allocation10_spill] sm:$0xff]  ;;  %v1323_v57 = vmul.f32 %v2779_v33, %v2779_v33 }
 0x1a9   : > { %v1242_v37 = vadd.f32 %v1241_v3, %v2771_v9  ;;  %v1372_v18 = vadd.f32 %v1371_v6, %v1309_v54  ;;  %v1324_v3 = vmul.f32 %v2780_v25, %v2780_v25 }
 0x1ab   : > { %v1243_v14 = vadd.f32 %v1242_v37, %v2772_v1  ;;  %v1373_v62 = vadd.f32 %v1372_v18, %v1310_v20  ;;  %v1325_v37 = vmul.f32 %v2781_v29, %v2781_v29  ;;  %v1326_v1 = vmul.f32 %v2782_v42, %v2782_v42 }
 0x1ad   : > { %v1244_v51 = vadd.f32 %v2773_v5, %v1243_v14  ;;  %v1374_v34 = vadd.f32 %v1373_v62, %v1311_v60 }
 0x1af   : > { %v1245_v35 = vadd.f32 %v2774_v15, %v1244_v51  ;;  %v1375_v50 = vadd.f32 %v1374_v34, %v1312_v59 }
 0x1b1   : > { %v1246_v12 = vadd.f32 %v1245_v35, %v2775_v21  ;;  %v1376_v19 = vadd.f32 %v1375_v50, %v1313_v16  ;;  %v1262_v35 = vld [vmem:[%s2223_s7] sm:$0x1] }
 0x1b3   : > { %v1247_v22 = vadd.f32 %v1246_v12, %v2776_v13  ;;  %v1377_v43 = vadd.f32 %v1376_v19, %v1314_v11 }
 0x1b5   : > { %v1248_v52 = vadd.f32 %v2777_v17, %v1247_v22  ;;  %v1378_v49 = vadd.f32 %v1377_v43, %v1315_v31 }
 0x1b7   : > { %v1249_v26 = vadd.f32 %v2778_v27, %v1248_v52  ;;  %v1379_v41 = vadd.f32 %v1378_v49, %v1316_v32 }
 0x1b9   : > { %v1250_v56 = vadd.f32 %v1249_v26, %v2779_v33  ;;  %v1380_v48 = vadd.f32 %v1379_v41, %v1317_v23 }
 0x1bb   : > { %v1251_v39 = vadd.f32 %v1250_v56, %v2780_v25  ;;  %v1381_v38 = vadd.f32 %v1380_v48, %v1318_v2 }
 0x1bd   : > { %v1252_v24 = vadd.f32 %v2781_v29, %v1251_v39  ;;  %v1382_v40 = vadd.f32 %v1381_v38, %v1319_v45 }
 0x1bf   : > { %v1253_v28 = vadd.f32 %v2782_v42, %v1252_v24  ;;  %v1383_v0 = vadd.f32 %v1382_v40, %v1320_v55 }
 0x1c1   : > { %v1254_v8 = vrot.slane %v1253_v28, 4  ;;  %v1384_v36 = vadd.f32 %v1383_v0, %v1321_v61 }
 0x1c3   : > { %v1255_v63 = vadd.f32 %v1254_v8, %v1253_v28  ;;  %v1385_v4 = vadd.f32 %v1384_v36, %v1322_v53 }
 0x1c5   : > { %v1256_v58 = vrot.slane %v1255_v63, 2  ;;  %v1386_v47 = vadd.f32 %v1385_v4, %v1323_v57 }
 0x1c7   : > { %v1257_v7 = vadd.f32 %v1256_v58, %v1255_v63  ;;  %v1387_v14 = vadd.f32 %v1386_v47, %v1324_v3 }
 0x1c9   : > { %v1258_v44 = vrot.slane %v1257_v7, 1  ;;  %v1388_v54 = vadd.f32 %v1387_v14, %v1325_v37 }
 0x1cb   : > { %v1259_v9 = vadd.f32 %v1258_v44, %v1257_v7  ;;  %v1389_v30 = vadd.f32 %v1388_v54, %v1326_v1 }
 0x1cd   : > { %v1260_v10 = vadd.f32 %v1259_v9, %v1190_v46  ;;  %v1390_v5 = vrot.slane %v1389_v30, 4 }
 0x1cf   : > { %1261 = vst [vmem:[%s2218_s30] sm:$0x1] %v1260_v10  ;;  %v1391_v51 = vadd.f32 %v1390_v5, %v1389_v30 }
 0x1d1   : > { %v1392_v20 = vrot.slane %v1391_v51, 2 }
 0x1d3   : > { %v1393_v6 = vadd.f32 %v1392_v20, %v1391_v51 }
 0x1d5   : > { %v1394_v15 = vrot.slane %v1393_v6, 1 }
 0x1d7   : > { %v1395_v60 = vadd.f32 %v1394_v15, %v1393_v6 }
 0x1d9   : > { %v1396_v18 = vadd.f32 %v1395_v60, %v1262_v35 }
 0x1db   : > { %1397 = vst [vmem:[%s2223_s7] sm:$0x1] %v1396_v18 }
 0x1dc PF: > { %s15_s19 = sadd.s32 1, %s2148_s19   ;;  %s2783_s15 = smov %s2140_s17 }
 0x1dd   : > { %p12_p8 = scmp.ge.s32.totalorder %s15_s19, 8   ;;  %s2784_s16 = smov %s2144_s18 }
 0x1de   : > { %s2785_s17 = smov %s2788_s20  ;;  %s2786_s18 = smov %s2792_s21 }
 0x1df   :  { %14 = sbr.rel (!%p12_p8) target bundleno = 3 (0x3), region = 86 }

// kernel: critic_forward.7
= control target key start
LH: loop header
LB: loop body
LE: loop exit
PB: predicated region body
PF: predicated region fallthrough
CT: control target
= control target key end

     0   :  { %v2297_v0 = vmov 0   ;;  %s2815_s1 = inlined_call_operand.vmem [shape: bf16[512,128], index: 1, kind: input, shape index: {}]   ;;  %s2816_s0 = inlined_call_operand.vmem [shape: bf16[368,512], index: 0, kind: input, shape index: {}]   ;;  %s2817_s2 = inlined_call_operand.vmem [shape: bf16[368,128], index: 2, kind: output, shape index: {0}]   ;;  %s2818_s3 = inlined_call_operand.vmem [shape: f32[1,128], index: 3, kind: output, shape index: {1}]   ;;  %s2819_s4 = inlined_call_operand.vmem [shape: f32[1,128], index: 4, kind: output, shape index: {2}]  }
   0x1   :  { %862 = vmatprep.subr.bf16.mxu1 %v2297_v0  ;;  %1079 = vmatprep.subr.bf16.mxu0 %v2297_v0  ;;  %v2127_v1 = vld [vmem:[%s2815_s1] sm:$0xff]   ;;  %v2129_v3 = vld [vmem:[%s2815_s1 + $0x8] sm:$0xff]   ;;  %v2131_v5 = vld [vmem:[%s2815_s1 + $0x10] sm:$0xff]  }
   0x2   :  { %v2128_v2 = vld [vmem:[%s2815_s1 + $0x80] sm:$0xff]   ;;  %863 = vmatpush1.bf16.msra.mxu1 %v2127_v1  ;;  %v2130_v4 = vld [vmem:[%s2815_s1 + $0x88] sm:$0xff]   ;;  %v2132_v6 = vld [vmem:[%s2815_s1 + $0x90] sm:$0xff]  }
   0x3   :  { %1080 = vmatpush1.bf16.msra.mxu0 %v2128_v2  ;;  %864 = vmatprep.subr.bf16.mxu1 %v2297_v0  ;;  %v2133_v7 = vld [vmem:[%s2815_s1 + $0x18] sm:$0xff]   ;;  %v2135_v9 = vld [vmem:[%s2815_s1 + $0x20] sm:$0xff]   ;;  %v2137_v11 = vld [vmem:[%s2815_s1 + $0x28] sm:$0xff]  }
   0x4   :  { %1081 = vmatprep.subr.bf16.mxu0 %v2297_v0  ;;  %v2134_v8 = vld [vmem:[%s2815_s1 + $0x98] sm:$0xff]   ;;  %v2136_v10 = vld [vmem:[%s2815_s1 + $0xa0] sm:$0xff]   ;;  %v2138_v12 = vld [vmem:[%s2815_s1 + $0xa8] sm:$0xff]  }
   0x5   :  { %v2139_v13 = vld [vmem:[%s2815_s1 + $0x30] sm:$0xff]   ;;  %v2141_v15 = vld [vmem:[%s2815_s1 + $0x38] sm:$0xff]   ;;  %v2143_v17 = vld [vmem:[%s2815_s1 + $0x40] sm:$0xff]  }
   0x6   :  { %865 = vmatpush1.bf16.msra.mxu1 %v2129_v3  ;;  %v2140_v14 = vld [vmem:[%s2815_s1 + $0xb0] sm:$0xff]   ;;  %v2142_v16 = vld [vmem:[%s2815_s1 + $0xb8] sm:$0xff]   ;;  %v2144_v18 = vld [vmem:[%s2815_s1 + $0xc0] sm:$0xff]  }
   0x7   :  { %1082 = vmatpush1.bf16.msra.mxu0 %v2130_v4  ;;  %866 = vmatprep.subr.bf16.mxu1 %v2297_v0  ;;  %v2161_v19 = vld [vmem:[%s2816_s0 + $0x4] ss:$16 sps:$4 sm:$0xff]   ;;  %v2145_v20 = vld [vmem:[%s2815_s1 + $0x48] sm:$0xff]   ;;  %v2149_v25 = vld [vmem:[%s2815_s1 + $0x58] sm:$0xff]  }
   0x8   :  { %1083 = vmatprep.subr.bf16.mxu0 %v2297_v0  ;;  %v2164_v21 = vld [vmem:[%s2816_s0 + $0xc] ss:$16 sps:$4 sm:$0xff]   ;;  %894 = vmatprep.mubr.bf16.mxu1 %v2161_v19  ;;  %v2147_v23 = vld [vmem:[%s2815_s1 + $0x50] sm:$0xff]   ;;  %v2151_v27 = vld [vmem:[%s2815_s1 + $0x60] sm:$0xff]  }
   0x9   :  { %v2146_v22 = vld [vmem:[%s2815_s1 + $0xc8] sm:$0xff]   ;;  %1111 = vmatprep.mubr.bf16.mxu0 %v2164_v21  ;;  %v2148_v24 = vld [vmem:[%s2815_s1 + $0xd0] sm:$0xff]   ;;  %v2150_v26 = vld [vmem:[%s2815_s1 + $0xd8] sm:$0xff]  }
   0xa   :  { %867 = vmatpush1.bf16.msra.mxu1 %v2131_v5  ;;  %v2152_v28 = vld [vmem:[%s2815_s1 + $0xe0] sm:$0xff]   ;;  %v2153_v29 = vld [vmem:[%s2815_s1 + $0x68] sm:$0xff]   ;;  %v2155_v31 = vld [vmem:[%s2815_s1 + $0x70] sm:$0xff]  }
   0xb   :  { %1084 = vmatpush1.bf16.msra.mxu0 %v2132_v6  ;;  %868 = vmatprep.subr.bf16.mxu1 %v2297_v0  ;;  %v2154_v30 = vld [vmem:[%s2815_s1 + $0xe8] sm:$0xff]   ;;  %v2156_v32 = vld [vmem:[%s2815_s1 + $0xf0] sm:$0xff]   ;;  %v2157_v33 = vld [vmem:[%s2815_s1 + $0x78] sm:$0xff]  }
   0xc   :  { %1085 = vmatprep.subr.bf16.mxu0 %v2297_v0  ;;  %v2158_v34 = vld [vmem:[%s2815_s1 + $0xf8] sm:$0xff]   ;;  %v2159_v35 = vld [vmem:[%s2816_s0] ss:$16 sps:$4 sm:$0xff]   ;;  %v2165_v37 = vld [vmem:[%s2816_s0 + $0x24] ss:$16 sps:$4 sm:$0xff]  }
   0xd   :  { %v2162_v36 = vld [vmem:[%s2816_s0 + $0x8] ss:$16 sps:$4 sm:$0xff]   ;;  %v2167_v38 = vld [vmem:[%s2816_s0 + $0x2c] ss:$16 sps:$4 sm:$0xff]   ;;  %v2169_v39 = vld [vmem:[%s2816_s0 + $0x20] ss:$16 sps:$4 sm:$0xff]  }
   0xe   :  { %869 = vmatpush1.bf16.msra.mxu1 %v2133_v7  ;;  %v2170_v40 = vld [vmem:[%s2816_s0 + $0x28] ss:$16 sps:$4 sm:$0xff]   ;;  %v2171_v41 = vld [vmem:[%s2816_s0 + $0x44] ss:$16 sps:$4 sm:$0xff]   ;;  %v2173_v42 = vld [vmem:[%s2816_s0 + $0x4c] ss:$16 sps:$4 sm:$0xff]  }
   0xf   :  { %1086 = vmatpush1.bf16.msra.mxu0 %v2134_v8  ;;  %870 = vmatprep.subr.bf16.mxu1 %v2297_v0  ;;  %v2175_v43 = vld [vmem:[%s2816_s0 + $0x40] ss:$16 sps:$4 sm:$0xff]   ;;  %v2176_v44 = vld [vmem:[%s2816_s0 + $0x48] ss:$16 sps:$4 sm:$0xff]   ;;  %v2177_v45 = vld [vmem:[%s2816_s0 + $0x64] ss:$16 sps:$4 sm:$0xff]  }
  0x10   :  { %1087 = vmatprep.subr.bf16.mxu0 %v2297_v0  ;;  %v2179_v46 = vld [vmem:[%s2816_s0 + $0x6c] ss:$16 sps:$4 sm:$0xff]   ;;  %v2181_v47 = vld [vmem:[%s2816_s0 + $0x60] ss:$16 sps:$4 sm:$0xff]   ;;  %v2182_v48 = vld [vmem:[%s2816_s0 + $0x68] ss:$16 sps:$4 sm:$0xff]  }
  0x11   :  { %v2183_v49 = vld [vmem:[%s2816_s0 + $0x84] ss:$16 sps:$4 sm:$0xff]   ;;  %v2185_v50 = vld [vmem:[%s2816_s0 + $0x8c] ss:$16 sps:$4 sm:$0xff]   ;;  %v2187_v51 = vld [vmem:[%s2816_s0 + $0x80] ss:$16 sps:$4 sm:$0xff]  }
  0x12   :  { %871 = vmatpush1.bf16.msra.mxu1 %v2135_v9  ;;  %v2188_v52 = vld [vmem:[%s2816_s0 + $0x88] ss:$16 sps:$4 sm:$0xff]   ;;  %v2189_v53 = vld [vmem:[%s2816_s0 + $0xa4] ss:$16 sps:$4 sm:$0xff]   ;;  %v2191_v54 = vld [vmem:[%s2816_s0 + $0xac] ss:$16 sps:$4 sm:$0xff]  }
  0x13   :  { %1088 = vmatpush1.bf16.msra.mxu0 %v2136_v10  ;;  %872 = vmatprep.subr.bf16.mxu1 %v2297_v0  ;;  %v2193_v55 = vld [vmem:[%s2816_s0 + $0xa0] ss:$16 sps:$4 sm:$0xff]   ;;  %v2194_v56 = vld [vmem:[%s2816_s0 + $0xa8] ss:$16 sps:$4 sm:$0xff]   ;;  %v2195_v57 = vld [vmem:[%s2816_s0 + $0xc4] ss:$16 sps:$4 sm:$0xff]  }
  0x14   :  { %1089 = vmatprep.subr.bf16.mxu0 %v2297_v0  ;;  %v2197_v58 = vld [vmem:[%s2816_s0 + $0xcc] ss:$16 sps:$4 sm:$0xff]   ;;  %v2199_v59 = vld [vmem:[%s2816_s0 + $0xc0] ss:$16 sps:$4 sm:$0xff]   ;;  %v2200_v60 = vld [vmem:[%s2816_s0 + $0xc8] ss:$16 sps:$4 sm:$0xff]  }
  0x15   :  { %v2201_v61 = vld [vmem:[%s2816_s0 + $0xe4] ss:$16 sps:$4 sm:$0xff]   ;;  %v2203_v62 = vld [vmem:[%s2816_s0 + $0xec] ss:$16 sps:$4 sm:$0xff]   ;;  %v2205_v63 = vld [vmem:[%s2816_s0 + $0xe0] ss:$16 sps:$4 sm:$0xff]  }
  0x16   :  { %873 = vmatpush1.bf16.msra.mxu1 %v2137_v11  ;;  %v2207_v1 = vld [vmem:[%s2816_s0 + $0x104] ss:$16 sps:$4 sm:$0xff]   ;;  %v2209_v2 = vld [vmem:[%s2816_s0 + $0x10c] ss:$16 sps:$4 sm:$0xff]   ;;  %v2211_v3 = vld [vmem:[%s2816_s0 + $0x100] ss:$16 sps:$4 sm:$0xff]  }
  0x17   :  { %1090 = vmatpush1.bf16.msra.mxu0 %v2138_v12  ;;  %874 = vmatprep.subr.bf16.mxu1 %v2297_v0  ;;  %v2212_v4 = vld [vmem:[%s2816_s0 + $0x108] ss:$16 sps:$4 sm:$0xff]   ;;  %v2213_v5 = vld [vmem:[%s2816_s0 + $0x124] ss:$16 sps:$4 sm:$0xff]   ;;  %v2215_v6 = vld [vmem:[%s2816_s0 + $0x12c] ss:$16 sps:$4 sm:$0xff]  }
  0x18   :  { %1091 = vmatprep.subr.bf16.mxu0 %v2297_v0  ;;  %v2217_v7 = vld [vmem:[%s2816_s0 + $0x120] ss:$16 sps:$4 sm:$0xff]   ;;  %v2218_v8 = vld [vmem:[%s2816_s0 + $0x128] ss:$16 sps:$4 sm:$0xff]   ;;  %v2219_v9 = vld [vmem:[%s2816_s0 + $0x144] ss:$16 sps:$4 sm:$0xff]  }
  0x19   :  { %v2221_v10 = vld [vmem:[%s2816_s0 + $0x14c] ss:$16 sps:$4 sm:$0xff]   ;;  %v2223_v11 = vld [vmem:[%s2816_s0 + $0x140] ss:$16 sps:$4 sm:$0xff]   ;;  %v2224_v12 = vld [vmem:[%s2816_s0 + $0x148] ss:$16 sps:$4 sm:$0xff]  }
  0x1a   :  { %875 = vmatpush1.bf16.msra.mxu1 %v2139_v13  ;;  %v2225_v13 = vld [vmem:[%s2816_s0 + $0x164] ss:$16 sps:$4 sm:$0xff]   ;;  %v2235_v19 = vld [vmem:[%s2816_s0 + $0x180] ss:$16 sps:$4 sm:$0xff]  }
  0x1b   :  { %1092 = vmatpush1.bf16.msra.mxu0 %v2140_v14  ;;  %876 = vmatprep.subr.bf16.mxu1 %v2297_v0  ;;  %v2227_v14 = vld [vmem:[%s2816_s0 + $0x16c] ss:$16 sps:$4 sm:$0xff]   ;;  %v2237_v21 = vld [vmem:[%s2816_s0 + $0x1a4] ss:$16 sps:$4 sm:$0xff]  }
  0x1c   :  { %1093 = vmatprep.subr.bf16.mxu0 %v2297_v0 }
  0x1e   :  { %877 = vmatpush1.bf16.msra.mxu1 %v2141_v15  ;;  %v2229_v15 = vld [vmem:[%s2816_s0 + $0x160] ss:$16 sps:$4 sm:$0xff]  }
  0x1f   :  { %1094 = vmatpush1.bf16.msra.mxu0 %v2142_v16  ;;  %878 = vmatprep.subr.bf16.mxu1 %v2297_v0  ;;  %v2230_v16 = vld [vmem:[%s2816_s0 + $0x168] ss:$16 sps:$4 sm:$0xff]  }
  0x20   :  { %1095 = vmatprep.subr.bf16.mxu0 %v2297_v0 }
  0x22   :  { %879 = vmatpush1.bf16.msra.mxu1 %v2143_v17  ;;  %v2231_v17 = vld [vmem:[%s2816_s0 + $0x184] ss:$16 sps:$4 sm:$0xff]  }
  0x23   :  { %1096 = vmatpush1.bf16.msra.mxu0 %v2144_v18  ;;  %880 = vmatprep.subr.bf16.mxu1 %v2297_v0  ;;  %v2233_v18 = vld [vmem:[%s2816_s0 + $0x18c] ss:$16 sps:$4 sm:$0xff]  }
  0x24   :  { %1097 = vmatprep.subr.bf16.mxu0 %v2297_v0 }
  0x26   :  { %881 = vmatpush1.bf16.msra.mxu1 %v2145_v20  ;;  %v2236_v20 = vld [vmem:[%s2816_s0 + $0x188] ss:$16 sps:$4 sm:$0xff]  }
  0x27   :  { %1098 = vmatpush1.bf16.msra.mxu0 %v2146_v22  ;;  %882 = vmatprep.subr.bf16.mxu1 %v2297_v0  ;;  %v2239_v22 = vld [vmem:[%s2816_s0 + $0x1ac] ss:$16 sps:$4 sm:$0xff]  }
  0x28   :  { %1099 = vmatprep.subr.bf16.mxu0 %v2297_v0 }
  0x2a   :  { %883 = vmatpush1.bf16.msra.mxu1 %v2147_v23  ;;  %v2241_v23 = vld [vmem:[%s2816_s0 + $0x1a0] ss:$16 sps:$4 sm:$0xff]  }
  0x2b   :  { %1100 = vmatpush1.bf16.msra.mxu0 %v2148_v24  ;;  %884 = vmatprep.subr.bf16.mxu1 %v2297_v0  ;;  %v2242_v24 = vld [vmem:[%s2816_s0 + $0x1a8] ss:$16 sps:$4 sm:$0xff]  }
  0x2c   :  { %1101 = vmatprep.subr.bf16.mxu0 %v2297_v0 }
  0x2e   :  { %885 = vmatpush1.bf16.msra.mxu1 %v2149_v25  ;;  %v2243_v25 = vld [vmem:[%s2816_s0 + $0x1c4] ss:$16 sps:$4 sm:$0xff]  }
  0x2f   :  { %1102 = vmatpush1.bf16.msra.mxu0 %v2150_v26  ;;  %886 = vmatprep.subr.bf16.mxu1 %v2297_v0  ;;  %v2245_v26 = vld [vmem:[%s2816_s0 + $0x1cc] ss:$16 sps:$4 sm:$0xff]  }
  0x30   :  { %1103 = vmatprep.subr.bf16.mxu0 %v2297_v0 }
  0x32   :  { %887 = vmatpush1.bf16.msra.mxu1 %v2151_v27  ;;  %v2247_v27 = vld [vmem:[%s2816_s0 + $0x1c0] ss:$16 sps:$4 sm:$0xff]  }
  0x33   :  { %1104 = vmatpush1.bf16.msra.mxu0 %v2152_v28  ;;  %888 = vmatprep.subr.bf16.mxu1 %v2297_v0  ;;  %v2248_v28 = vld [vmem:[%s2816_s0 + $0x1c8] ss:$16 sps:$4 sm:$0xff]  }
  0x34   :  { %1105 = vmatprep.subr.bf16.mxu0 %v2297_v0 }
  0x36   :  { %889 = vmatpush1.bf16.msra.mxu1 %v2153_v29  ;;  %v2249_v29 = vld [vmem:[%s2816_s0 + $0x1e4] ss:$16 sps:$4 sm:$0xff]  }
  0x37   :  { %1106 = vmatpush1.bf16.msra.mxu0 %v2154_v30  ;;  %890 = vmatprep.subr.bf16.mxu1 %v2297_v0  ;;  %v2251_v30 = vld [vmem:[%s2816_s0 + $0x1ec] ss:$16 sps:$4 sm:$0xff]  }
  0x38   :  { %1107 = vmatprep.subr.bf16.mxu0 %v2297_v0 }
  0x3a   :  { %891 = vmatpush1.bf16.msra.mxu1 %v2155_v31  ;;  %v2253_v31 = vld [vmem:[%s2816_s0 + $0x1e0] ss:$16 sps:$4 sm:$0xff]  }
  0x3b   :  { %1108 = vmatpush1.bf16.msra.mxu0 %v2156_v32  ;;  %892 = vmatprep.subr.bf16.mxu1 %v2297_v0  ;;  %v2254_v32 = vld [vmem:[%s2816_s0 + $0x1e8] ss:$16 sps:$4 sm:$0xff]  }
  0x3c   :  { %1109 = vmatprep.subr.bf16.mxu0 %v2297_v0  ;;  %v2206_v0 = vld [vmem:[%s2816_s0 + $0xe8] ss:$16 sps:$4 sm:$0xff]  }
  0x3e   :  { %893 = vmatpush1.bf16.msra.mxu1 %v2157_v33  ;;  %v2255_v33 = vld [vmem:[%s2816_s0 + $0x204] ss:$16 sps:$4 sm:$0xff]  }
  0x3f   :  { %1110 = vmatpush1.bf16.msra.mxu0 %v2158_v34  ;;  %v2257_v34 = vld [vmem:[%s2816_s0 + $0x20c] ss:$16 sps:$4 sm:$0xff]  }
  0x41   :  { %895 = vmatmul.mubr.bf16.vlgmr.msra.gmra.mrb[0].mxu1 %v2159_v35  ;;  %v2259_v35 = vld [vmem:[%s2816_s0 + $0x200] ss:$16 sps:$4 sm:$0xff]  }
  0x42   :  { %1112 = vmatmul.mubr.bf16.vlgmr.msra.gmra.mrb[0].mxu0 %v2162_v36  ;;  %902 = vmatprep.mubr.bf16.mxu1 %v2165_v37  ;;  %v2260_v36 = vld [vmem:[%s2816_s0 + $0x208] ss:$16 sps:$4 sm:$0xff]   ;;  %v2261_v37 = vld [vmem:[%s2816_s0 + $0x224] ss:$16 sps:$4 sm:$0xff]  }
  0x43   :  { %1119 = vmatprep.mubr.bf16.mxu0 %v2167_v38  ;;  %v2263_v38 = vld [vmem:[%s2816_s0 + $0x22c] ss:$16 sps:$4 sm:$0xff]  }
  0x49   :  { %903 = vmatmul.mubr.bf16.gmra.mrb[4].mxu1 %v2169_v39  ;;  %v2265_v39 = vld [vmem:[%s2816_s0 + $0x220] ss:$16 sps:$4 sm:$0xff]  }
  0x4a   :  { %1120 = vmatmul.mubr.bf16.gmra.mrb[4].mxu0 %v2170_v40  ;;  %910 = vmatprep.mubr.bf16.mxu1 %v2171_v41  ;;  %v2266_v40 = vld [vmem:[%s2816_s0 + $0x228] ss:$16 sps:$4 sm:$0xff]   ;;  %v2267_v41 = vld [vmem:[%s2816_s0 + $0x244] ss:$16 sps:$4 sm:$0xff]  }
  0x4b   :  { %1127 = vmatprep.mubr.bf16.mxu0 %v2173_v42  ;;  %v2269_v42 = vld [vmem:[%s2816_s0 + $0x24c] ss:$16 sps:$4 sm:$0xff]  }
  0x51   :  { %911 = vmatmul.mubr.bf16.gmra.mrb[8].mxu1 %v2175_v43  ;;  %v2271_v43 = vld [vmem:[%s2816_s0 + $0x240] ss:$16 sps:$4 sm:$0xff]  }
  0x52   :  { %1128 = vmatmul.mubr.bf16.gmra.mrb[8].mxu0 %v2176_v44  ;;  %918 = vmatprep.mubr.bf16.mxu1 %v2177_v45  ;;  %v2272_v44 = vld [vmem:[%s2816_s0 + $0x248] ss:$16 sps:$4 sm:$0xff]   ;;  %v2273_v45 = vld [vmem:[%s2816_s0 + $0x264] ss:$16 sps:$4 sm:$0xff]  }
  0x53   :  { %1135 = vmatprep.mubr.bf16.mxu0 %v2179_v46  ;;  %v2275_v46 = vld [vmem:[%s2816_s0 + $0x26c] ss:$16 sps:$4 sm:$0xff]  }
  0x59   :  { %919 = vmatmul.mubr.bf16.gmra.mrb[12].mxu1 %v2181_v47  ;;  %v2277_v47 = vld [vmem:[%s2816_s0 + $0x260] ss:$16 sps:$4 sm:$0xff]  }
  0x5a   :  { %1136 = vmatmul.mubr.bf16.gmra.mrb[12].mxu0 %v2182_v48  ;;  %926 = vmatprep.mubr.bf16.mxu1 %v2183_v49  ;;  %v2278_v48 = vld [vmem:[%s2816_s0 + $0x268] ss:$16 sps:$4 sm:$0xff]   ;;  %v2279_v49 = vld [vmem:[%s2816_s0 + $0x284] ss:$16 sps:$4 sm:$0xff]  }
  0x5b   :  { %1143 = vmatprep.mubr.bf16.mxu0 %v2185_v50  ;;  %v2281_v50 = vld [vmem:[%s2816_s0 + $0x28c] ss:$16 sps:$4 sm:$0xff]  }
  0x61   :  { %927 = vmatmul.mubr.bf16.gmra.mrb[16].mxu1 %v2187_v51  ;;  %v2283_v51 = vld [vmem:[%s2816_s0 + $0x280] ss:$16 sps:$4 sm:$0xff]  }
  0x62   :  { %1144 = vmatmul.mubr.bf16.gmra.mrb[16].mxu0 %v2188_v52  ;;  %934 = vmatprep.mubr.bf16.mxu1 %v2189_v53  ;;  %v2284_v52 = vld [vmem:[%s2816_s0 + $0x288] ss:$16 sps:$4 sm:$0xff]   ;;  %v2285_v53 = vld [vmem:[%s2816_s0 + $0x2a4] ss:$16 sps:$4 sm:$0xff]  }
  0x63   :  { %1151 = vmatprep.mubr.bf16.mxu0 %v2191_v54  ;;  %v2287_v54 = vld [vmem:[%s2816_s0 + $0x2ac] ss:$16 sps:$4 sm:$0xff]  }
  0x69   :  { %935 = vmatmul.mubr.bf16.gmra.mrb[20].mxu1 %v2193_v55  ;;  %v2289_v55 = vld [vmem:[%s2816_s0 + $0x2a0] ss:$16 sps:$4 sm:$0xff]  }
  0x6a   :  { %1152 = vmatmul.mubr.bf16.gmra.mrb[20].mxu0 %v2194_v56  ;;  %942 = vmatprep.mubr.bf16.mxu1 %v2195_v57  ;;  %v2290_v56 = vld [vmem:[%s2816_s0 + $0x2a8] ss:$16 sps:$4 sm:$0xff]   ;;  %v2291_v57 = vld [vmem:[%s2816_s0 + $0x2c4] ss:$16 sps:$4 sm:$0xff]  }
  0x6b   :  { %1159 = vmatprep.mubr.bf16.mxu0 %v2197_v58  ;;  %v2293_v58 = vld [vmem:[%s2816_s0 + $0x2cc] ss:$16 sps:$4 sm:$0xff]  }
  0x71   :  { %943 = vmatmul.mubr.bf16.gmra.mrb[24].mxu1 %v2199_v59  ;;  %v2295_v59 = vld [vmem:[%s2816_s0 + $0x2c0] ss:$16 sps:$4 sm:$0xff]  }
  0x72   :  { %1160 = vmatmul.mubr.bf16.gmra.mrb[24].mxu0 %v2200_v60  ;;  %950 = vmatprep.mubr.bf16.mxu1 %v2201_v61  ;;  %v2296_v60 = vld [vmem:[%s2816_s0 + $0x2c8] ss:$16 sps:$4 sm:$0xff]  }
  0x73   :  { %1167 = vmatprep.mubr.bf16.mxu0 %v2203_v62 }
  0x79   :  { %951 = vmatmul.mubr.bf16.gmra.mrb[28].mxu1 %v2205_v63 }
  0x7a   :  { %1168 = vmatmul.mubr.bf16.gmra.mrb[28].mxu0 %v2206_v0  ;;  %958 = vmatprep.mubr.bf16.mxu1 %v2207_v1 }
  0x7b   :  { %1175 = vmatprep.mubr.bf16.mxu0 %v2209_v2 }
  0x81   :  { %959 = vmatmul.mubr.bf16.gmra.mrb[32].mxu1 %v2211_v3 }
  0x82   :  { %1176 = vmatmul.mubr.bf16.gmra.mrb[32].mxu0 %v2212_v4  ;;  %966 = vmatprep.mubr.bf16.mxu1 %v2213_v5 }
  0x83   :  { %1183 = vmatprep.mubr.bf16.mxu0 %v2215_v6 }
  0x89   :  { %967 = vmatmul.mubr.bf16.gmra.mrb[36].mxu1 %v2217_v7 }
  0x8a   :  { %1184 = vmatmul.mubr.bf16.gmra.mrb[36].mxu0 %v2218_v8  ;;  %974 = vmatprep.mubr.bf16.mxu1 %v2219_v9 }
  0x8b   :  { %1191 = vmatprep.mubr.bf16.mxu0 %v2221_v10 }
  0x91   :  { %975 = vmatmul.mubr.bf16.gmra.mrb[40].mxu1 %v2223_v11 }
  0x92   :  { %1192 = vmatmul.mubr.bf16.gmra.mrb[40].mxu0 %v2224_v12  ;;  %982 = vmatprep.mubr.bf16.mxu1 %v2225_v13 }
  0x93   :  { %1199 = vmatprep.mubr.bf16.mxu0 %v2227_v14 }
  0x99   :  { %983 = vmatmul.mubr.bf16.gmra.mrb[44].mxu1 %v2229_v15 }
  0x9a   :  { %1200 = vmatmul.mubr.bf16.gmra.mrb[44].mxu0 %v2230_v16  ;;  %990 = vmatprep.mubr.bf16.mxu1 %v2231_v17 }
  0x9b   :  { %1207 = vmatprep.mubr.bf16.mxu0 %v2233_v18 }
  0xa1   :  { %991 = vmatmul.mubr.bf16.gmra.mrb[48].mxu1 %v2235_v19 }
  0xa2   :  { %1208 = vmatmul.mubr.bf16.gmra.mrb[48].mxu0 %v2236_v20  ;;  %998 = vmatprep.mubr.bf16.mxu1 %v2237_v21 }
  0xa3   :  { %1215 = vmatprep.mubr.bf16.mxu0 %v2239_v22 }
  0xa9   :  { %999 = vmatmul.mubr.bf16.gmra.mrb[52].mxu1 %v2241_v23 }
  0xaa   :  { %1216 = vmatmul.mubr.bf16.gmra.mrb[52].mxu0 %v2242_v24  ;;  %1006 = vmatprep.mubr.bf16.mxu1 %v2243_v25 }
  0xab   :  { %1223 = vmatprep.mubr.bf16.mxu0 %v2245_v26 }
  0xb1   :  { %1007 = vmatmul.mubr.bf16.gmra.mrb[56].mxu1 %v2247_v27 }
  0xb2   :  { %1224 = vmatmul.mubr.bf16.gmra.mrb[56].mxu0 %v2248_v28  ;;  %1014 = vmatprep.mubr.bf16.mxu1 %v2249_v29 }
  0xb3   :  { %1231 = vmatprep.mubr.bf16.mxu0 %v2251_v30 }
  0xb9   :  { %1015 = vmatmul.mubr.bf16.gmra.mrb[60].mxu1 %v2253_v31 }
  0xba   :  { %1232 = vmatmul.mubr.bf16.gmra.mrb[60].mxu0 %v2254_v32  ;;  %1022 = vmatprep.mubr.bf16.mxu1 %v2255_v33 }
  0xbb   :  { %1239 = vmatprep.mubr.bf16.mxu0 %v2257_v34 }
  0xc1   :  { %1023 = vmatmul.mubr.bf16.gmra.mrb[64].mxu1 %v2259_v35 }
  0xc2   :  { %1240 = vmatmul.mubr.bf16.gmra.mrb[64].mxu0 %v2260_v36  ;;  %1030 = vmatprep.mubr.bf16.mxu1 %v2261_v37 }
  0xc3   :  { %1247 = vmatprep.mubr.bf16.mxu0 %v2263_v38 }
  0xc9   :  { %1031 = vmatmul.mubr.bf16.gmra.mrb[68].mxu1 %v2265_v39 }
  0xca   :  { %1248 = vmatmul.mubr.bf16.gmra.mrb[68].mxu0 %v2266_v40  ;;  %1038 = vmatprep.mubr.bf16.mxu1 %v2267_v41 }
  0xcb   :  { %1255 = vmatprep.mubr.bf16.mxu0 %v2269_v42 }
  0xd1   :  { %1039 = vmatmul.mubr.bf16.gmra.mrb[72].mxu1 %v2271_v43 }
  0xd2   :  { %1256 = vmatmul.mubr.bf16.gmra.mrb[72].mxu0 %v2272_v44  ;;  %1046 = vmatprep.mubr.bf16.mxu1 %v2273_v45 }
  0xd3   :  { %1263 = vmatprep.mubr.bf16.mxu0 %v2275_v46 }
  0xd9   :  { %1047 = vmatmul.mubr.bf16.gmra.mrb[76].mxu1 %v2277_v47 }
  0xda   :  { %1264 = vmatmul.mubr.bf16.gmra.mrb[76].mxu0 %v2278_v48  ;;  %1054 = vmatprep.mubr.bf16.mxu1 %v2279_v49 }
  0xdb   :  { %1271 = vmatprep.mubr.bf16.mxu0 %v2281_v50 }
  0xe1   :  { %1055 = vmatmul.mubr.bf16.gmra.mrb[80].mxu1 %v2283_v51 }
  0xe2   :  { %1272 = vmatmul.mubr.bf16.gmra.mrb[80].mxu0 %v2284_v52  ;;  %1062 = vmatprep.mubr.bf16.mxu1 %v2285_v53 }
  0xe3   :  { %1279 = vmatprep.mubr.bf16.mxu0 %v2287_v54 }
  0xe9   :  { %1063 = vmatmul.mubr.bf16.gmra.mrb[84].mxu1 %v2289_v55 }
  0xea   :  { %1280 = vmatmul.mubr.bf16.gmra.mrb[84].mxu0 %v2290_v56  ;;  %1070 = vmatprep.mubr.bf16.mxu1 %v2291_v57 }
  0xeb   :  { %1287 = vmatprep.mubr.bf16.mxu0 %v2293_v58 }
  0xf1   :  { %1071 = vmatmul.mubr.bf16.gmra.mrb[88].mxu1 %v2295_v59 }
  0xf2   :  { %1288 = vmatmul.mubr.bf16.gmra.mrb[88].mxu0 %v2296_v60 }
 0x114   :  { %v896_v61 = vpop.f32.mrb[0].mxu1 }
 0x115   :  { %v1113_v62 = vpop.f32.mrb[0].mxu0  ;;  %v898_v63 = vpop.f32.mrb[1].mxu1 }
 0x116   :  { %v1114_v0 = vadd.f32 %v1113_v62, %v896_v61  ;;  %v1115_v1 = vpop.f32.mrb[1].mxu0  ;;  %v899_v2 = vpop.f32.mrb[2].mxu1 }
 0x117   :  { %v1116_v3 = vpop.f32.mrb[2].mxu0  ;;  %v901_v4 = vpop.f32.mrb[3].mxu1 }
 0x118   :  { %v1117_v5 = vadd.f32 %v1116_v3, %v899_v2  ;;  %v1118_v6 = vpop.f32.mrb[3].mxu0  ;;  %v1587_v7 = vmul.f32 %v1114_v0, %v1114_v0 }
 0x11a   :  { %v1945_v8 = vpack.c.bf16 %v1117_v5, %v1114_v0  ;;  %v1533_v9 = vadd.f32 %v1117_v5, %v1114_v0  ;;  %v1588_v10 = vmul.f32 %v1117_v5, %v1117_v5 }
 0x11c   :  { %1946 = vst [vmem:[%s2817_s2] sm:$0xff] %v1945_v8   ;;  %v1633_v11 = vadd.f32 %v1588_v10, %v1587_v7  ;;  %v904_v12 = vpop.f32.mrb[4].mxu1 }
 0x11d   :  { %v1121_v13 = vpop.f32.mrb[4].mxu0  ;;  %v906_v14 = vpop.f32.mrb[5].mxu1 }
 0x11e   :  { %v1122_v15 = vadd.f32 %v1121_v13, %v904_v12  ;;  %v1123_v16 = vpop.f32.mrb[5].mxu0  ;;  %v907_v17 = vpop.f32.mrb[6].mxu1 }
 0x11f   :  { %v1124_v18 = vpop.f32.mrb[6].mxu0  ;;  %v909_v19 = vpop.f32.mrb[7].mxu1 }
 0x120   :  { %v1534_v20 = vadd.f32 %v1533_v9, %v1122_v15  ;;  %v1589_v21 = vmul.f32 %v1122_v15, %v1122_v15  ;;  %v1125_v22 = vadd.f32 %v1124_v18, %v907_v17  ;;  %v1126_v23 = vpop.f32.mrb[7].mxu0 }
 0x122   :  { %v1634_v24 = vadd.f32 %v1633_v11, %v1589_v21  ;;  %v1950_v25 = vpack.c.bf16 %v1125_v22, %v1122_v15  ;;  %v1535_v26 = vadd.f32 %v1534_v20, %v1125_v22  ;;  %v1590_v27 = vmul.f32 %v1125_v22, %v1125_v22 }
 0x124   :  { %2057 = vst [vmem:[%s2817_s2 + $0x8] sm:$0xff] %v1950_v25   ;;  %v1635_v28 = vadd.f32 %v1634_v24, %v1590_v27  ;;  %v912_v29 = vpop.f32.mrb[8].mxu1 }
 0x125   :  { %v1129_v30 = vpop.f32.mrb[8].mxu0  ;;  %v914_v31 = vpop.f32.mrb[9].mxu1 }
 0x126   :  { %v1130_v32 = vadd.f32 %v1129_v30, %v912_v29  ;;  %v1131_v33 = vpop.f32.mrb[9].mxu0  ;;  %v915_v34 = vpop.f32.mrb[10].mxu1 }
 0x127   :  { %v1132_v35 = vpop.f32.mrb[10].mxu0  ;;  %v917_v36 = vpop.f32.mrb[11].mxu1 }
 0x128   :  { %v1536_v37 = vadd.f32 %v1535_v26, %v1130_v32  ;;  %v1591_v38 = vmul.f32 %v1130_v32, %v1130_v32  ;;  %v1133_v39 = vadd.f32 %v1132_v35, %v915_v34  ;;  %v1134_v40 = vpop.f32.mrb[11].mxu0 }
 0x12a   :  { %v1636_v41 = vadd.f32 %v1635_v28, %v1591_v38  ;;  %v1955_v42 = vpack.c.bf16 %v1133_v39, %v1130_v32  ;;  %v1537_v43 = vadd.f32 %v1536_v37, %v1133_v39  ;;  %v1592_v44 = vmul.f32 %v1133_v39, %v1133_v39 }
 0x12c   :  { %2058 = vst [vmem:[%s2817_s2 + $0x10] sm:$0xff] %v1955_v42   ;;  %v1637_v45 = vadd.f32 %v1636_v41, %v1592_v44  ;;  %v920_v46 = vpop.f32.mrb[12].mxu1 }
 0x12d   :  { %v1137_v47 = vpop.f32.mrb[12].mxu0  ;;  %v922_v48 = vpop.f32.mrb[13].mxu1 }
 0x12e   :  { %v1138_v49 = vadd.f32 %v1137_v47, %v920_v46  ;;  %v1139_v50 = vpop.f32.mrb[13].mxu0  ;;  %v923_v51 = vpop.f32.mrb[14].mxu1 }
 0x12f   :  { %v1140_v52 = vpop.f32.mrb[14].mxu0  ;;  %v925_v53 = vpop.f32.mrb[15].mxu1 }
 0x130   :  { %v1538_v54 = vadd.f32 %v1537_v43, %v1138_v49  ;;  %v1593_v55 = vmul.f32 %v1138_v49, %v1138_v49  ;;  %v1141_v56 = vadd.f32 %v1140_v52, %v923_v51  ;;  %v1142_v57 = vpop.f32.mrb[15].mxu0  ;;  %v2298_v53 = vmov 0.0  }
 0x131   :  { %1530 = vst [vmem:[%s2818_s3] sm:$0x1] %v2298_v53  ;;  %1531 = vst [vmem:[%s2819_s4] sm:$0x1] %v2298_v53 }
 0x132   :  { %v1638_v58 = vadd.f32 %v1637_v45, %v1593_v55  ;;  %v1960_v59 = vpack.c.bf16 %v1141_v56, %v1138_v49  ;;  %v1539_v60 = vadd.f32 %v1538_v54, %v1141_v56  ;;  %v1594_v61 = vmul.f32 %v1141_v56, %v1141_v56 }
 0x134   :  { %2059 = vst [vmem:[%s2817_s2 + $0x18] sm:$0xff] %v1960_v59   ;;  %v1639_v62 = vadd.f32 %v1638_v58, %v1594_v61  ;;  %v928_v63 = vpop.f32.mrb[16].mxu1 }
 0x135   :  { %v1145_v0 = vpop.f32.mrb[16].mxu0  ;;  %v930_v1 = vpop.f32.mrb[17].mxu1 }
 0x136   :  { %v1146_v2 = vadd.f32 %v1145_v0, %v928_v63  ;;  %v1147_v3 = vpop.f32.mrb[17].mxu0  ;;  %v931_v4 = vpop.f32.mrb[18].mxu1 }
 0x137   :  { %v1148_v5 = vpop.f32.mrb[18].mxu0  ;;  %v933_v6 = vpop.f32.mrb[19].mxu1 }
 0x138   :  { %v1540_v7 = vadd.f32 %v1539_v60, %v1146_v2  ;;  %v1595_v8 = vmul.f32 %v1146_v2, %v1146_v2  ;;  %v1149_v9 = vadd.f32 %v1148_v5, %v931_v4  ;;  %v1150_v10 = vpop.f32.mrb[19].mxu0 }
 0x13a   :  { %v1640_v11 = vadd.f32 %v1639_v62, %v1595_v8  ;;  %v1965_v12 = vpack.c.bf16 %v1149_v9, %v1146_v2  ;;  %v1541_v13 = vadd.f32 %v1540_v7, %v1149_v9  ;;  %v1596_v14 = vmul.f32 %v1149_v9, %v1149_v9 }
 0x13c   :  { %2060 = vst [vmem:[%s2817_s2 + $0x20] sm:$0xff] %v1965_v12   ;;  %v1641_v15 = vadd.f32 %v1640_v11, %v1596_v14  ;;  %v936_v16 = vpop.f32.mrb[20].mxu1 }
 0x13d   :  { %v1153_v17 = vpop.f32.mrb[20].mxu0  ;;  %v938_v18 = vpop.f32.mrb[21].mxu1 }
 0x13e   :  { %v1154_v19 = vadd.f32 %v1153_v17, %v936_v16  ;;  %v1155_v20 = vpop.f32.mrb[21].mxu0  ;;  %v939_v21 = vpop.f32.mrb[22].mxu1 }
 0x13f   :  { %v1156_v22 = vpop.f32.mrb[22].mxu0  ;;  %v941_v23 = vpop.f32.mrb[23].mxu1 }
 0x140   :  { %v1542_v24 = vadd.f32 %v1541_v13, %v1154_v19  ;;  %v1597_v25 = vmul.f32 %v1154_v19, %v1154_v19  ;;  %v1157_v26 = vadd.f32 %v1156_v22, %v939_v21  ;;  %v1158_v27 = vpop.f32.mrb[23].mxu0 }
 0x142   :  { %v1642_v28 = vadd.f32 %v1641_v15, %v1597_v25  ;;  %v1970_v29 = vpack.c.bf16 %v1157_v26, %v1154_v19  ;;  %v1543_v30 = vadd.f32 %v1542_v24, %v1157_v26  ;;  %v1598_v31 = vmul.f32 %v1157_v26, %v1157_v26 }
 0x144   :  { %2061 = vst [vmem:[%s2817_s2 + $0x28] sm:$0xff] %v1970_v29   ;;  %v1643_v32 = vadd.f32 %v1642_v28, %v1598_v31  ;;  %v944_v33 = vpop.f32.mrb[24].mxu1 }
 0x145   :  { %v1161_v34 = vpop.f32.mrb[24].mxu0  ;;  %v946_v35 = vpop.f32.mrb[25].mxu1 }
 0x146   :  { %v1162_v36 = vadd.f32 %v1161_v34, %v944_v33  ;;  %v1163_v37 = vpop.f32.mrb[25].mxu0  ;;  %v947_v38 = vpop.f32.mrb[26].mxu1 }
 0x147   :  { %v1164_v39 = vpop.f32.mrb[26].mxu0  ;;  %v949_v40 = vpop.f32.mrb[27].mxu1 }
 0x148   :  { %v1544_v41 = vadd.f32 %v1543_v30, %v1162_v36  ;;  %v1599_v42 = vmul.f32 %v1162_v36, %v1162_v36  ;;  %v1165_v43 = vadd.f32 %v1164_v39, %v947_v38  ;;  %v1166_v44 = vpop.f32.mrb[27].mxu0 }
 0x14a   :  { %v1644_v45 = vadd.f32 %v1643_v32, %v1599_v42  ;;  %v1975_v46 = vpack.c.bf16 %v1165_v43, %v1162_v36  ;;  %v1545_v47 = vadd.f32 %v1544_v41, %v1165_v43  ;;  %v1600_v48 = vmul.f32 %v1165_v43, %v1165_v43 }
 0x14c   :  { %2062 = vst [vmem:[%s2817_s2 + $0x30] sm:$0xff] %v1975_v46   ;;  %v1645_v49 = vadd.f32 %v1644_v45, %v1600_v48  ;;  %v952_v50 = vpop.f32.mrb[28].mxu1 }
 0x14d   :  { %v1169_v51 = vpop.f32.mrb[28].mxu0  ;;  %v954_v52 = vpop.f32.mrb[29].mxu1 }
 0x14e   :  { %v1170_v54 = vadd.f32 %v1169_v51, %v952_v50  ;;  %v1171_v55 = vpop.f32.mrb[29].mxu0  ;;  %v955_v56 = vpop.f32.mrb[30].mxu1 }
 0x14f   :  { %v1172_v57 = vpop.f32.mrb[30].mxu0  ;;  %v957_v58 = vpop.f32.mrb[31].mxu1 }
 0x150   :  { %v1546_v59 = vadd.f32 %v1545_v47, %v1170_v54  ;;  %v1601_v60 = vmul.f32 %v1170_v54, %v1170_v54  ;;  %v1173_v61 = vadd.f32 %v1172_v57, %v955_v56  ;;  %v1174_v62 = vpop.f32.mrb[31].mxu0 }
 0x152   :  { %v1646_v63 = vadd.f32 %v1645_v49, %v1601_v60  ;;  %v1980_v0 = vpack.c.bf16 %v1173_v61, %v1170_v54  ;;  %v1547_v1 = vadd.f32 %v1546_v59, %v1173_v61  ;;  %v1602_v2 = vmul.f32 %v1173_v61, %v1173_v61 }
 0x154   :  { %2063 = vst [vmem:[%s2817_s2 + $0x38] sm:$0xff] %v1980_v0   ;;  %v1647_v3 = vadd.f32 %v1646_v63, %v1602_v2  ;;  %v960_v4 = vpop.f32.mrb[32].mxu1 }
 0x155   :  { %v1177_v5 = vpop.f32.mrb[32].mxu0  ;;  %v962_v6 = vpop.f32.mrb[33].mxu1 }
 0x156   :  { %v1178_v7 = vadd.f32 %v1177_v5, %v960_v4  ;;  %v1179_v8 = vpop.f32.mrb[33].mxu0  ;;  %v963_v9 = vpop.f32.mrb[34].mxu1 }
 0x157   :  { %v1180_v10 = vpop.f32.mrb[34].mxu0  ;;  %v965_v11 = vpop.f32.mrb[35].mxu1 }
 0x158   :  { %v1548_v12 = vadd.f32 %v1547_v1, %v1178_v7  ;;  %v1603_v13 = vmul.f32 %v1178_v7, %v1178_v7  ;;  %v1181_v14 = vadd.f32 %v1180_v10, %v963_v9  ;;  %v1182_v15 = vpop.f32.mrb[35].mxu0 }
 0x15a   :  { %v1648_v16 = vadd.f32 %v1647_v3, %v1603_v13  ;;  %v1985_v17 = vpack.c.bf16 %v1181_v14, %v1178_v7  ;;  %v1549_v18 = vadd.f32 %v1548_v12, %v1181_v14  ;;  %v1604_v19 = vmul.f32 %v1181_v14, %v1181_v14 }
 0x15c   :  { %2064 = vst [vmem:[%s2817_s2 + $0x40] sm:$0xff] %v1985_v17   ;;  %v1649_v20 = vadd.f32 %v1648_v16, %v1604_v19  ;;  %v968_v21 = vpop.f32.mrb[36].mxu1 }
 0x15d   :  { %v1185_v22 = vpop.f32.mrb[36].mxu0  ;;  %v970_v23 = vpop.f32.mrb[37].mxu1 }
 0x15e   :  { %v1186_v24 = vadd.f32 %v1185_v22, %v968_v21  ;;  %v1187_v25 = vpop.f32.mrb[37].mxu0  ;;  %v971_v26 = vpop.f32.mrb[38].mxu1 }
 0x15f   :  { %v1188_v27 = vpop.f32.mrb[38].mxu0  ;;  %v973_v28 = vpop.f32.mrb[39].mxu1 }
 0x160   :  { %v1550_v29 = vadd.f32 %v1549_v18, %v1186_v24  ;;  %v1605_v30 = vmul.f32 %v1186_v24, %v1186_v24  ;;  %v1189_v31 = vadd.f32 %v1188_v27, %v971_v26  ;;  %v1190_v32 = vpop.f32.mrb[39].mxu0 }
 0x162   :  { %v1650_v33 = vadd.f32 %v1649_v20, %v1605_v30  ;;  %v1990_v34 = vpack.c.bf16 %v1189_v31, %v1186_v24  ;;  %v1551_v35 = vadd.f32 %v1550_v29, %v1189_v31  ;;  %v1606_v36 = vmul.f32 %v1189_v31, %v1189_v31 }
 0x164   :  { %2065 = vst [vmem:[%s2817_s2 + $0x48] sm:$0xff] %v1990_v34   ;;  %v1651_v37 = vadd.f32 %v1650_v33, %v1606_v36  ;;  %v976_v38 = vpop.f32.mrb[40].mxu1 }
 0x165   :  { %v1193_v39 = vpop.f32.mrb[40].mxu0  ;;  %v978_v40 = vpop.f32.mrb[41].mxu1 }
 0x166   :  { %v1194_v41 = vadd.f32 %v1193_v39, %v976_v38  ;;  %v1195_v42 = vpop.f32.mrb[41].mxu0  ;;  %v979_v43 = vpop.f32.mrb[42].mxu1 }
 0x167   :  { %v1196_v44 = vpop.f32.mrb[42].mxu0  ;;  %v981_v45 = vpop.f32.mrb[43].mxu1 }
 0x168   :  { %v1552_v46 = vadd.f32 %v1551_v35, %v1194_v41  ;;  %v1607_v47 = vmul.f32 %v1194_v41, %v1194_v41  ;;  %v1197_v48 = vadd.f32 %v1196_v44, %v979_v43  ;;  %v1198_v49 = vpop.f32.mrb[43].mxu0 }
 0x16a   :  { %v1652_v50 = vadd.f32 %v1651_v37, %v1607_v47  ;;  %v1995_v51 = vpack.c.bf16 %v1197_v48, %v1194_v41  ;;  %v1553_v52 = vadd.f32 %v1552_v46, %v1197_v48  ;;  %v1608_v53 = vmul.f32 %v1197_v48, %v1197_v48 }
 0x16c   :  { %2066 = vst [vmem:[%s2817_s2 + $0x50] sm:$0xff] %v1995_v51   ;;  %v1653_v54 = vadd.f32 %v1652_v50, %v1608_v53  ;;  %v984_v55 = vpop.f32.mrb[44].mxu1 }
 0x16d   :  { %v1201_v56 = vpop.f32.mrb[44].mxu0  ;;  %v986_v57 = vpop.f32.mrb[45].mxu1 }
 0x16e   :  { %v1202_v58 = vadd.f32 %v1201_v56, %v984_v55  ;;  %v1203_v59 = vpop.f32.mrb[45].mxu0  ;;  %v987_v60 = vpop.f32.mrb[46].mxu1 }
 0x16f   :  { %v1204_v61 = vpop.f32.mrb[46].mxu0  ;;  %v989_v62 = vpop.f32.mrb[47].mxu1 }
 0x170   :  { %v1554_v63 = vadd.f32 %v1553_v52, %v1202_v58  ;;  %v1609_v0 = vmul.f32 %v1202_v58, %v1202_v58  ;;  %v1205_v1 = vadd.f32 %v1204_v61, %v987_v60  ;;  %v1206_v2 = vpop.f32.mrb[47].mxu0 }
 0x172   :  { %v1654_v3 = vadd.f32 %v1653_v54, %v1609_v0  ;;  %v2000_v4 = vpack.c.bf16 %v1205_v1, %v1202_v58  ;;  %v1555_v5 = vadd.f32 %v1554_v63, %v1205_v1  ;;  %v1610_v6 = vmul.f32 %v1205_v1, %v1205_v1 }
 0x174   :  { %2067 = vst [vmem:[%s2817_s2 + $0x58] sm:$0xff] %v2000_v4   ;;  %v1655_v7 = vadd.f32 %v1654_v3, %v1610_v6  ;;  %v992_v8 = vpop.f32.mrb[48].mxu1 }
 0x175   :  { %v1209_v9 = vpop.f32.mrb[48].mxu0  ;;  %v994_v10 = vpop.f32.mrb[49].mxu1 }
 0x176   :  { %v1210_v11 = vadd.f32 %v1209_v9, %v992_v8  ;;  %v1211_v12 = vpop.f32.mrb[49].mxu0  ;;  %v995_v13 = vpop.f32.mrb[50].mxu1 }
 0x177   :  { %v1212_v14 = vpop.f32.mrb[50].mxu0  ;;  %v997_v15 = vpop.f32.mrb[51].mxu1 }
 0x178   :  { %v1556_v16 = vadd.f32 %v1555_v5, %v1210_v11  ;;  %v1611_v17 = vmul.f32 %v1210_v11, %v1210_v11  ;;  %v1213_v18 = vadd.f32 %v1212_v14, %v995_v13  ;;  %v1214_v19 = vpop.f32.mrb[51].mxu0 }
 0x17a   :  { %v1656_v20 = vadd.f32 %v1655_v7, %v1611_v17  ;;  %v2005_v21 = vpack.c.bf16 %v1213_v18, %v1210_v11  ;;  %v1557_v22 = vadd.f32 %v1556_v16, %v1213_v18  ;;  %v1612_v23 = vmul.f32 %v1213_v18, %v1213_v18 }
 0x17c   :  { %2068 = vst [vmem:[%s2817_s2 + $0x60] sm:$0xff] %v2005_v21   ;;  %v1657_v24 = vadd.f32 %v1656_v20, %v1612_v23  ;;  %v1000_v25 = vpop.f32.mrb[52].mxu1 }
 0x17d   :  { %v1217_v26 = vpop.f32.mrb[52].mxu0  ;;  %v1002_v27 = vpop.f32.mrb[53].mxu1 }
 0x17e   :  { %v1218_v28 = vadd.f32 %v1217_v26, %v1000_v25  ;;  %v1219_v29 = vpop.f32.mrb[53].mxu0  ;;  %v1003_v30 = vpop.f32.mrb[54].mxu1 }
 0x17f   :  { %v1220_v31 = vpop.f32.mrb[54].mxu0  ;;  %v1005_v32 = vpop.f32.mrb[55].mxu1 }
 0x180   :  { %v1558_v33 = vadd.f32 %v1557_v22, %v1218_v28  ;;  %v1613_v34 = vmul.f32 %v1218_v28, %v1218_v28  ;;  %v1221_v35 = vadd.f32 %v1220_v31, %v1003_v30  ;;  %v1222_v36 = vpop.f32.mrb[55].mxu0 }
 0x182   :  { %v1658_v37 = vadd.f32 %v1657_v24, %v1613_v34  ;;  %v2010_v38 = vpack.c.bf16 %v1221_v35, %v1218_v28  ;;  %v1559_v39 = vadd.f32 %v1558_v33, %v1221_v35  ;;  %v1614_v40 = vmul.f32 %v1221_v35, %v1221_v35 }
 0x184   :  { %2069 = vst [vmem:[%s2817_s2 + $0x68] sm:$0xff] %v2010_v38   ;;  %v1659_v41 = vadd.f32 %v1658_v37, %v1614_v40  ;;  %v1008_v42 = vpop.f32.mrb[56].mxu1 }
 0x185   :  { %v1225_v43 = vpop.f32.mrb[56].mxu0  ;;  %v1010_v44 = vpop.f32.mrb[57].mxu1 }
 0x186   :  { %v1226_v45 = vadd.f32 %v1225_v43, %v1008_v42  ;;  %v1227_v46 = vpop.f32.mrb[57].mxu0  ;;  %v1011_v47 = vpop.f32.mrb[58].mxu1 }
 0x187   :  { %v1228_v48 = vpop.f32.mrb[58].mxu0  ;;  %v1013_v49 = vpop.f32.mrb[59].mxu1 }
 0x188   :  { %v1560_v50 = vadd.f32 %v1559_v39, %v1226_v45  ;;  %v1615_v51 = vmul.f32 %v1226_v45, %v1226_v45  ;;  %v1229_v52 = vadd.f32 %v1228_v48, %v1011_v47  ;;  %v1230_v53 = vpop.f32.mrb[59].mxu0 }
 0x18a   :  { %v1660_v54 = vadd.f32 %v1659_v41, %v1615_v51  ;;  %v2015_v55 = vpack.c.bf16 %v1229_v52, %v1226_v45  ;;  %v1561_v56 = vadd.f32 %v1560_v50, %v1229_v52  ;;  %v1616_v57 = vmul.f32 %v1229_v52, %v1229_v52 }
 0x18c   :  { %2070 = vst [vmem:[%s2817_s2 + $0x70] sm:$0xff] %v2015_v55   ;;  %v1661_v58 = vadd.f32 %v1660_v54, %v1616_v57  ;;  %v1016_v59 = vpop.f32.mrb[60].mxu1 }
 0x18d   :  { %v1233_v60 = vpop.f32.mrb[60].mxu0  ;;  %v1018_v61 = vpop.f32.mrb[61].mxu1 }
 0x18e   :  { %v1234_v62 = vadd.f32 %v1233_v60, %v1016_v59  ;;  %v1235_v63 = vpop.f32.mrb[61].mxu0  ;;  %v1019_v0 = vpop.f32.mrb[62].mxu1 }
 0x18f   :  { %v1236_v1 = vpop.f32.mrb[62].mxu0  ;;  %v1021_v2 = vpop.f32.mrb[63].mxu1 }
 0x190   :  { %v1562_v3 = vadd.f32 %v1561_v56, %v1234_v62  ;;  %v1617_v4 = vmul.f32 %v1234_v62, %v1234_v62  ;;  %v1237_v5 = vadd.f32 %v1236_v1, %v1019_v0  ;;  %v1238_v6 = vpop.f32.mrb[63].mxu0 }
 0x192   :  { %v1662_v7 = vadd.f32 %v1661_v58, %v1617_v4  ;;  %v2020_v8 = vpack.c.bf16 %v1237_v5, %v1234_v62  ;;  %v1563_v9 = vadd.f32 %v1562_v3, %v1237_v5  ;;  %v1618_v10 = vmul.f32 %v1237_v5, %v1237_v5 }
 0x194   :  { %2071 = vst [vmem:[%s2817_s2 + $0x78] sm:$0xff] %v2020_v8   ;;  %v1663_v11 = vadd.f32 %v1662_v7, %v1618_v10  ;;  %v1024_v12 = vpop.f32.mrb[64].mxu1 }
 0x195   :  { %v1241_v13 = vpop.f32.mrb[64].mxu0  ;;  %v1026_v14 = vpop.f32.mrb[65].mxu1 }
 0x196   :  { %v1242_v15 = vadd.f32 %v1241_v13, %v1024_v12  ;;  %v1243_v16 = vpop.f32.mrb[65].mxu0  ;;  %v1027_v17 = vpop.f32.mrb[66].mxu1 }
 0x197   :  { %v1244_v18 = vpop.f32.mrb[66].mxu0  ;;  %v1029_v19 = vpop.f32.mrb[67].mxu1 }
 0x198   :  { %v1564_v20 = vadd.f32 %v1563_v9, %v1242_v15  ;;  %v1619_v21 = vmul.f32 %v1242_v15, %v1242_v15  ;;  %v1245_v22 = vadd.f32 %v1244_v18, %v1027_v17  ;;  %v1246_v23 = vpop.f32.mrb[67].mxu0 }
 0x19a   :  { %v1664_v24 = vadd.f32 %v1663_v11, %v1619_v21  ;;  %v2025_v25 = vpack.c.bf16 %v1245_v22, %v1242_v15  ;;  %v1565_v26 = vadd.f32 %v1564_v20, %v1245_v22  ;;  %v1620_v27 = vmul.f32 %v1245_v22, %v1245_v22 }
 0x19c   :  { %2072 = vst [vmem:[%s2817_s2 + $0x80] sm:$0xff] %v2025_v25   ;;  %v1665_v28 = vadd.f32 %v1664_v24, %v1620_v27  ;;  %v1032_v29 = vpop.f32.mrb[68].mxu1 }
 0x19d   :  { %v1249_v30 = vpop.f32.mrb[68].mxu0  ;;  %v1034_v31 = vpop.f32.mrb[69].mxu1 }
 0x19e   :  { %v1250_v32 = vadd.f32 %v1249_v30, %v1032_v29  ;;  %v1251_v33 = vpop.f32.mrb[69].mxu0  ;;  %v1035_v34 = vpop.f32.mrb[70].mxu1 }
 0x19f   :  { %v1252_v35 = vpop.f32.mrb[70].mxu0  ;;  %v1037_v36 = vpop.f32.mrb[71].mxu1 }
 0x1a0   :  { %v1566_v37 = vadd.f32 %v1565_v26, %v1250_v32  ;;  %v1621_v38 = vmul.f32 %v1250_v32, %v1250_v32  ;;  %v1253_v39 = vadd.f32 %v1252_v35, %v1035_v34  ;;  %v1254_v40 = vpop.f32.mrb[71].mxu0 }
 0x1a2   :  { %v1666_v41 = vadd.f32 %v1665_v28, %v1621_v38  ;;  %v2030_v42 = vpack.c.bf16 %v1253_v39, %v1250_v32  ;;  %v1567_v43 = vadd.f32 %v1566_v37, %v1253_v39  ;;  %v1622_v44 = vmul.f32 %v1253_v39, %v1253_v39 }
 0x1a4   :  { %2073 = vst [vmem:[%s2817_s2 + $0x88] sm:$0xff] %v2030_v42   ;;  %v1667_v45 = vadd.f32 %v1666_v41, %v1622_v44  ;;  %v1040_v46 = vpop.f32.mrb[72].mxu1 }
 0x1a5   :  { %v1257_v47 = vpop.f32.mrb[72].mxu0  ;;  %v1042_v48 = vpop.f32.mrb[73].mxu1 }
 0x1a6   :  { %v1258_v49 = vadd.f32 %v1257_v47, %v1040_v46  ;;  %v1259_v50 = vpop.f32.mrb[73].mxu0  ;;  %v1043_v51 = vpop.f32.mrb[74].mxu1 }
 0x1a7   :  { %v1260_v52 = vpop.f32.mrb[74].mxu0  ;;  %v1045_v53 = vpop.f32.mrb[75].mxu1 }
 0x1a8   :  { %v1568_v54 = vadd.f32 %v1567_v43, %v1258_v49  ;;  %v1623_v55 = vmul.f32 %v1258_v49, %v1258_v49  ;;  %v1261_v56 = vadd.f32 %v1260_v52, %v1043_v51  ;;  %v1262_v57 = vpop.f32.mrb[75].mxu0 }
 0x1aa   :  { %v1668_v58 = vadd.f32 %v1667_v45, %v1623_v55  ;;  %v2035_v59 = vpack.c.bf16 %v1261_v56, %v1258_v49  ;;  %v1569_v60 = vadd.f32 %v1568_v54, %v1261_v56  ;;  %v1624_v61 = vmul.f32 %v1261_v56, %v1261_v56 }
 0x1ac   :  { %2074 = vst [vmem:[%s2817_s2 + $0x90] sm:$0xff] %v2035_v59   ;;  %v1669_v62 = vadd.f32 %v1668_v58, %v1624_v61  ;;  %v1048_v63 = vpop.f32.mrb[76].mxu1 }
 0x1ad   :  { %v1265_v0 = vpop.f32.mrb[76].mxu0  ;;  %v1050_v1 = vpop.f32.mrb[77].mxu1 }
 0x1ae   :  { %v1266_v2 = vadd.f32 %v1265_v0, %v1048_v63  ;;  %v1267_v3 = vpop.f32.mrb[77].mxu0  ;;  %v1051_v4 = vpop.f32.mrb[78].mxu1 }
 0x1af   :  { %v1268_v5 = vpop.f32.mrb[78].mxu0  ;;  %v1053_v6 = vpop.f32.mrb[79].mxu1 }
 0x1b0   :  { %v1570_v7 = vadd.f32 %v1569_v60, %v1266_v2  ;;  %v1625_v8 = vmul.f32 %v1266_v2, %v1266_v2  ;;  %v1269_v9 = vadd.f32 %v1268_v5, %v1051_v4  ;;  %v1270_v10 = vpop.f32.mrb[79].mxu0 }
 0x1b2   :  { %v1670_v11 = vadd.f32 %v1669_v62, %v1625_v8  ;;  %v2040_v12 = vpack.c.bf16 %v1269_v9, %v1266_v2  ;;  %v1571_v13 = vadd.f32 %v1570_v7, %v1269_v9  ;;  %v1626_v14 = vmul.f32 %v1269_v9, %v1269_v9 }
 0x1b4   :  { %2075 = vst [vmem:[%s2817_s2 + $0x98] sm:$0xff] %v2040_v12   ;;  %v1671_v15 = vadd.f32 %v1670_v11, %v1626_v14  ;;  %v1056_v16 = vpop.f32.mrb[80].mxu1  ;;  %v1532_v12 = vld [vmem:[%s2818_s3] sm:$0x1] }
 0x1b5   :  { %v1273_v17 = vpop.f32.mrb[80].mxu0  ;;  %v1058_v18 = vpop.f32.mrb[81].mxu1 }
 0x1b6   :  { %v1274_v19 = vadd.f32 %v1273_v17, %v1056_v16  ;;  %v1275_v20 = vpop.f32.mrb[81].mxu0  ;;  %v1059_v21 = vpop.f32.mrb[82].mxu1 }
 0x1b7   :  { %v1276_v22 = vpop.f32.mrb[82].mxu0  ;;  %v1061_v23 = vpop.f32.mrb[83].mxu1 }
 0x1b8   :  { %v1572_v24 = vadd.f32 %v1571_v13, %v1274_v19  ;;  %v1627_v25 = vmul.f32 %v1274_v19, %v1274_v19  ;;  %v1277_v26 = vadd.f32 %v1276_v22, %v1059_v21  ;;  %v1278_v27 = vpop.f32.mrb[83].mxu0 }
 0x1ba   :  { %v1672_v28 = vadd.f32 %v1671_v15, %v1627_v25  ;;  %v2045_v29 = vpack.c.bf16 %v1277_v26, %v1274_v19  ;;  %v1573_v30 = vadd.f32 %v1572_v24, %v1277_v26  ;;  %v1628_v31 = vmul.f32 %v1277_v26, %v1277_v26  ;;  %v1586_v15 = vld [vmem:[%s2819_s4] sm:$0x1] }
 0x1bc   :  { %2076 = vst [vmem:[%s2817_s2 + $0xa0] sm:$0xff] %v2045_v29   ;;  %v1673_v32 = vadd.f32 %v1672_v28, %v1628_v31  ;;  %v1064_v33 = vpop.f32.mrb[84].mxu1 }
 0x1bd   :  { %v1281_v34 = vpop.f32.mrb[84].mxu0  ;;  %v1066_v35 = vpop.f32.mrb[85].mxu1 }
 0x1be   :  { %v1282_v36 = vadd.f32 %v1281_v34, %v1064_v33  ;;  %v1283_v37 = vpop.f32.mrb[85].mxu0  ;;  %v1067_v38 = vpop.f32.mrb[86].mxu1 }
 0x1bf   :  { %v1284_v39 = vpop.f32.mrb[86].mxu0  ;;  %v1069_v40 = vpop.f32.mrb[87].mxu1 }
 0x1c0   :  { %v1574_v41 = vadd.f32 %v1573_v30, %v1282_v36  ;;  %v1629_v42 = vmul.f32 %v1282_v36, %v1282_v36  ;;  %v1285_v43 = vadd.f32 %v1284_v39, %v1067_v38  ;;  %v1286_v44 = vpop.f32.mrb[87].mxu0 }
 0x1c2   :  { %v1674_v45 = vadd.f32 %v1673_v32, %v1629_v42  ;;  %v2050_v46 = vpack.c.bf16 %v1285_v43, %v1282_v36  ;;  %v1575_v47 = vadd.f32 %v1574_v41, %v1285_v43  ;;  %v1630_v48 = vmul.f32 %v1285_v43, %v1285_v43 }
 0x1c4   :  { %2077 = vst [vmem:[%s2817_s2 + $0xa8] sm:$0xff] %v2050_v46   ;;  %v1675_v49 = vadd.f32 %v1674_v45, %v1630_v48  ;;  %v1072_v50 = vpop.f32.mrb[88].mxu1 }
 0x1c5   :  { %v1289_v51 = vpop.f32.mrb[88].mxu0  ;;  %v1074_v52 = vpop.f32.mrb[89].mxu1 }
 0x1c6   :  { %v1290_v53 = vadd.f32 %v1289_v51, %v1072_v50  ;;  %v1291_v54 = vpop.f32.mrb[89].mxu0  ;;  %v1075_v55 = vpop.f32.mrb[90].mxu1 }
 0x1c7   :  { %v1292_v56 = vpop.f32.mrb[90].mxu0  ;;  %v1077_v57 = vpop.f32.mrb[91].mxu1 }
 0x1c8   :  { %v1576_v58 = vadd.f32 %v1575_v47, %v1290_v53  ;;  %v1631_v59 = vmul.f32 %v1290_v53, %v1290_v53  ;;  %v1293_v60 = vadd.f32 %v1292_v56, %v1075_v55  ;;  %v1294_v61 = vpop.f32.mrb[91].mxu0 }
 0x1ca   :  { %v1676_v62 = vadd.f32 %v1675_v49, %v1631_v59  ;;  %v2055_v63 = vpack.c.bf16 %v1293_v60, %v1290_v53  ;;  %v1577_v0 = vadd.f32 %v1576_v58, %v1293_v60  ;;  %v1632_v1 = vmul.f32 %v1293_v60, %v1293_v60 }
 0x1cc   :  { %2078 = vst [vmem:[%s2817_s2 + $0xb0] sm:$0xff] %v2055_v63   ;;  %v1578_v2 = vrot.slane %v1577_v0, 4  ;;  %v1677_v3 = vadd.f32 %v1676_v62, %v1632_v1 }
 0x1ce   :  { %v1579_v4 = vadd.f32 %v1578_v2, %v1577_v0  ;;  %v1678_v5 = vrot.slane %v1677_v3, 4 }
 0x1d0   :  { %v1580_v6 = vrot.slane %v1579_v4, 2  ;;  %v1679_v7 = vadd.f32 %v1678_v5, %v1677_v3 }
 0x1d2   :  { %v1581_v8 = vadd.f32 %v1580_v6, %v1579_v4  ;;  %v1680_v9 = vrot.slane %v1679_v7, 2 }
 0x1d4   :  { %v1582_v10 = vrot.slane %v1581_v8, 1  ;;  %v1681_v11 = vadd.f32 %v1680_v9, %v1679_v7 }
 0x1d6   :  { %v1583_v13 = vadd.f32 %v1582_v10, %v1581_v8  ;;  %v1682_v14 = vrot.slane %v1681_v11, 1 }
 0x1d8   :  { %v1584_v16 = vadd.f32 %v1583_v13, %v1532_v12  ;;  %v1683_v17 = vadd.f32 %v1682_v14, %v1681_v11 }
 0x1da   :  { %1585 = vst [vmem:[%s2818_s3] sm:$0x1] %v1584_v16  ;;  %v1684_v18 = vadd.f32 %v1683_v17, %v1586_v15 }
 0x1dc   :  { %1685 = vst [vmem:[%s2819_s4] sm:$0x1] %v1684_v18 }

// kernel: critic_forward.8
= control target key start
LH: loop header
LB: loop body
LE: loop exit
PB: predicated region body
PF: predicated region fallthrough
CT: control target
= control target key end

     0   :  { %v126_v5 = vlaneseq  ;;  %s1418_s1 = inlined_call_operand.vmem [shape: f32[1,128], index: 1, kind: input, shape index: {}]   ;;  %s1419_s2 = inlined_call_operand.vmem [shape: f32[1,128], index: 2, kind: input, shape index: {}]   ;;  %s1420_s0 = inlined_call_operand.vmem [shape: bf16[368,128], index: 0, kind: input, shape index: {}]   ;;  %s1421_s3 = inlined_call_operand.vmem [shape: f32[1,128], index: 3, kind: input, shape index: {}]   ;;  %s1422_s4 = inlined_call_operand.vmem [shape: f32[1,128], index: 4, kind: input, shape index: {}]   ;;  %s1423_s5 = inlined_call_operand.vmem [shape: bf16[368,128], index: 5, kind: output, shape index: {}]  }
   0x1   :  { %v20_v0 = vld [vmem:[%s1418_s1] sm:$0x1]  ;;  %v996_v10 = vld [vmem:[%s1420_s0 + $0x8] sm:$0xff]   ;;  %v1001_v11 = vld [vmem:[%s1420_s0 + $0x10] sm:$0xff]  }
   0x2   :  { %v21_v1 = vld [vmem:[%s1419_s2] sm:$0x1]  ;;  %v982_v2 = vmul.f32 0.0027777778, %v20_v0  ;;  %v991_v9 = vshrl.u32 %v126_v5, 7  ;;  %v1006_v12 = vld [vmem:[%s1420_s0 + $0x18] sm:$0xff]   ;;  %v699_v19 = vunpack.c.l.bf16 %v996_v10  ;;  %v700_v20 = vunpack.c.h.bf16 %v996_v10 }
   0x3   :  { %v23_v3 = vmul.f32 0.0027777778, %v21_v1  ;;  %v989_v8 = vld [vmem:[%s1420_s0] sm:$0xff]   ;;  %v1018_v16 = vld [vmem:[%s1420_s0 + $0x28] sm:$0xff]   ;;  %v1023_v17 = vld [vmem:[%s1420_s0 + $0x30] sm:$0xff]   ;;  %v703_v21 = vunpack.c.l.bf16 %v1001_v11  ;;  %v704_v24 = vunpack.c.h.bf16 %v1001_v11  ;;  %v707_v25 = vunpack.c.l.bf16 %v1006_v12 }
   0x4   :  { %v24_v4 = vmul.f32 %v982_v2, %v982_v2  ;;  %v1011_v13 = vld [vmem:[%s1420_s0 + $0x20] sm:$0xff]   ;;  %v695_v14 = vunpack.c.l.bf16 %v989_v8  ;;  %v696_v15 = vunpack.c.h.bf16 %v989_v8  ;;  %v128_v18 = vsub.s32 0, %v991_v9  ;;  %v1032_v22 = vld [vmem:[%s1420_s0 + $0x38] sm:$0xff]   ;;  %v1046_v28 = vld [vmem:[%s1420_s0 + $0x48] sm:$0xff]  }
   0x5   :  { %v1037_v23 = vld [vmem:[%s1420_s0 + $0x40] sm:$0xff]   ;;  %v708_v26 = vunpack.c.h.bf16 %v1006_v12  ;;  %v711_v27 = vunpack.c.l.bf16 %v1011_v13  ;;  %v1051_v29 = vld [vmem:[%s1420_s0 + $0x50] sm:$0xff]   ;;  %v712_v30 = vunpack.c.h.bf16 %v1011_v13  ;;  %v715_v31 = vunpack.c.l.bf16 %v1018_v16  ;;  %v1060_v34 = vld [vmem:[%s1420_s0 + $0x58] sm:$0xff]  }
   0x6   :  { %v25_v6 = vsub.f32 %v23_v3, %v24_v4  ;;  %v716_v32 = vunpack.c.h.bf16 %v1018_v16  ;;  %v719_v33 = vunpack.c.l.bf16 %v1023_v17  ;;  %v1065_v35 = vld [vmem:[%s1420_s0 + $0x60] sm:$0xff]   ;;  %v720_v36 = vunpack.c.h.bf16 %v1023_v17  ;;  %v1074_v40 = vld [vmem:[%s1420_s0 + $0x68] sm:$0xff]   ;;  %v1079_v41 = vld [vmem:[%s1420_s0 + $0x70] sm:$0xff]  }
   0x7   :  { %v723_v37 = vunpack.c.l.bf16 %v1032_v22  ;;  %v724_v38 = vunpack.c.h.bf16 %v1032_v22  ;;  %v727_v39 = vunpack.c.l.bf16 %v1037_v23  ;;  %v728_v42 = vunpack.c.h.bf16 %v1037_v23  ;;  %v1088_v46 = vld [vmem:[%s1420_s0 + $0x78] sm:$0xff]   ;;  %v1093_v47 = vld [vmem:[%s1420_s0 + $0x80] sm:$0xff]   ;;  %v1105_v53 = vld [vmem:[%s1420_s0 + $0x88] sm:$0xff]  }
   0x8   :  { %v27_v7 = vadd.f32 1e-05, %v25_v6  ;;  %v731_v43 = vunpack.c.l.bf16 %v1046_v28  ;;  %v732_v44 = vunpack.c.h.bf16 %v1046_v28  ;;  %v735_v45 = vunpack.c.l.bf16 %v1051_v29  ;;  %v26_v48 = vld [vmem:[%s1421_s3] sm:$0x1]  ;;  %v1114_v58 = vld [vmem:[%s1420_s0 + $0x90] sm:$0xff]   ;;  %v1119_v59 = vld [vmem:[%s1420_s0 + $0x98] sm:$0xff]  }
   0x9   :  { %v736_v49 = vunpack.c.h.bf16 %v1051_v29  ;;  %v739_v50 = vunpack.c.l.bf16 %v1060_v34  ;;  %v740_v51 = vunpack.c.h.bf16 %v1060_v34  ;;  %v743_v52 = vunpack.c.l.bf16 %v1065_v35  ;;  %v1128_v1 = vld [vmem:[%s1420_s0 + $0xa0] sm:$0xff]   ;;  %v1141_v0 = vld [vmem:[%s1420_s0 + $0xb0] sm:$0xff]  }
   0xa   :  { %944 = vrsqrt.f32 %v27_v7  ;;  %v744_v54 = vunpack.c.h.bf16 %v1065_v35  ;;  %v1136_v7 = vld [vmem:[%s1420_s0 + $0xa8] sm:$0xff]   ;;  %v772_v4 = vunpack.c.h.bf16 %v1119_v59  ;;  %v775_v61 = vunpack.c.l.bf16 %v1128_v1 }
   0xb   :  { %v779_v56 = vunpack.c.l.bf16 %v1136_v7  ;;  %v783_v5 = vunpack.c.l.bf16 %v1141_v0  ;;  %v784_v6 = vunpack.c.h.bf16 %v1141_v0 }
  0x14   :  { %v945_v60 = vpop.eup %944 }
  0x15   :  { %v29_v3 = vmul.f32 %v945_v60, %v26_v48  ;;  %v30_v48 = vld [vmem:[%s1422_s4] sm:$0x1] }
  0x17   :  { %v31_v63 = vmul.f32 %v29_v3, %v982_v2  ;;  %v1153_v62 = vrot.slane %v29_v3, %v128_v18 }
  0x19   :  { %v32_v55 = vsub.f32 %v30_v48, %v31_v63  ;;  %v131_v2 = vmul.f32 %v695_v14, %v1153_v62  ;;  %v132_v3 = vmul.f32 %v696_v15, %v1153_v62  ;;  %v133_v57 = vmul.f32 %v699_v19, %v1153_v62 }
  0x1a   :  { %v134_v60 = vmul.f32 %v700_v20, %v1153_v62  ;;  %v135_v63 = vmul.f32 %v703_v21, %v1153_v62  ;;  %v136_v14 = vmul.f32 %v704_v24, %v1153_v62  ;;  %v137_v8 = vmul.f32 %v707_v25, %v1153_v62 }
  0x1b   :  { %v1184_v15 = vrot.slane %v32_v55, %v128_v18  ;;  %v138_v10 = vmul.f32 %v708_v26, %v1153_v62  ;;  %v139_v19 = vmul.f32 %v711_v27, %v1153_v62  ;;  %v140_v11 = vmul.f32 %v712_v30, %v1153_v62 }
  0x1c   :  { %v141_v20 = vmul.f32 %v715_v31, %v1153_v62  ;;  %v142_v9 = vmul.f32 %v716_v32, %v1153_v62  ;;  %v143_v12 = vmul.f32 %v719_v33, %v1153_v62  ;;  %v144_v18 = vmul.f32 %v720_v36, %v1153_v62 }
  0x1d   :  { %v183_v21 = vadd.f32 %v1184_v15, %v131_v2  ;;  %v184_v13 = vadd.f32 %v1184_v15, %v132_v3  ;;  %v185_v24 = vadd.f32 %v1184_v15, %v133_v57  ;;  %v186_v25 = vadd.f32 %v1184_v15, %v134_v60 }
  0x1e   :  { %v187_v26 = vadd.f32 %v1184_v15, %v135_v63  ;;  %v188_v16 = vadd.f32 %v1184_v15, %v136_v14  ;;  %v189_v27 = vadd.f32 %v1184_v15, %v137_v8  ;;  %v190_v30 = vadd.f32 %v1184_v15, %v138_v10 }
  0x1f   :  { %vm229_vm0 = vcmp.gt.f32.partialorder %v183_v21, 0.0  ;;  %vm230_vm1 = vcmp.gt.f32.partialorder %v184_v13, 0.0  ;;  %v275_v17 = vmul.f32 0.2, %v183_v21  ;;  %v276_v31 = vmul.f32 0.2, %v184_v13 }
  0x20   :  { %vm231_vm2 = vcmp.gt.f32.partialorder %v185_v24, 0.0  ;;  %vm232_vm3 = vcmp.gt.f32.partialorder %v186_v25, 0.0  ;;  %v277_v32 = vmul.f32 0.2, %v185_v24  ;;  %v278_v33 = vmul.f32 0.2, %v186_v25 }
  0x21   :  { %v321_v36 = vsel %vm229_vm0, %v183_v21, %v275_v17  ;;  %v322_v55 = vsel %vm230_vm1, %v184_v13, %v276_v31  ;;  %vm233_vm4 = vcmp.gt.f32.partialorder %v187_v26, 0.0  ;;  %vm234_vm5 = vcmp.gt.f32.partialorder %v188_v16, 0.0 }
  0x22   :  { %v788_v57 = vpack.c.bf16 %v322_v55, %v321_v36  ;;  %v323_v48 = vsel %vm231_vm2, %v185_v24, %v277_v32  ;;  %v324_v60 = vsel %vm232_vm3, %v186_v25, %v278_v33  ;;  %v279_v2 = vmul.f32 0.2, %v187_v26 }
  0x23   :  { %v793_v3 = vpack.c.bf16 %v324_v60, %v323_v48  ;;  %v280_v63 = vmul.f32 0.2, %v188_v16  ;;  %vm235_vm6 = vcmp.gt.f32.partialorder %v189_v27, 0.0  ;;  %vm236_vm7 = vcmp.gt.f32.partialorder %v190_v30, 0.0 }
  0x24   :  { %789 = vst [vmem:[%s1423_s5] sm:$0xff] %v788_v57   ;;  %v325_v14 = vsel %vm233_vm4, %v187_v26, %v279_v2  ;;  %v281_v8 = vmul.f32 0.2, %v189_v27  ;;  %v282_v10 = vmul.f32 0.2, %v190_v30  ;;  %v191_v21 = vadd.f32 %v1184_v15, %v139_v19 }
  0x25   :  { %922 = vst [vmem:[%s1423_s5 + $0x8] sm:$0xff] %v793_v3   ;;  %v326_v13 = vsel %vm234_vm5, %v188_v16, %v280_v63  ;;  %v192_v24 = vadd.f32 %v1184_v15, %v140_v11  ;;  %v193_v25 = vadd.f32 %v1184_v15, %v141_v20  ;;  %v194_v17 = vadd.f32 %v1184_v15, %v142_v9 }
  0x26   :  { %v798_v31 = vpack.c.bf16 %v326_v13, %v325_v14  ;;  %v327_v32 = vsel %vm235_vm6, %v189_v27, %v281_v8  ;;  %v328_v33 = vsel %vm236_vm7, %v190_v30, %v282_v10  ;;  %vm237_vm8 = vcmp.gt.f32.partialorder %v191_v21, 0.0 }
  0x27   :  { %v803_v26 = vpack.c.bf16 %v328_v33, %v327_v32  ;;  %vm238_vm9 = vcmp.gt.f32.partialorder %v192_v24, 0.0  ;;  %v283_v36 = vmul.f32 0.2, %v191_v21  ;;  %v284_v55 = vmul.f32 0.2, %v192_v24 }
  0x28   :  { %923 = vst [vmem:[%s1423_s5 + $0x10] sm:$0xff] %v798_v31   ;;  %vm239_vm10 = vcmp.gt.f32.partialorder %v193_v25, 0.0  ;;  %vm240_vm11 = vcmp.gt.f32.partialorder %v194_v17, 0.0  ;;  %v285_v19 = vmul.f32 0.2, %v193_v25  ;;  %v195_v16 = vadd.f32 %v1184_v15, %v143_v12 }
  0x29   :  { %v286_v11 = vmul.f32 0.2, %v194_v17  ;;  %924 = vst [vmem:[%s1423_s5 + $0x18] sm:$0xff] %v803_v26   ;;  %v329_v20 = vsel %vm237_vm8, %v191_v21, %v283_v36  ;;  %v330_v9 = vsel %vm238_vm9, %v192_v24, %v284_v55  ;;  %v196_v27 = vadd.f32 %v1184_v15, %v144_v18 }
  0x2a   :  { %v808_v30 = vpack.c.bf16 %v330_v9, %v329_v20  ;;  %v331_v57 = vsel %vm239_vm10, %v193_v25, %v285_v19  ;;  %v145_v60 = vmul.f32 %v723_v37, %v1153_v62  ;;  %vm241_vm12 = vcmp.gt.f32.partialorder %v195_v16, 0.0 }
  0x2b   :  { %v332_v48 = vsel %vm240_vm11, %v194_v17, %v286_v11  ;;  %vm242_vm13 = vcmp.gt.f32.partialorder %v196_v27, 0.0  ;;  %v287_v3 = vmul.f32 0.2, %v195_v16  ;;  %v288_v63 = vmul.f32 0.2, %v196_v27 }
  0x2c   :  { %v813_v2 = vpack.c.bf16 %v332_v48, %v331_v57  ;;  %925 = vst [vmem:[%s1423_s5 + $0x20] sm:$0xff] %v808_v30   ;;  %v146_v12 = vmul.f32 %v724_v38, %v1153_v62  ;;  %v197_v18 = vadd.f32 %v1184_v15, %v145_v60  ;;  %v147_v14 = vmul.f32 %v727_v39, %v1153_v62 }
  0x2d   :  { %v333_v37 = vsel %vm241_vm12, %v195_v16, %v287_v3  ;;  %v148_v8 = vmul.f32 %v728_v42, %v1153_v62  ;;  %v149_v22 = vmul.f32 %v731_v43, %v1153_v62  ;;  %v150_v38 = vmul.f32 %v732_v44, %v1153_v62 }
  0x2e   :  { %926 = vst [vmem:[%s1423_s5 + $0x28] sm:$0xff] %v813_v2   ;;  %v334_v10 = vsel %vm242_vm13, %v196_v27, %v288_v63  ;;  %v198_v39 = vadd.f32 %v1184_v15, %v146_v12  ;;  %vm243_vm14 = vcmp.gt.f32.partialorder %v197_v18, 0.0  ;;  %v289_v21 = vmul.f32 0.2, %v197_v18 }
  0x2f   :  { %v818_v13 = vpack.c.bf16 %v334_v10, %v333_v37  ;;  %v199_v24 = vadd.f32 %v1184_v15, %v147_v14  ;;  %v200_v25 = vadd.f32 %v1184_v15, %v148_v8  ;;  %v201_v23 = vadd.f32 %v1184_v15, %v149_v22 }
  0x30   :  { %vm244_vm15 = vcmp.gt.f32.partialorder %v198_v39, 0.0  ;;  %v290_v42 = vmul.f32 0.2, %v198_v39  ;;  %v335_v17 = vsel %vm243_vm14, %v197_v18, %v289_v21  ;;  %v202_v43 = vadd.f32 %v1184_v15, %v150_v38 }
  0x31   :  { %927 = vst [vmem:[%s1423_s5 + $0x30] sm:$0xff] %v818_v13   ;;  %vm245_vm0 = vcmp.gt.f32.partialorder %v199_v24, 0.0  ;;  %vm246_vm1 = vcmp.gt.f32.partialorder %v200_v25, 0.0  ;;  %v291_v28 = vmul.f32 0.2, %v199_v24  ;;  %vm247_vm2 = vcmp.gt.f32.partialorder %v201_v23, 0.0 }
  0x32   :  { %v292_v44 = vmul.f32 0.2, %v200_v25  ;;  %v336_v31 = vsel %vm244_vm15, %v198_v39, %v290_v42  ;;  %vm248_vm3 = vcmp.gt.f32.partialorder %v202_v43, 0.0  ;;  %v293_v32 = vmul.f32 0.2, %v201_v23 }
  0x33   :  { %v823_v33 = vpack.c.bf16 %v336_v31, %v335_v17  ;;  %v337_v26 = vsel %vm245_vm0, %v199_v24, %v291_v28  ;;  %v294_v55 = vmul.f32 0.2, %v202_v43  ;;  %v151_v20 = vmul.f32 %v735_v45, %v1153_v62 }
  0x34   :  { %v338_v36 = vsel %vm246_vm1, %v200_v25, %v292_v44  ;;  %v339_v11 = vsel %vm247_vm2, %v201_v23, %v293_v32  ;;  %v152_v9 = vmul.f32 %v736_v49, %v1153_v62  ;;  %v153_v27 = vmul.f32 %v739_v50, %v1153_v62 }
  0x35   :  { %v828_v19 = vpack.c.bf16 %v338_v36, %v337_v26  ;;  %928 = vst [vmem:[%s1423_s5 + $0x38] sm:$0xff] %v823_v33   ;;  %v340_v16 = vsel %vm248_vm3, %v202_v43, %v294_v55  ;;  %v154_v30 = vmul.f32 %v740_v51, %v1153_v62  ;;  %v155_v45 = vmul.f32 %v743_v52, %v1153_v62 }
  0x36   :  { %v833_v29 = vpack.c.bf16 %v340_v16, %v339_v11  ;;  %v203_v49 = vadd.f32 %v1184_v15, %v151_v20  ;;  %v204_v57 = vadd.f32 %v1184_v15, %v152_v9  ;;  %v156_v50 = vmul.f32 %v744_v54, %v1153_v62 }
  0x37   :  { %929 = vst [vmem:[%s1423_s5 + $0x40] sm:$0xff] %v828_v19   ;;  %v205_v34 = vadd.f32 %v1184_v15, %v153_v27  ;;  %v206_v51 = vadd.f32 %v1184_v15, %v154_v30  ;;  %v207_v48 = vadd.f32 %v1184_v15, %v155_v45  ;;  %v1424_v52 = vunpack.c.l.bf16 %v1074_v40 }
  0x38   :  { %930 = vst [vmem:[%s1423_s5 + $0x48] sm:$0xff] %v833_v29   ;;  %vm249_vm4 = vcmp.gt.f32.partialorder %v203_v49, 0.0  ;;  %vm250_vm5 = vcmp.gt.f32.partialorder %v204_v57, 0.0  ;;  %v295_v2 = vmul.f32 0.2, %v203_v49  ;;  %v208_v18 = vadd.f32 %v1184_v15, %v156_v50 }
  0x39   :  { %v157_v60 = vmul.f32 %v1424_v52, %v1153_v62  ;;  %v296_v3 = vmul.f32 0.2, %v204_v57  ;;  %vm251_vm6 = vcmp.gt.f32.partialorder %v205_v34, 0.0  ;;  %vm252_vm7 = vcmp.gt.f32.partialorder %v206_v51, 0.0 }
  0x3a   :  { %v297_v35 = vmul.f32 0.2, %v205_v34  ;;  %v298_v54 = vmul.f32 0.2, %v206_v51  ;;  %v341_v63 = vsel %vm249_vm4, %v203_v49, %v295_v2  ;;  %vm253_vm8 = vcmp.gt.f32.partialorder %v207_v48, 0.0 }
  0x3b   :  { %v342_v12 = vsel %vm250_vm5, %v204_v57, %v296_v3  ;;  %v299_v22 = vmul.f32 0.2, %v207_v48  ;;  %vm254_vm9 = vcmp.gt.f32.partialorder %v208_v18, 0.0  ;;  %v300_v10 = vmul.f32 0.2, %v208_v18 }
  0x3c   :  { %v838_v14 = vpack.c.bf16 %v342_v12, %v341_v63  ;;  %v343_v37 = vsel %vm251_vm6, %v205_v34, %v297_v35  ;;  %v344_v8 = vsel %vm252_vm7, %v206_v51, %v298_v54  ;;  %v1425_v39 = vunpack.c.h.bf16 %v1074_v40 }
  0x3d   :  { %v843_v38 = vpack.c.bf16 %v344_v8, %v343_v37  ;;  %v345_v13 = vsel %vm253_vm8, %v207_v48, %v299_v22  ;;  %v209_v24 = vadd.f32 %v1184_v15, %v157_v60  ;;  %v1426_v25 = vunpack.c.l.bf16 %v1079_v41 }
  0x3e   :  { %v158_v21 = vmul.f32 %v1425_v39, %v1153_v62  ;;  %931 = vst [vmem:[%s1423_s5 + $0x50] sm:$0xff] %v838_v14   ;;  %v1427_v42 = vunpack.c.h.bf16 %v1079_v41  ;;  %v346_v40 = vsel %vm254_vm9, %v208_v18, %v300_v10  ;;  %v1428_v28 = vunpack.c.l.bf16 %v1088_v46 }
  0x3f   :  { %v159_v23 = vmul.f32 %v1426_v25, %v1153_v62  ;;  %932 = vst [vmem:[%s1423_s5 + $0x58] sm:$0xff] %v843_v38   ;;  %v1429_v31 = vunpack.c.h.bf16 %v1088_v46  ;;  %v848_v33 = vpack.c.bf16 %v346_v40, %v345_v13  ;;  %vm255_vm10 = vcmp.gt.f32.partialorder %v209_v24, 0.0 }
  0x40   :  { %v160_v17 = vmul.f32 %v1427_v42, %v1153_v62  ;;  %v210_v43 = vadd.f32 %v1184_v15, %v158_v21  ;;  %v161_v44 = vmul.f32 %v1428_v28, %v1153_v62  ;;  %v301_v26 = vmul.f32 0.2, %v209_v24 }
  0x41   :  { %v162_v32 = vmul.f32 %v1429_v31, %v1153_v62  ;;  %v211_v41 = vadd.f32 %v1184_v15, %v159_v23  ;;  %933 = vst [vmem:[%s1423_s5 + $0x60] sm:$0xff] %v848_v33   ;;  %v1430_v57 = vunpack.c.l.bf16 %v1093_v47  ;;  %v1431_v34 = vunpack.c.h.bf16 %v1093_v47 }
  0x42   :  { %vm256_vm11 = vcmp.gt.f32.partialorder %v210_v43, 0.0  ;;  %v302_v36 = vmul.f32 0.2, %v210_v43  ;;  %v212_v55 = vadd.f32 %v1184_v15, %v160_v17  ;;  %v213_v19 = vadd.f32 %v1184_v15, %v161_v44 }
  0x43   :  { %v347_v11 = vsel %vm255_vm10, %v209_v24, %v301_v26  ;;  %vm257_vm12 = vcmp.gt.f32.partialorder %v211_v41, 0.0  ;;  %v303_v20 = vmul.f32 0.2, %v211_v41  ;;  %v214_v46 = vadd.f32 %v1184_v15, %v162_v32 }
  0x44   :  { %v348_v9 = vsel %vm256_vm11, %v210_v43, %v302_v36  ;;  %vm258_vm13 = vcmp.gt.f32.partialorder %v212_v55, 0.0  ;;  %v304_v16 = vmul.f32 0.2, %v212_v55  ;;  %vm259_vm14 = vcmp.gt.f32.partialorder %v213_v19, 0.0 }
  0x45   :  { %v853_v27 = vpack.c.bf16 %v348_v9, %v347_v11  ;;  %v349_v30 = vsel %vm257_vm12, %v211_v41, %v303_v20  ;;  %vm260_vm15 = vcmp.gt.f32.partialorder %v214_v46, 0.0  ;;  %v305_v45 = vmul.f32 0.2, %v213_v19 }
  0x46   :  { %v350_v29 = vsel %vm258_vm13, %v212_v55, %v304_v16  ;;  %v306_v49 = vmul.f32 0.2, %v214_v46  ;;  %v163_v50 = vmul.f32 %v1430_v57, %v1153_v62  ;;  %v164_v51 = vmul.f32 %v1431_v34, %v1153_v62 }
  0x47   :  { %934 = vst [vmem:[%s1423_s5 + $0x68] sm:$0xff] %v853_v27   ;;  %v858_v48 = vpack.c.bf16 %v350_v29, %v349_v30  ;;  %v351_v52 = vsel %vm259_vm14, %v213_v19, %v305_v45  ;;  %v1432_v60 = vunpack.c.l.bf16 %v1105_v53  ;;  %v1433_v3 = vunpack.c.h.bf16 %v1105_v53 }
  0x48   :  { %v352_v54 = vsel %vm260_vm15, %v214_v46, %v306_v49  ;;  %v215_v63 = vadd.f32 %v1184_v15, %v163_v50  ;;  %v216_v47 = vadd.f32 %v1184_v15, %v164_v51  ;;  %v1434_v12 = vunpack.c.l.bf16 %v1114_v58 }
  0x49   :  { %v165_v2 = vmul.f32 %v1432_v60, %v1153_v62  ;;  %v166_v35 = vmul.f32 %v1433_v3, %v1153_v62  ;;  %935 = vst [vmem:[%s1423_s5 + $0x70] sm:$0xff] %v858_v48   ;;  %v863_v14 = vpack.c.bf16 %v352_v54, %v351_v52  ;;  %v1435_v53 = vunpack.c.h.bf16 %v1114_v58 }
  0x4a   :  { %v167_v18 = vmul.f32 %v1434_v12, %v1153_v62  ;;  %vm261_vm0 = vcmp.gt.f32.partialorder %v215_v63, 0.0  ;;  %vm262_vm1 = vcmp.gt.f32.partialorder %v216_v47, 0.0  ;;  %v307_v38 = vmul.f32 0.2, %v215_v63 }
  0x4b   :  { %v217_v37 = vadd.f32 %v1184_v15, %v165_v2  ;;  %v218_v8 = vadd.f32 %v1184_v15, %v166_v35  ;;  %v168_v22 = vmul.f32 %v1435_v53, %v1153_v62  ;;  %v308_v10 = vmul.f32 0.2, %v216_v47  ;;  %936 = vst [vmem:[%s1423_s5 + $0x78] sm:$0xff] %v863_v14  }
  0x4c   :  { %v353_v13 = vsel %vm261_vm0, %v215_v63, %v307_v38  ;;  %v219_v25 = vadd.f32 %v1184_v15, %v167_v18  ;;  %v1436_v40 = vunpack.c.l.bf16 %v1119_v59  ;;  %v170_v32 = vmul.f32 %v772_v4, %v1153_v62 }
  0x4d   :  { %vm263_vm2 = vcmp.gt.f32.partialorder %v217_v37, 0.0  ;;  %vm264_vm3 = vcmp.gt.f32.partialorder %v218_v8, 0.0  ;;  %v309_v39 = vmul.f32 0.2, %v217_v37  ;;  %v310_v21 = vmul.f32 0.2, %v218_v8 }
  0x4e   :  { %v354_v24 = vsel %vm262_vm1, %v216_v47, %v308_v10  ;;  %v220_v23 = vadd.f32 %v1184_v15, %v168_v22  ;;  %v169_v43 = vmul.f32 %v1436_v40, %v1153_v62  ;;  %vm265_vm4 = vcmp.gt.f32.partialorder %v219_v25, 0.0 }
  0x4f   :  { %v868_v58 = vpack.c.bf16 %v354_v24, %v353_v13  ;;  %v355_v42 = vsel %vm263_vm2, %v217_v37, %v309_v39  ;;  %v356_v17 = vsel %vm264_vm3, %v218_v8, %v310_v21  ;;  %v311_v44 = vmul.f32 0.2, %v219_v25 }
  0x50   :  { %v873_v28 = vpack.c.bf16 %v356_v17, %v355_v42  ;;  %vm266_vm5 = vcmp.gt.f32.partialorder %v220_v23, 0.0  ;;  %v312_v31 = vmul.f32 0.2, %v220_v23  ;;  %v221_v33 = vadd.f32 %v1184_v15, %v169_v43 }
  0x51   :  { %937 = vst [vmem:[%s1423_s5 + $0x80] sm:$0xff] %v868_v58   ;;  %v171_v26 = vmul.f32 %v775_v61, %v1153_v62  ;;  %v357_v41 = vsel %vm265_vm4, %v219_v25, %v311_v44  ;;  %v1437_v36 = vunpack.c.h.bf16 %v1128_v1  ;;  %v173_v59 = vmul.f32 %v779_v56, %v1153_v62 }
  0x52   :  { %938 = vst [vmem:[%s1423_s5 + $0x88] sm:$0xff] %v873_v28   ;;  %v1438_v4 = vunpack.c.h.bf16 %v1136_v7  ;;  %v358_v11 = vsel %vm266_vm5, %v220_v23, %v312_v31  ;;  %v222_v61 = vadd.f32 %v1184_v15, %v170_v32  ;;  %vm267_vm6 = vcmp.gt.f32.partialorder %v221_v33, 0.0 }
  0x53   :  { %v172_v55 = vmul.f32 %v1437_v36, %v1153_v62  ;;  %v313_v20 = vmul.f32 0.2, %v221_v33  ;;  %v878_v46 = vpack.c.bf16 %v358_v11, %v357_v41  ;;  %v223_v9 = vadd.f32 %v1184_v15, %v171_v26 }
  0x54   :  { %v174_v19 = vmul.f32 %v1438_v4, %v1153_v62  ;;  %v225_v1 = vadd.f32 %v1184_v15, %v173_v59  ;;  %vm268_vm7 = vcmp.gt.f32.partialorder %v222_v61, 0.0  ;;  %v314_v27 = vmul.f32 0.2, %v222_v61 }
  0x55   :  { %v224_v16 = vadd.f32 %v1184_v15, %v172_v55  ;;  %v359_v30 = vsel %vm267_vm6, %v221_v33, %v313_v20  ;;  %939 = vst [vmem:[%s1423_s5 + $0x90] sm:$0xff] %v878_v46   ;;  %vm269_vm8 = vcmp.gt.f32.partialorder %v223_v9, 0.0  ;;  %v315_v7 = vmul.f32 0.2, %v223_v9 }
  0x56   :  { %v226_v56 = vadd.f32 %v1184_v15, %v174_v19  ;;  %v360_v29 = vsel %vm268_vm7, %v222_v61, %v314_v27  ;;  %vm271_vm10 = vcmp.gt.f32.partialorder %v225_v1, 0.0  ;;  %v317_v49 = vmul.f32 0.2, %v225_v1 }
  0x57   :  { %vm270_vm9 = vcmp.gt.f32.partialorder %v224_v16, 0.0  ;;  %v316_v45 = vmul.f32 0.2, %v224_v16  ;;  %v883_v57 = vpack.c.bf16 %v360_v29, %v359_v30  ;;  %v361_v50 = vsel %vm269_vm8, %v223_v9, %v315_v7 }
  0x58   :  { %vm272_vm11 = vcmp.gt.f32.partialorder %v226_v56, 0.0  ;;  %v318_v51 = vmul.f32 0.2, %v226_v56  ;;  %v363_v52 = vsel %vm271_vm10, %v225_v1, %v317_v49  ;;  %v175_v60 = vmul.f32 %v783_v5, %v1153_v62 }
  0x59   :  { %v362_v34 = vsel %vm270_vm9, %v224_v16, %v316_v45  ;;  %v176_v2 = vmul.f32 %v784_v6, %v1153_v62  ;;  %940 = vst [vmem:[%s1423_s5 + $0x98] sm:$0xff] %v883_v57  }
  0x5a   :  { %v888_v48 = vpack.c.bf16 %v362_v34, %v361_v50  ;;  %v364_v3 = vsel %vm272_vm11, %v226_v56, %v318_v51  ;;  %v227_v54 = vadd.f32 %v1184_v15, %v175_v60 }
  0x5b   :  { %v893_v35 = vpack.c.bf16 %v364_v3, %v363_v52  ;;  %v228_v63 = vadd.f32 %v1184_v15, %v176_v2 }
  0x5c   :  { %941 = vst [vmem:[%s1423_s5 + $0xa0] sm:$0xff] %v888_v48   ;;  %vm273_vm12 = vcmp.gt.f32.partialorder %v227_v54, 0.0  ;;  %v319_v62 = vmul.f32 0.2, %v227_v54 }
  0x5d   :  { %942 = vst [vmem:[%s1423_s5 + $0xa8] sm:$0xff] %v893_v35   ;;  %vm274_vm13 = vcmp.gt.f32.partialorder %v228_v63, 0.0  ;;  %v320_v0 = vmul.f32 0.2, %v228_v63 }
  0x5e   :  { %v365_v5 = vsel %vm273_vm12, %v227_v54, %v319_v62 }
  0x5f   :  { %v366_v6 = vsel %vm274_vm13, %v228_v63, %v320_v0 }
  0x60   :  { %v898_v47 = vpack.c.bf16 %v366_v6, %v365_v5 }
  0x62   :  { %943 = vst [vmem:[%s1423_s5 + $0xb0] sm:$0xff] %v898_v47  }

// kernel: critic_forward.9
= control target key start
LH: loop header
LB: loop body
LE: loop exit
PB: predicated region body
PF: predicated region fallthrough
CT: control target
= control target key end

     0   :  { %s1510_s1 = inlined_call_operand.vmem [shape: bf16[1024,128], index: 1, kind: input, shape index: {}]   ;;  %s1511_s0 = inlined_call_operand.vmem [shape: bf16[48,1024], index: 0, kind: input, shape index: {}]   ;;  %s1512_s2 = inlined_call_operand.vmem [shape: f32[1,128], index: 2, kind: input, shape index: {}]   ;;  %s1513_s3 = inlined_call_operand.vmem [shape: f32[48,128], index: 3, kind: output, shape index: {}]  }
   0x1   :  { %v1141_v0 = vld [vmem:[%s1510_s1 + $0x40] sm:$0xff]   ;;  %v1145_v4 = vld [vmem:[%s1510_s1 + $0x48] sm:$0xff]   ;;  %v1149_v8 = vld [vmem:[%s1510_s1 + $0x50] sm:$0xff]  }
   0x2   :  { %v1142_v1 = vld [vmem:[%s1510_s1 + $0xc0] sm:$0xff]   ;;  %1005 = vmatprep.subr.bf16.mxu0 %v1141_v0  ;;  %v1146_v5 = vld [vmem:[%s1510_s1 + $0xc8] sm:$0xff]   ;;  %v1150_v9 = vld [vmem:[%s1510_s1 + $0xd0] sm:$0xff]  }
   0x3   :  { %v1143_v2 = vld [vmem:[%s1510_s1] sm:$0xff]   ;;  %1039 = vmatprep.subr.bf16.mxu1 %v1142_v1  ;;  %v1147_v6 = vld [vmem:[%s1510_s1 + $0x8] sm:$0xff]   ;;  %v1151_v10 = vld [vmem:[%s1510_s1 + $0x10] sm:$0xff]  }
   0x4   :  { %v1144_v3 = vld [vmem:[%s1510_s1 + $0x80] sm:$0xff]   ;;  %1006 = vmatpush3.bf16.msra.mxu0 %v1143_v2  ;;  %v1148_v7 = vld [vmem:[%s1510_s1 + $0x88] sm:$0xff]   ;;  %v1152_v11 = vld [vmem:[%s1510_s1 + $0x90] sm:$0xff]  }
   0x5   :  { %1040 = vmatpush3.bf16.msra.mxu1 %v1144_v3  ;;  %1007 = vmatprep.subr.bf16.mxu0 %v1145_v4  ;;  %v1153_v12 = vld [vmem:[%s1510_s1 + $0x58] sm:$0xff]   ;;  %v1157_v16 = vld [vmem:[%s1510_s1 + $0x60] sm:$0xff]   ;;  %v1161_v20 = vld [vmem:[%s1510_s1 + $0x68] sm:$0xff]  }
   0x6   :  { %1041 = vmatprep.subr.bf16.mxu1 %v1146_v5  ;;  %v1154_v13 = vld [vmem:[%s1510_s1 + $0xd8] sm:$0xff]   ;;  %v1158_v17 = vld [vmem:[%s1510_s1 + $0xe0] sm:$0xff]   ;;  %v1162_v21 = vld [vmem:[%s1510_s1 + $0xe8] sm:$0xff]  }
   0x7   :  { %v1155_v14 = vld [vmem:[%s1510_s1 + $0x18] sm:$0xff]   ;;  %v1159_v18 = vld [vmem:[%s1510_s1 + $0x20] sm:$0xff]   ;;  %v1163_v22 = vld [vmem:[%s1510_s1 + $0x28] sm:$0xff]  }
   0x8   :  { %1008 = vmatpush3.bf16.msra.mxu0 %v1147_v6  ;;  %v1156_v15 = vld [vmem:[%s1510_s1 + $0x98] sm:$0xff]   ;;  %v1160_v19 = vld [vmem:[%s1510_s1 + $0xa0] sm:$0xff]   ;;  %v1164_v23 = vld [vmem:[%s1510_s1 + $0xa8] sm:$0xff]  }
   0x9   :  { %1042 = vmatpush3.bf16.msra.mxu1 %v1148_v7  ;;  %1009 = vmatprep.subr.bf16.mxu0 %v1149_v8  ;;  %v1165_v24 = vld [vmem:[%s1510_s1 + $0x70] sm:$0xff]   ;;  %v1169_v28 = vld [vmem:[%s1510_s1 + $0x78] sm:$0xff]   ;;  %v15_v32 = vld [vmem:[%s1511_s0] sm:$0xff] }
   0xa   :  { %1043 = vmatprep.subr.bf16.mxu1 %v1150_v9  ;;  %v1166_v25 = vld [vmem:[%s1510_s1 + $0xf0] sm:$0xff]   ;;  %v1170_v29 = vld [vmem:[%s1510_s1 + $0xf8] sm:$0xff]   ;;  %v19_v33 = vld [vmem:[%s1511_s0 + $0x20] sm:$0xff] }
   0xb   :  { %v1167_v26 = vld [vmem:[%s1510_s1 + $0x30] sm:$0xff]   ;;  %v1171_v30 = vld [vmem:[%s1510_s1 + $0x38] sm:$0xff]   ;;  %v16_v34 = vld [vmem:[%s1511_s0 + $0x8] sm:$0xff]  ;;  %v917_v35 = vcombine.low %v15_v32, %v19_v33  ;;  %v918_v36 = vcombine.high %v15_v32, %v19_v33 }
   0xc   :  { %1010 = vmatpush3.bf16.msra.mxu0 %v1151_v10  ;;  %v1168_v27 = vld [vmem:[%s1510_s1 + $0xb0] sm:$0xff]   ;;  %v1172_v31 = vld [vmem:[%s1510_s1 + $0xb8] sm:$0xff]   ;;  %v20_v37 = vld [vmem:[%s1511_s0 + $0x28] sm:$0xff] }
   0xd   :  { %1044 = vmatpush3.bf16.msra.mxu1 %v1152_v11  ;;  %1011 = vmatprep.subr.bf16.mxu0 %v1153_v12  ;;  %v919_v38 = vcombine.low %v16_v34, %v20_v37  ;;  %v920_v39 = vcombine.high %v16_v34, %v20_v37  ;;  %v1173_v40 = vld [vmem:[%s1510_s1 + $0x140] sm:$0xff]   ;;  %v1177_v44 = vld [vmem:[%s1510_s1 + $0x148] sm:$0xff]   ;;  %v1181_v48 = vld [vmem:[%s1510_s1 + $0x150] sm:$0xff]  }
   0xe   :  { %1045 = vmatprep.subr.bf16.mxu1 %v1154_v13  ;;  %710 = vmatprep.mubr.bf16.mxu0 %v918_v36  ;;  %v1174_v41 = vld [vmem:[%s1510_s1 + $0x1c0] sm:$0xff]   ;;  %v1178_v45 = vld [vmem:[%s1510_s1 + $0x1c8] sm:$0xff]   ;;  %v1182_v49 = vld [vmem:[%s1510_s1 + $0x1d0] sm:$0xff]  }
   0xf   :  { %767 = vmatprep.mubr.bf16.mxu1 %v920_v39  ;;  %v1175_v42 = vld [vmem:[%s1510_s1 + $0x100] sm:$0xff]   ;;  %v1179_v46 = vld [vmem:[%s1510_s1 + $0x108] sm:$0xff]   ;;  %v1183_v50 = vld [vmem:[%s1510_s1 + $0x110] sm:$0xff]  }
  0x10   :  { %1012 = vmatpush3.bf16.msra.mxu0 %v1155_v14  ;;  %v1176_v43 = vld [vmem:[%s1510_s1 + $0x180] sm:$0xff]   ;;  %v1180_v47 = vld [vmem:[%s1510_s1 + $0x188] sm:$0xff]   ;;  %v1184_v51 = vld [vmem:[%s1510_s1 + $0x190] sm:$0xff]  }
  0x11   :  { %1046 = vmatpush3.bf16.msra.mxu1 %v1156_v15  ;;  %1013 = vmatprep.subr.bf16.mxu0 %v1157_v16  ;;  %v23_v52 = vld [vmem:[%s1511_s0 + $0x40] sm:$0xff]  ;;  %v1185_v55 = vld [vmem:[%s1510_s1 + $0x158] sm:$0xff]   ;;  %v24_v60 = vld [vmem:[%s1511_s0 + $0x48] sm:$0xff] }
  0x12   :  { %1047 = vmatprep.subr.bf16.mxu1 %v1158_v17  ;;  %v27_v53 = vld [vmem:[%s1511_s0 + $0x60] sm:$0xff]  ;;  %v1186_v57 = vld [vmem:[%s1510_s1 + $0x1d8] sm:$0xff]   ;;  %v28_v61 = vld [vmem:[%s1511_s0 + $0x68] sm:$0xff] }
  0x13   :  { %v926_v54 = vcombine.high %v23_v52, %v27_v53  ;;  %v925_v56 = vcombine.low %v23_v52, %v27_v53  ;;  %v1187_v58 = vld [vmem:[%s1510_s1 + $0x118] sm:$0xff]   ;;  %v928_v62 = vcombine.high %v24_v60, %v28_v61  ;;  %v927_v63 = vcombine.low %v24_v60, %v28_v61  ;;  %v1189_v0 = vld [vmem:[%s1510_s1 + $0x160] sm:$0xff]   ;;  %v1193_v7 = vld [vmem:[%s1510_s1 + $0x168] sm:$0xff]  }
  0x14   :  { %1014 = vmatpush3.bf16.msra.mxu0 %v1159_v18  ;;  %v1188_v59 = vld [vmem:[%s1510_s1 + $0x198] sm:$0xff]   ;;  %v1190_v1 = vld [vmem:[%s1510_s1 + $0x1e0] sm:$0xff]   ;;  %v1194_v9 = vld [vmem:[%s1510_s1 + $0x1e8] sm:$0xff]  }
  0x15   :  { %1048 = vmatpush3.bf16.msra.mxu1 %v1160_v19  ;;  %1015 = vmatprep.subr.bf16.mxu0 %v1161_v20  ;;  %v1191_v2 = vld [vmem:[%s1510_s1 + $0x120] sm:$0xff]   ;;  %v1195_v10 = vld [vmem:[%s1510_s1 + $0x128] sm:$0xff]   ;;  %v1197_v16 = vld [vmem:[%s1510_s1 + $0x170] sm:$0xff]  }
  0x16   :  { %1049 = vmatprep.subr.bf16.mxu1 %v1162_v21  ;;  %v1192_v3 = vld [vmem:[%s1510_s1 + $0x1a0] sm:$0xff]   ;;  %v1196_v11 = vld [vmem:[%s1510_s1 + $0x1a8] sm:$0xff]   ;;  %v1198_v17 = vld [vmem:[%s1510_s1 + $0x1f0] sm:$0xff]  }
  0x17   :  { %v31_v4 = vld [vmem:[%s1511_s0 + $0x80] sm:$0xff]  ;;  %v32_v12 = vld [vmem:[%s1511_s0 + $0x88] sm:$0xff]  ;;  %v1199_v18 = vld [vmem:[%s1510_s1 + $0x130] sm:$0xff]  }
  0x18   :  { %1016 = vmatpush3.bf16.msra.mxu0 %v1163_v22  ;;  %v35_v5 = vld [vmem:[%s1511_s0 + $0xa0] sm:$0xff]  ;;  %v36_v13 = vld [vmem:[%s1511_s0 + $0xa8] sm:$0xff]  ;;  %v1200_v19 = vld [vmem:[%s1510_s1 + $0x1b0] sm:$0xff]  }
  0x19   :  { %1050 = vmatpush3.bf16.msra.mxu1 %v1164_v23  ;;  %1017 = vmatprep.subr.bf16.mxu0 %v1165_v24  ;;  %v934_v6 = vcombine.high %v31_v4, %v35_v5  ;;  %v933_v8 = vcombine.low %v31_v4, %v35_v5  ;;  %v936_v14 = vcombine.high %v32_v12, %v36_v13  ;;  %v1201_v20 = vld [vmem:[%s1510_s1 + $0x178] sm:$0xff]   ;;  %v17_v24 = vld [vmem:[%s1511_s0 + $0x10] sm:$0xff] }
  0x1a   :  { %1051 = vmatprep.subr.bf16.mxu1 %v1166_v25  ;;  %v935_v15 = vcombine.low %v32_v12, %v36_v13  ;;  %v1202_v21 = vld [vmem:[%s1510_s1 + $0x1f8] sm:$0xff]   ;;  %v21_v25 = vld [vmem:[%s1511_s0 + $0x30] sm:$0xff] }
  0x1b   :  { %v1203_v22 = vld [vmem:[%s1510_s1 + $0x138] sm:$0xff]   ;;  %v37_v39 = vld [vmem:[%s1511_s0 + $0xb0] sm:$0xff] }
  0x1c   :  { %1018 = vmatpush3.bf16.msra.mxu0 %v1167_v26  ;;  %v1204_v23 = vld [vmem:[%s1510_s1 + $0x1b8] sm:$0xff]  }
  0x1d   :  { %1052 = vmatpush3.bf16.msra.mxu1 %v1168_v27  ;;  %1019 = vmatprep.subr.bf16.mxu0 %v1169_v28  ;;  %v18_v26 = vld [vmem:[%s1511_s0 + $0x18] sm:$0xff]  ;;  %v921_v27 = vcombine.low %v17_v24, %v21_v25  ;;  %v922_v28 = vcombine.high %v17_v24, %v21_v25 }
  0x1e   :  { %1053 = vmatprep.subr.bf16.mxu1 %v1170_v29  ;;  %v22_v29 = vld [vmem:[%s1511_s0 + $0x38] sm:$0xff] }
  0x1f   :  { %v923_v32 = vcombine.low %v18_v26, %v22_v29  ;;  %v924_v33 = vcombine.high %v18_v26, %v22_v29  ;;  %v30_v36 = vld [vmem:[%s1511_s0 + $0x78] sm:$0xff] }
  0x20   :  { %1020 = vmatpush3.bf16.msra.mxu0 %v1171_v30  ;;  %v25_v30 = vld [vmem:[%s1511_s0 + $0x50] sm:$0xff] }
  0x21   :  { %1054 = vmatpush3.bf16.msra.mxu1 %v1172_v31  ;;  %1073 = vmatprep.subr.bf16.mxu0 %v1173_v40  ;;  %v29_v31 = vld [vmem:[%s1511_s0 + $0x70] sm:$0xff]  ;;  %v34_v40 = vld [vmem:[%s1511_s0 + $0x98] sm:$0xff] }
  0x22   :  { %1107 = vmatprep.subr.bf16.mxu1 %v1174_v41  ;;  %v930_v34 = vcombine.high %v25_v30, %v29_v31  ;;  %v38_v41 = vld [vmem:[%s1511_s0 + $0xb8] sm:$0xff] }
  0x23   :  { %711 = vmatmul.mubr.bf16.vlgmr.msra.gmra.mrb[0].mxu0 %v917_v35  ;;  %v26_v35 = vld [vmem:[%s1511_s0 + $0x58] sm:$0xff] }
  0x24   :  { %768 = vmatmul.mubr.bf16.vlgmr.msra.gmra.mrb[0].mxu1 %v919_v38  ;;  %1074 = vmatpush3.bf16.msra.mxu0 %v1175_v42  ;;  %v932_v37 = vcombine.high %v26_v35, %v30_v36  ;;  %v33_v38 = vld [vmem:[%s1511_s0 + $0x90] sm:$0xff]  ;;  %v929_v42 = vcombine.low %v25_v30, %v29_v31 }
  0x25   :  { %1108 = vmatpush3.bf16.msra.mxu1 %v1176_v43  ;;  %1075 = vmatprep.subr.bf16.mxu0 %v1177_v44  ;;  %v931_v43 = vcombine.low %v26_v35, %v30_v36  ;;  %v938_v44 = vcombine.high %v33_v38, %v37_v39 }
  0x26   :  { %1109 = vmatprep.subr.bf16.mxu1 %v1178_v45  ;;  %718 = vmatprep.mubr.bf16.mxu0 %v926_v54  ;;  %v940_v45 = vcombine.high %v34_v40, %v38_v41 }
  0x27   :  { %775 = vmatprep.mubr.bf16.mxu1 %v928_v62 }
  0x28   :  { %1076 = vmatpush3.bf16.msra.mxu0 %v1179_v46  ;;  %v937_v46 = vcombine.low %v33_v38, %v37_v39 }
  0x29   :  { %1110 = vmatpush3.bf16.msra.mxu1 %v1180_v47  ;;  %1077 = vmatprep.subr.bf16.mxu0 %v1181_v48  ;;  %v939_v47 = vcombine.low %v34_v40, %v38_v41 }
  0x2a   :  { %1111 = vmatprep.subr.bf16.mxu1 %v1182_v49 }
  0x2b   :  { %719 = vmatmul.mubr.bf16.gmra.mrb[4].mxu0 %v925_v56 }
  0x2c   :  { %1078 = vmatpush3.bf16.msra.mxu0 %v1183_v50  ;;  %776 = vmatmul.mubr.bf16.gmra.mrb[4].mxu1 %v927_v63  ;;  %v916_v50 = vld [vmem:[%s1512_s2] ss:$0 sm:$0xff] }
  0x2d   :  { %1112 = vmatpush3.bf16.msra.mxu1 %v1184_v51  ;;  %1079 = vmatprep.subr.bf16.mxu0 %v1185_v55 }
  0x2e   :  { %1113 = vmatprep.subr.bf16.mxu1 %v1186_v57  ;;  %726 = vmatprep.mubr.bf16.mxu0 %v934_v6 }
  0x2f   :  { %783 = vmatprep.mubr.bf16.mxu1 %v936_v14 }
  0x30   :  { %1080 = vmatpush3.bf16.msra.mxu0 %v1187_v58 }
  0x31   :  { %1114 = vmatpush3.bf16.msra.mxu1 %v1188_v59  ;;  %1081 = vmatprep.subr.bf16.mxu0 %v1189_v0 }
  0x32   :  { %1115 = vmatprep.subr.bf16.mxu1 %v1190_v1 }
  0x33   :  { %727 = vmatmul.mubr.bf16.gmra.mrb[8].mxu0 %v933_v8 }
  0x34   :  { %1082 = vmatpush3.bf16.msra.mxu0 %v1191_v2  ;;  %784 = vmatmul.mubr.bf16.gmra.mrb[8].mxu1 %v935_v15 }
  0x35   :  { %1116 = vmatpush3.bf16.msra.mxu1 %v1192_v3  ;;  %1083 = vmatprep.subr.bf16.mxu0 %v1193_v7 }
  0x36   :  { %1117 = vmatprep.subr.bf16.mxu1 %v1194_v9  ;;  %824 = vmatprep.mubr.bf16.mxu0 %v922_v28 }
  0x37   :  { %881 = vmatprep.mubr.bf16.mxu1 %v924_v33 }
  0x38   :  { %1084 = vmatpush3.bf16.msra.mxu0 %v1195_v10 }
  0x39   :  { %1118 = vmatpush3.bf16.msra.mxu1 %v1196_v11  ;;  %1085 = vmatprep.subr.bf16.mxu0 %v1197_v16 }
  0x3a   :  { %1119 = vmatprep.subr.bf16.mxu1 %v1198_v17 }
  0x3c   :  { %1086 = vmatpush3.bf16.msra.mxu0 %v1199_v18 }
  0x3d   :  { %1120 = vmatpush3.bf16.msra.mxu1 %v1200_v19  ;;  %1087 = vmatprep.subr.bf16.mxu0 %v1201_v20 }
  0x3e   :  { %1121 = vmatprep.subr.bf16.mxu1 %v1202_v21 }
  0x40   :  { %1088 = vmatpush3.bf16.msra.mxu0 %v1203_v22 }
  0x41   :  { %1122 = vmatpush3.bf16.msra.mxu1 %v1204_v23 }
  0x43   :  { %825 = vmatmul.mubr.bf16.vlgmr.msra.gmra.mrb[12].mxu0 %v921_v27 }
  0x44   :  { %882 = vmatmul.mubr.bf16.vlgmr.msra.gmra.mrb[12].mxu1 %v923_v32  ;;  %832 = vmatprep.mubr.bf16.mxu0 %v930_v34 }
  0x45   :  { %889 = vmatprep.mubr.bf16.mxu1 %v932_v37 }
  0x4b   :  { %833 = vmatmul.mubr.bf16.gmra.mrb[16].mxu0 %v929_v42 }
  0x4c   :  { %890 = vmatmul.mubr.bf16.gmra.mrb[16].mxu1 %v931_v43  ;;  %840 = vmatprep.mubr.bf16.mxu0 %v938_v44 }
  0x4d   :  { %897 = vmatprep.mubr.bf16.mxu1 %v940_v45 }
  0x53   :  { %841 = vmatmul.mubr.bf16.gmra.mrb[20].mxu0 %v937_v46 }
  0x54   :  { %898 = vmatmul.mubr.bf16.gmra.mrb[20].mxu1 %v939_v47 }
  0xf6   :  { %v1021_v48 = vpop.f32.mrb[0].mxu0 }
  0xf7   :  { %v1055_v49 = vpop.f32.mrb[0].mxu1  ;;  %v1022_v51 = vpop.f32.mrb[1].mxu0 }
  0xf8   :  { %v1023_v52 = vadd.f32 %v1022_v51, %v1021_v48  ;;  %v1056_v53 = vpop.f32.mrb[1].mxu1  ;;  %v1024_v54 = vpop.f32.mrb[2].mxu0 }
  0xf9   :  { %v1057_v55 = vadd.f32 %v1056_v53, %v1055_v49  ;;  %v1058_v56 = vpop.f32.mrb[2].mxu1  ;;  %v1025_v57 = vpop.f32.mrb[3].mxu0 }
  0xfa   :  { %v713_v58 = vadd.f32 %v1023_v52, %v916_v50  ;;  %v1026_v59 = vadd.f32 %v1025_v57, %v1024_v54  ;;  %v1059_v60 = vpop.f32.mrb[3].mxu1 }
  0xfb   :  { %v1060_v61 = vadd.f32 %v1059_v60, %v1058_v56 }
  0xfc   :  { %v770_v62 = vadd.f32 %v1057_v55, %v713_v58  ;;  %v716_v63 = vadd.f32 %v1026_v59, %v916_v50 }
  0xfe   :  { %v773_v0 = vadd.f32 %v1060_v61, %v716_v63  ;;  %v1027_v1 = vpop.f32.mrb[4].mxu0 }
  0xff   :  { %v1028_v2 = vpop.f32.mrb[5].mxu0  ;;  %v1061_v8 = vpop.f32.mrb[4].mxu1 }
 0x100   :  { %v1029_v3 = vadd.f32 %v1028_v2, %v1027_v1  ;;  %v1030_v4 = vpop.f32.mrb[6].mxu0  ;;  %v1062_v9 = vpop.f32.mrb[5].mxu1 }
 0x101   :  { %v1031_v5 = vpop.f32.mrb[7].mxu0  ;;  %v1063_v11 = vadd.f32 %v1062_v9, %v1061_v8  ;;  %v1064_v12 = vpop.f32.mrb[6].mxu1 }
 0x102   :  { %v1032_v6 = vadd.f32 %v1031_v5, %v1030_v4  ;;  %v721_v7 = vadd.f32 %v1029_v3, %v916_v50  ;;  %v1065_v13 = vpop.f32.mrb[7].mxu1 }
 0x103   :  { %v1066_v15 = vadd.f32 %v1065_v13, %v1064_v12 }
 0x104   :  { %v724_v10 = vadd.f32 %v1032_v6, %v916_v50  ;;  %v778_v14 = vadd.f32 %v1063_v11, %v721_v7 }
 0x106   :  { %v1033_v16 = vpop.f32.mrb[8].mxu0  ;;  %v781_v17 = vadd.f32 %v1066_v15, %v724_v10 }
 0x107   :  { %v1034_v18 = vpop.f32.mrb[9].mxu0  ;;  %v1067_v23 = vpop.f32.mrb[8].mxu1 }
 0x108   :  { %v1035_v19 = vadd.f32 %v1034_v18, %v1033_v16  ;;  %v1036_v20 = vpop.f32.mrb[10].mxu0  ;;  %v1068_v25 = vpop.f32.mrb[9].mxu1 }
 0x109   :  { %v1037_v21 = vpop.f32.mrb[11].mxu0  ;;  %v1069_v27 = vadd.f32 %v1068_v25, %v1067_v23  ;;  %v1070_v28 = vpop.f32.mrb[10].mxu1 }
 0x10a   :  { %v729_v22 = vadd.f32 %v1035_v19, %v916_v50  ;;  %v1038_v24 = vadd.f32 %v1037_v21, %v1036_v20  ;;  %v1071_v29 = vpop.f32.mrb[11].mxu1 }
 0x10b   :  { %v1072_v31 = vadd.f32 %v1071_v29, %v1070_v28 }
 0x10c   :  { %v732_v26 = vadd.f32 %v1038_v24, %v916_v50  ;;  %v786_v30 = vadd.f32 %v1069_v27, %v729_v22 }
 0x10e   :  { %v789_v32 = vadd.f32 %v1072_v31, %v732_v26 }
 0x116   :  { %v1089_v33 = vpop.f32.mrb[12].mxu0 }
 0x117   :  { %v1123_v34 = vpop.f32.mrb[12].mxu1  ;;  %v1090_v35 = vpop.f32.mrb[13].mxu0 }
 0x118   :  { %v1091_v36 = vadd.f32 %v1090_v35, %v1089_v33  ;;  %v1124_v37 = vpop.f32.mrb[13].mxu1  ;;  %v1092_v38 = vpop.f32.mrb[14].mxu0 }
 0x119   :  { %v1125_v39 = vadd.f32 %v1124_v37, %v1123_v34  ;;  %v1126_v40 = vpop.f32.mrb[14].mxu1  ;;  %v1093_v41 = vpop.f32.mrb[15].mxu0 }
 0x11a   :  { %v827_v42 = vadd.f32 %v1091_v36, %v770_v62  ;;  %v1094_v43 = vadd.f32 %v1093_v41, %v1092_v38  ;;  %v1127_v44 = vpop.f32.mrb[15].mxu1 }
 0x11b   :  { %v1128_v45 = vadd.f32 %v1127_v44, %v1126_v40 }
 0x11c   :  { %v884_v46 = vadd.f32 %v1125_v39, %v827_v42  ;;  %v830_v47 = vadd.f32 %v1094_v43, %v773_v0 }
 0x11e   :  { %906 = vst [vmem:[%s1513_s3] sm:$0xff] %v884_v46  ;;  %v887_v48 = vadd.f32 %v1128_v45, %v830_v47  ;;  %v1095_v49 = vpop.f32.mrb[16].mxu0 }
 0x11f   :  { %v1129_v50 = vpop.f32.mrb[16].mxu1  ;;  %v1096_v51 = vpop.f32.mrb[17].mxu0 }
 0x120   :  { %907 = vst [vmem:[%s1513_s3 + $0x8] sm:$0xff] %v887_v48  ;;  %v1097_v52 = vadd.f32 %v1096_v51, %v1095_v49  ;;  %v1130_v53 = vpop.f32.mrb[17].mxu1  ;;  %v1098_v54 = vpop.f32.mrb[18].mxu0 }
 0x121   :  { %v1131_v55 = vadd.f32 %v1130_v53, %v1129_v50  ;;  %v1132_v56 = vpop.f32.mrb[18].mxu1  ;;  %v1099_v57 = vpop.f32.mrb[19].mxu0 }
 0x122   :  { %v835_v58 = vadd.f32 %v1097_v52, %v778_v14  ;;  %v1100_v59 = vadd.f32 %v1099_v57, %v1098_v54  ;;  %v1133_v60 = vpop.f32.mrb[19].mxu1 }
 0x123   :  { %v1134_v61 = vadd.f32 %v1133_v60, %v1132_v56 }
 0x124   :  { %v892_v62 = vadd.f32 %v1131_v55, %v835_v58  ;;  %v838_v63 = vadd.f32 %v1100_v59, %v781_v17 }
 0x126   :  { %908 = vst [vmem:[%s1513_s3 + $0x10] sm:$0xff] %v892_v62  ;;  %v895_v0 = vadd.f32 %v1134_v61, %v838_v63  ;;  %v1101_v1 = vpop.f32.mrb[20].mxu0 }
 0x127   :  { %v1135_v2 = vpop.f32.mrb[20].mxu1  ;;  %v1102_v3 = vpop.f32.mrb[21].mxu0 }
 0x128   :  { %909 = vst [vmem:[%s1513_s3 + $0x18] sm:$0xff] %v895_v0  ;;  %v1103_v4 = vadd.f32 %v1102_v3, %v1101_v1  ;;  %v1136_v5 = vpop.f32.mrb[21].mxu1  ;;  %v1104_v6 = vpop.f32.mrb[22].mxu0 }
 0x129   :  { %v1137_v7 = vadd.f32 %v1136_v5, %v1135_v2  ;;  %v1138_v8 = vpop.f32.mrb[22].mxu1  ;;  %v1105_v9 = vpop.f32.mrb[23].mxu0 }
 0x12a   :  { %v843_v10 = vadd.f32 %v1103_v4, %v786_v30  ;;  %v1106_v11 = vadd.f32 %v1105_v9, %v1104_v6  ;;  %v1139_v12 = vpop.f32.mrb[23].mxu1 }
 0x12b   :  { %v1140_v13 = vadd.f32 %v1139_v12, %v1138_v8 }
 0x12c   :  { %v900_v14 = vadd.f32 %v1137_v7, %v843_v10  ;;  %v846_v15 = vadd.f32 %v1106_v11, %v789_v32 }
 0x12e   :  { %910 = vst [vmem:[%s1513_s3 + $0x20] sm:$0xff] %v900_v14  ;;  %v903_v16 = vadd.f32 %v1140_v13, %v846_v15 }
 0x130   :  { %911 = vst [vmem:[%s1513_s3 + $0x28] sm:$0xff] %v903_v16 }

</bundles_post_ra>
